<compile_context>
chip_gen: v7x
topology: tpu7x:2x2x1
jax: 0.10.0
libtpu: 0.0.40
codegen_flags: <defaults>
</compile_context>

<pallas_src>
import jax
import jax.numpy as jnp
from jax.experimental import pallas as pl
from jax.experimental.pallas import tpu as pltpu

IN_DIM = 3 * 32 * 32   # 3072
H1_DIM = 512
H2_DIM = 256
OUT_PAD = 128          # lane-dense output width (true output is column 0)
NEG_SLOPE = 0.2


def _discriminator_kernel(x_ref, w1_ref, b1_ref, w2_ref, b2_ref, w3_ref, b3_ref,
                          o_ref):
    # x tile: (TB, 3072) f32 from HBM; cast to bf16 in-kernel (single HBM pass).
    x = x_ref[...].astype(jnp.bfloat16)

    # Linear(3072 -> 512): bf16 MXU matmul, f32 accumulate; activation in f32.
    h1 = jnp.dot(x, w1_ref[...], preferred_element_type=jnp.float32) + b1_ref[...]
    h1 = jnp.where(h1 > 0, h1, NEG_SLOPE * h1)

    # Linear(512 -> 256).
    h2 = (jnp.dot(h1.astype(jnp.bfloat16), w2_ref[...],
                  preferred_element_type=jnp.float32) + b2_ref[...])
    h2 = jnp.where(h2 > 0, h2, NEG_SLOPE * h2)

    # Linear(256 -> 1) as a lane-dense MXU matmul against w3 zero-padded to
    # (256, 128); only column 0 carries the real logit. Full-lane stores.
    logits = (jnp.dot(h2.astype(jnp.bfloat16), w3_ref[...],
                      preferred_element_type=jnp.float32) + b3_ref[...])
    o_ref[...] = jax.nn.sigmoid(logits)


def discriminator_forward(x, params):
    """x: (B, 3, 32, 32) float32 NCHW. Returns (B, 1) float32 in (0, 1)."""
    w1, b1, w2, b2, w3, b3 = params
    B = x.shape[0]

    # Same flatten order as torch's x.view(B, -1); x stays f32 (cast in-kernel).
    x_flat = x.reshape(B, IN_DIM)
    w1_bf = w1.astype(jnp.bfloat16)                        # (3072, 512)
    w2_bf = w2.astype(jnp.bfloat16)                        # (512, 256)
    # Zero-pad w3 / b3 to a lane-dense 128-wide output; column 0 is the logit.
    w3_pad = jnp.zeros((H2_DIM, OUT_PAD), jnp.float32).at[:, :1].set(
        w3.reshape(H2_DIM, 1)).astype(jnp.bfloat16)        # (256, 128) bf16
    b3_pad = jnp.zeros((1, OUT_PAD), jnp.float32).at[:, :1].set(
        b3.reshape(1, 1))                                  # (1, 128)   f32

    # Batch tile selection:
    #   B <= 8          -> one 8-row tile.
    #   8 < B <= 1024   -> two-ish tiles (round_up(ceil(B/2), 8)) so the
    #                      "parallel" axis shards across both v7x TensorCores.
    #   B > 1024        -> 512-row tiles (amortizes per-step overhead).
    TB_MAX = 512
    if B <= 8:
        TB = 8
    elif B <= 2 * TB_MAX:
        TB = ((pl.cdiv(B, 2) + 7) // 8) * 8
    else:
        TB = TB_MAX
    n_tiles = pl.cdiv(B, TB)
    B_pad = n_tiles * TB
    if B_pad != B:
        x_flat = jnp.pad(x_flat, ((0, B_pad - B), (0, 0)))

    flops = 2 * B_pad * (IN_DIM * H1_DIM + H1_DIM * H2_DIM + H2_DIM * OUT_PAD)
    bytes_accessed = (
        B_pad * IN_DIM * 4                                    # x (f32, single pass)
        + w1_bf.size * 2 + w2_bf.size * 2 + w3_pad.size * 2   # bf16 weights
        + b1.size * 4 + b2.size * 4 + b3_pad.size * 4         # f32 biases
        + B_pad * OUT_PAD * 4)                                # output
    cost = pl.CostEstimate(flops=flops, transcendentals=B_pad * OUT_PAD,
                           bytes_accessed=bytes_accessed)

    # Weights/biases have constant index_maps -> single-buffered (saves VMEM).
    resident = dict(pipeline_mode=pl.Buffered(1))

    grid_spec = pltpu.PrefetchScalarGridSpec(
        num_scalar_prefetch=0,
        grid=(n_tiles,),
        in_specs=[
            pl.BlockSpec((TB, IN_DIM), lambda i: (i, 0)),                 # x tile (streamed, f32)
            pl.BlockSpec((IN_DIM, H1_DIM), lambda i: (0, 0), **resident),  # w1 (resident)
            pl.BlockSpec((1, H1_DIM), lambda i: (0, 0), **resident),       # b1
            pl.BlockSpec((H1_DIM, H2_DIM), lambda i: (0, 0), **resident),  # w2
            pl.BlockSpec((1, H2_DIM), lambda i: (0, 0), **resident),       # b2
            pl.BlockSpec((H2_DIM, OUT_PAD), lambda i: (0, 0), **resident),  # w3 (padded)
            pl.BlockSpec((1, OUT_PAD), lambda i: (0, 0), **resident),      # b3 (padded)
        ],
        out_specs=pl.BlockSpec((TB, OUT_PAD), lambda i: (i, 0)),
    )

    out = pl.pallas_call(
        _discriminator_kernel,
        out_shape=jax.ShapeDtypeStruct((B_pad, OUT_PAD), jnp.float32),
        grid_spec=grid_spec,
        compiler_params=pltpu.CompilerParams(
            dimension_semantics=("parallel",),   # batch axis -> both v7x TCs
            vmem_limit_bytes=48 * 1024 * 1024),  # fits f32 x tiles at TB=512 everywhere
        cost_estimate=cost,
    )(x_flat, w1_bf, b1, w2_bf, b2, w3_pad, b3_pad)

    return out[:B, :1]


def init_params(key):
    """Deterministic synthetic parameters matching the torch module's shapes.

    Torch nn.Linear stores weight as (out, in); we keep (in, out) so the kernel
    can do x @ W directly. Biases kept 2-D (1, out) for clean broadcasting.
    Parameters are f32 (like the torch module); the wrapper casts the matmul
    operands to bf16.
    """
    k1, k2, k3, k4, k5, k6 = jax.random.split(key, 6)
    dims = [(IN_DIM, H1_DIM), (H1_DIM, H2_DIM), (H2_DIM, 1)]
    params = []
    for (fan_in, fan_out), kw, kb in zip(dims, (k1, k2, k3), (k4, k5, k6)):
        bound = 1.0 / jnp.sqrt(fan_in)            # torch Linear default init range
        w = jax.random.uniform(kw, (fan_in, fan_out), jnp.float32, -bound, bound)
        b = jax.random.uniform(kb, (1, fan_out), jnp.float32, -bound, bound)
        params += [w, b]
    return tuple(params)


def _reference_forward(x, params):
    """Pure-JAX reference mirroring the kernel's bf16-operand / f32-accum math."""
    w1, b1, w2, b2, w3, b3 = params
    h = x.reshape(x.shape[0], -1).astype(jnp.bfloat16)
    h = jnp.dot(h, w1.astype(jnp.bfloat16),
                preferred_element_type=jnp.float32) + b1
    h = jnp.where(h > 0, h, NEG_SLOPE * h)
    h = jnp.dot(h.astype(jnp.bfloat16), w2.astype(jnp.bfloat16),
                preferred_element_type=jnp.float32) + b2
    h = jnp.where(h > 0, h, NEG_SLOPE * h)
    logits = jnp.dot(h.astype(jnp.bfloat16), w3.astype(jnp.bfloat16),
                     preferred_element_type=jnp.float32) + b3.reshape(1, 1)
    return jax.nn.sigmoid(logits)


if __name__ == "__main__":
    key = jax.random.PRNGKey(0)
    k_params, k_x = jax.random.split(key)

    params = init_params(k_params)
    x = jax.random.normal(k_x, (2, 3, 32, 32), dtype=jnp.float32)   # NCHW, small batch

    out = discriminator_forward(x, params)
    out = jax.block_until_ready(out)

    ref = _reference_forward(x, params)
    assert out.shape == (2, 1), out.shape
    assert bool(jnp.all(jnp.isfinite(out))), "non-finite output"
    assert jnp.allclose(out, ref, atol=1e-3, rtol=1e-3), "mismatch vs JAX reference"

    print("KERNEL_OK")
</pallas_src>

<mosaic_0001>
module attributes {stable_mosaic.version = 11 : i64} {
  func.func @_discriminator_kernel(%arg0: i32, %arg1: memref<8x3072xf32, #tpu.memory_space<vmem>>, %arg2: memref<3072x512xbf16, #tpu.memory_space<vmem>>, %arg3: memref<1x512xf32, #tpu.memory_space<vmem>>, %arg4: memref<512x256xbf16, #tpu.memory_space<vmem>>, %arg5: memref<1x256xf32, #tpu.memory_space<vmem>>, %arg6: memref<256x128xbf16, #tpu.memory_space<vmem>>, %arg7: memref<1x128xf32, #tpu.memory_space<vmem>>, %arg8: memref<8x128xf32, #tpu.memory_space<vmem>>) attributes {dimension_semantics = [#tpu.dimension_semantics<parallel>], iteration_bounds = array<i64: 1>, scalar_prefetch = 0 : i64, scratch_operands = 0 : i64, tpu.core_type = #tpu.core_type<tc>, window_params = [{transform_indices = @transform_0, window_bounds = array<i64: 8, 3072>}, {pipeline_mode = #tpu.pipeline_mode<synchronous>, transform_indices = @transform_1, window_bounds = array<i64: 3072, 512>}, {pipeline_mode = #tpu.pipeline_mode<synchronous>, transform_indices = @transform_2, window_bounds = array<i64: 1, 512>}, {pipeline_mode = #tpu.pipeline_mode<synchronous>, transform_indices = @transform_3, window_bounds = array<i64: 512, 256>}, {pipeline_mode = #tpu.pipeline_mode<synchronous>, transform_indices = @transform_4, window_bounds = array<i64: 1, 256>}, {pipeline_mode = #tpu.pipeline_mode<synchronous>, transform_indices = @transform_5, window_bounds = array<i64: 256, 128>}, {pipeline_mode = #tpu.pipeline_mode<synchronous>, transform_indices = @transform_6, window_bounds = array<i64: 1, 128>}, {transform_indices = @transform_7, window_bounds = array<i64: 8, 128>}]} {
    %c0 = arith.constant 0 : index
    %c0_0 = arith.constant 0 : index
    %0 = vector.load %arg1[%c0, %c0_0] : memref<8x3072xf32, #tpu.memory_space<vmem>>, vector<8x3072xf32>
    %1 = arith.truncf %0 : vector<8x3072xf32> to vector<8x3072xbf16>
    %c0_1 = arith.constant 0 : index
    %c0_2 = arith.constant 0 : index
    %2 = vector.load %arg2[%c0_1, %c0_2] : memref<3072x512xbf16, #tpu.memory_space<vmem>>, vector<3072x512xbf16>
    %cst = arith.constant dense<0.000000e+00> : vector<8x512xf32>
    %3 = tpu.matmul %1, %2, %cst {dimension_numbers = #tpu.dot_dimension_numbers<[1], [0], [0], [1], [0, 0, 1, 1], [], []>} : vector<8x3072xbf16>, vector<3072x512xbf16>, vector<8x512xf32> -> vector<8x512xf32>
    %c0_3 = arith.constant 0 : index
    %c0_4 = arith.constant 0 : index
    %4 = vector.load %arg3[%c0_3, %c0_4] : memref<1x512xf32, #tpu.memory_space<vmem>>, vector<1x512xf32>
    %5 = vector.broadcast %4 : vector<1x512xf32> to vector<8x512xf32>
    %6 = arith.addf %3, %5 : vector<8x512xf32>
    %cst_5 = arith.constant 0.000000e+00 : f32
    %7 = vector.broadcast %cst_5 : f32 to vector<8x512xf32>
    %8 = arith.cmpf ogt, %6, %7 : vector<8x512xf32>
    %cst_6 = arith.constant 2.000000e-01 : f32
    %9 = vector.broadcast %cst_6 : f32 to vector<8x512xf32>
    %10 = arith.mulf %9, %6 : vector<8x512xf32>
    %11 = arith.select %8, %6, %10 : vector<8x512xi1>, vector<8x512xf32>
    %12 = arith.truncf %11 : vector<8x512xf32> to vector<8x512xbf16>
    %c0_7 = arith.constant 0 : index
    %c0_8 = arith.constant 0 : index
    %13 = vector.load %arg4[%c0_7, %c0_8] : memref<512x256xbf16, #tpu.memory_space<vmem>>, vector<512x256xbf16>
    %cst_9 = arith.constant dense<0.000000e+00> : vector<8x256xf32>
    %14 = tpu.matmul %12, %13, %cst_9 {dimension_numbers = #tpu.dot_dimension_numbers<[1], [0], [0], [1], [0, 0, 1, 1], [], []>} : vector<8x512xbf16>, vector<512x256xbf16>, vector<8x256xf32> -> vector<8x256xf32>
    %c0_10 = arith.constant 0 : index
    %c0_11 = arith.constant 0 : index
    %15 = vector.load %arg5[%c0_10, %c0_11] : memref<1x256xf32, #tpu.memory_space<vmem>>, vector<1x256xf32>
    %16 = vector.broadcast %15 : vector<1x256xf32> to vector<8x256xf32>
    %17 = arith.addf %14, %16 : vector<8x256xf32>
    %cst_12 = arith.constant 0.000000e+00 : f32
    %18 = vector.broadcast %cst_12 : f32 to vector<8x256xf32>
    %19 = arith.cmpf ogt, %17, %18 : vector<8x256xf32>
    %cst_13 = arith.constant 2.000000e-01 : f32
    %20 = vector.broadcast %cst_13 : f32 to vector<8x256xf32>
    %21 = arith.mulf %20, %17 : vector<8x256xf32>
    %22 = arith.select %19, %17, %21 : vector<8x256xi1>, vector<8x256xf32>
    %23 = arith.truncf %22 : vector<8x256xf32> to vector<8x256xbf16>
    %c0_14 = arith.constant 0 : index
    %c0_15 = arith.constant 0 : index
    %24 = vector.load %arg6[%c0_14, %c0_15] : memref<256x128xbf16, #tpu.memory_space<vmem>>, vector<256x128xbf16>
    %cst_16 = arith.constant dense<0.000000e+00> : vector<8x128xf32>
    %25 = tpu.matmul %23, %24, %cst_16 {dimension_numbers = #tpu.dot_dimension_numbers<[1], [0], [0], [1], [0, 0, 1, 1], [], []>} : vector<8x256xbf16>, vector<256x128xbf16>, vector<8x128xf32> -> vector<8x128xf32>
    %c0_17 = arith.constant 0 : index
    %c0_18 = arith.constant 0 : index
    %26 = vector.load %arg7[%c0_17, %c0_18] : memref<1x128xf32, #tpu.memory_space<vmem>>, vector<1x128xf32>
    %27 = vector.broadcast %26 : vector<1x128xf32> to vector<8x128xf32>
    %28 = arith.addf %25, %27 : vector<8x128xf32>
    %29 = arith.negf %28 : vector<8x128xf32>
    %30 = math.exp %29 : vector<8x128xf32>
    %cst_19 = arith.constant 1.000000e+00 : f32
    %31 = vector.broadcast %cst_19 : f32 to vector<8x128xf32>
    %32 = arith.addf %31, %30 : vector<8x128xf32>
    %33 = arith.divf %31, %32 : vector<8x128xf32>
    %c0_20 = arith.constant 0 : index
    %c0_21 = arith.constant 0 : index
    %34 = vector.load %arg8[%c0_20, %c0_21] : memref<8x128xf32, #tpu.memory_space<vmem>>, vector<8x128xf32>
    tpu.vector_store %arg8[%c0_20, %c0_21], %33 {strides = array<i32>} : memref<8x128xf32, #tpu.memory_space<vmem>>, vector<8x128xf32>,
    return
  }
  func.func @transform_0(%arg0: i32) -> (i32, i32) {
    %c0_i32 = arith.constant 0 : i32
    %c0_i32_0 = arith.constant 0 : i32
    return %arg0, %c0_i32 : i32, i32
  }
  func.func @transform_1(%arg0: i32) -> (i32, i32) {
    %c0_i32 = arith.constant 0 : i32
    %c0_i32_0 = arith.constant 0 : i32
    %c0_i32_1 = arith.constant 0 : i32
    return %c0_i32, %c0_i32_0 : i32, i32
  }
  func.func @transform_2(%arg0: i32) -> (i32, i32) {
    %c0_i32 = arith.constant 0 : i32
    %c0_i32_0 = arith.constant 0 : i32
    %c0_i32_1 = arith.constant 0 : i32
    return %c0_i32, %c0_i32_0 : i32, i32
  }
  func.func @transform_3(%arg0: i32) -> (i32, i32) {
    %c0_i32 = arith.constant 0 : i32
    %c0_i32_0 = arith.constant 0 : i32
    %c0_i32_1 = arith.constant 0 : i32
    return %c0_i32, %c0_i32_0 : i32, i32
  }
  func.func @transform_4(%arg0: i32) -> (i32, i32) {
    %c0_i32 = arith.constant 0 : i32
    %c0_i32_0 = arith.constant 0 : i32
    %c0_i32_1 = arith.constant 0 : i32
    return %c0_i32, %c0_i32_0 : i32, i32
  }
  func.func @transform_5(%arg0: i32) -> (i32, i32) {
    %c0_i32 = arith.constant 0 : i32
    %c0_i32_0 = arith.constant 0 : i32
    %c0_i32_1 = arith.constant 0 : i32
    return %c0_i32, %c0_i32_0 : i32, i32
  }
  func.func @transform_6(%arg0: i32) -> (i32, i32) {
    %c0_i32 = arith.constant 0 : i32
    %c0_i32_0 = arith.constant 0 : i32
    %c0_i32_1 = arith.constant 0 : i32
    return %c0_i32, %c0_i32_0 : i32, i32
  }
  func.func @transform_7(%arg0: i32) -> (i32, i32) {
    %c0_i32 = arith.constant 0 : i32
    %c0_i32_0 = arith.constant 0 : i32
    return %arg0, %c0_i32 : i32, i32
  }
}

</mosaic_0001>

<bundles_post_ra>
// kernel: tpu_custom_call.1
= control target key start
LH: loop header
LB: loop body
LE: loop exit
PB: predicated region body
PF: predicated region fallthrough
CT: control target
= control target key end

     0   :  { %12 = vsyncpa [#allocation3], 0  ;;  %s9187_s0 = inlined_call_operand.hbm [shape: f32[8,3072], index: 0, kind: input, shape index: {}]   ;;  %s9188_s1 = inlined_call_operand.hbm [shape: bf16[3072,512], index: 1, kind: input, shape index: {}]   ;;  %s9189_s2 = inlined_call_operand.hbm [shape: f32[1,512], index: 2, kind: input, shape index: {}]   ;;  %s9190_s3 = inlined_call_operand.hbm [shape: bf16[512,256], index: 3, kind: input, shape index: {}]   ;;  %s9191_s4 = inlined_call_operand.hbm [shape: f32[1,256], index: 4, kind: input, shape index: {}]   ;;  %s9192_s5 = inlined_call_operand.hbm [shape: bf16[256,128], index: 5, kind: input, shape index: {}]   ;;  %s9193_s6 = inlined_call_operand.hbm [shape: f32[1,128], index: 6, kind: input, shape index: {}]   ;;  %s9194_s7 = inlined_call_operand.hbm [shape: f32[8,128], index: 7, kind: output, shape index: {}]  }
   0x1   :  { %13 = vsyncpa [#allocation6], 0 }
   0x2   :  { %14 = vsyncpa [#allocation9], 0 }
   0x3   :  { %15 = vsyncpa [#allocation12], 0 }
   0x4   :  { %16 = vsyncpa [#allocation4], 0  ;;  %s8915_s24 = smov [#allocation5]   ;;  %s8729_s28 = scalar_lea.hbm %s9188_s1, 98304 }
   0x5   :  { %s32_s25 = sshll.u32 %s8915_s24, 4  ;;  %p8730_p0 = scmp.ne.s32.totalorder %s9188_s1, %s8729_s28  ;;  %s33_s25 = int_to_ptr.vmem [resolvable:$true] %s32_s25 }
   0x6   :  { %p8733_p1 = scmp.lt.u32.totalorder %s8729_s28, %s9188_s1 }
   0x8   :  { %p8735_p2 = pnand %p8733_p1, %p8730_p0 }
   0xa   :  { %8738 = shalt.err (!%p8735_p2)
}
   0xb   :  { %s8739_s10 = scalar_lea.vmem %s33_s25, 98304  ;;  %p8744_p4 = scmp.lt.s32.totalorder %s33_s25, %s33_s25 }
   0xc   :  { %p8740_p3 = scmp.ne.s32.totalorder %s33_s25, %s8739_s10  ;;  %p8745_p5 = scmp.lt.s32.totalorder %s8739_s10, %s8739_s10 }
   0xe   :  { %p8746_p6 = por %p8745_p5, %p8744_p4 }
  0x10   :  { %p8747_p7 = pnand %p8746_p6, %p8740_p3 }
  0x12   :  { %8750 = shalt.err (!%p8747_p7)
}
  0x13   :  { %s8916_s11 = smov 256   ;;  %s8917_s12 = smov 16  }
  0x14   :  { %38 = dma.hbm_to_vmem [thread:$0]  %s9188_s1, 98304, %s33_s25, [#allocation6], %s8916_s11, %s8916_s11, %s8917_s12  }
  0x15   :  { %s8918_s15 = smov [#allocation8]   ;;  %s8751_s19 = scalar_lea.hbm %s9190_s3, 8192 }
  0x16   :  { %s54_s16 = sshll.u32 %s8918_s15, 4  ;;  %p8752_p8 = scmp.ne.s32.totalorder %s9190_s3, %s8751_s19  ;;  %s55_s16 = int_to_ptr.vmem [resolvable:$true] %s54_s16 }
  0x17   :  { %p8755_p9 = scmp.lt.u32.totalorder %s8751_s19, %s9190_s3 }
  0x19   :  { %p8757_p10 = pnand %p8755_p9, %p8752_p8 }
  0x1b   :  { %8760 = shalt.err (!%p8757_p10)
}
  0x1c   :  { %s8761_s24 = scalar_lea.vmem %s55_s16, 8192  ;;  %p8766_p12 = scmp.lt.s32.totalorder %s55_s16, %s55_s16 }
  0x1d   :  { %p8762_p11 = scmp.ne.s32.totalorder %s55_s16, %s8761_s24  ;;  %p8767_p13 = scmp.lt.s32.totalorder %s8761_s24, %s8761_s24 }
  0x1f   :  { %p8768_p0 = por %p8767_p13, %p8766_p12 }
  0x21   :  { %p8769_p1 = pnand %p8768_p0, %p8762_p11 }
  0x23   :  { %8772 = shalt.err (!%p8769_p1)
}
  0x24   :  { %s8919_s1 = smov 128   ;;  %s8920_s25 = smov 8  }
  0x25   :  { %60 = dma.hbm_to_vmem [thread:$0]  %s9190_s3, 8192, %s55_s16, [#allocation9], %s8919_s1, %s8919_s1, %s8920_s25  }
  0x26   :  { %s8921_s28 = smov [#allocation11]   ;;  %s8773_s9 = scalar_lea.hbm %s9192_s5, 2048 }
  0x27   :  { %s76_s29 = sshll.u32 %s8921_s28, 4  ;;  %p8774_p2 = scmp.ne.s32.totalorder %s9192_s5, %s8773_s9  ;;  %s77_s29 = int_to_ptr.vmem [resolvable:$true] %s76_s29 }
  0x28   :  { %p8777_p3 = scmp.lt.u32.totalorder %s8773_s9, %s9192_s5 }
  0x2a   :  { %p8779_p4 = pnand %p8777_p3, %p8774_p2 }
  0x2c   :  { %8782 = shalt.err (!%p8779_p4)
}
  0x2d   :  { %s8783_s14 = scalar_lea.vmem %s77_s29, 2048  ;;  %p8788_p6 = scmp.lt.s32.totalorder %s77_s29, %s77_s29 }
  0x2e   :  { %p8784_p5 = scmp.ne.s32.totalorder %s77_s29, %s8783_s14  ;;  %p8789_p7 = scmp.lt.s32.totalorder %s8783_s14, %s8783_s14 }
  0x30   :  { %p8790_p8 = por %p8789_p7, %p8788_p6 }
  0x32   :  { %p8791_p9 = pnand %p8790_p8, %p8784_p5 }
  0x34   :  { %8794 = shalt.err (!%p8791_p9)
}
  0x35   :  { %s8922_s3 = smov 64   ;;  %s8923_s15 = smov 4  }
  0x36   :  { %82 = dma.hbm_to_vmem [thread:$0]  %s9192_s5, 2048, %s77_s29, [#allocation12], %s8922_s3, %s8922_s3, %s8923_s15  }
  0x37   :  { %s8924_s18 = smov [#allocation2]   ;;  %s8925_s20 = smov [#allocation7]  }
  0x38   :  { %s23_s19 = sshll.u32 %s8924_s18, 4  ;;  %s45_s21 = sshll.u32 %s8925_s20, 4  ;;  %s24_s19 = int_to_ptr.vmem [resolvable:$true] %s23_s19  ;;  %s46_s21 = int_to_ptr.vmem [resolvable:$true] %s45_s21 }
  0x39   :  { %s8795_s24 = scalar_lea.hbm %s9187_s0, 3072 }
  0x3a   :  { %p8796_p10 = scmp.ne.s32.totalorder %s9187_s0, %s8795_s24  ;;  %p8799_p11 = scmp.lt.u32.totalorder %s8795_s24, %s9187_s0 }
  0x3c   :  { %p8801_p12 = pnand %p8799_p11, %p8796_p10 }
  0x3e   :  { %8804 = shalt.err (!%p8801_p12)
}
  0x3f   :  { %s8805_s5 = scalar_lea.vmem %s24_s19, 3072  ;;  %p8810_p0 = scmp.lt.s32.totalorder %s24_s19, %s24_s19 }
  0x40   :  { %p8806_p13 = scmp.ne.s32.totalorder %s24_s19, %s8805_s5  ;;  %p8811_p1 = scmp.lt.s32.totalorder %s8805_s5, %s8805_s5 }
  0x42   :  { %p8812_p2 = por %p8811_p1, %p8810_p0 }
  0x44   :  { %p8813_p3 = pnand %p8812_p2, %p8806_p13 }
  0x46   :  { %8816 = shalt.err (!%p8813_p3)
}
  0x47   :  { %26 = dma.hbm_to_vmem [thread:$0]  %s9187_s0, 3072, %s24_s19, [#allocation3]  }
  0x48   :  { %s8817_s9 = scalar_lea.hbm %s9189_s2, 64 }
  0x49   :  { %p8818_p4 = scmp.ne.s32.totalorder %s9189_s2, %s8817_s9  ;;  %p8821_p5 = scmp.lt.u32.totalorder %s8817_s9, %s9189_s2 }
  0x4b   :  { %p8823_p6 = pnand %p8821_p5, %p8818_p4 }
  0x4d   :  { %8826 = shalt.err (!%p8823_p6)
}
  0x4e   :  { %s8827_s14 = scalar_lea.vmem %s46_s21, 64  ;;  %p8832_p8 = scmp.lt.s32.totalorder %s46_s21, %s46_s21 }
  0x4f   :  { %p8828_p7 = scmp.ne.s32.totalorder %s46_s21, %s8827_s14  ;;  %p8833_p9 = scmp.lt.s32.totalorder %s8827_s14, %s8827_s14 }
  0x51   :  { %p8834_p10 = por %p8833_p9, %p8832_p8 }
  0x53   :  { %p8835_p11 = pnand %p8834_p10, %p8828_p7 }
  0x55   :  { %8838 = shalt.err (!%p8835_p11)
}
  0x56   :  { %48 = dma.hbm_to_vmem [thread:$0]  %s9189_s2, 64, %s46_s21, [#allocation6]  }
  0x57   :  { %s8926_s15 = smov [#allocation10]   ;;  %s8927_s17 = smov [#allocation13]  }
  0x58   :  { %s67_s16 = sshll.u32 %s8926_s15, 4  ;;  %s89_s18 = sshll.u32 %s8927_s17, 4  ;;  %s68_s16 = int_to_ptr.vmem [resolvable:$true] %s67_s16  ;;  %s90_s18 = int_to_ptr.vmem [resolvable:$true] %s89_s18 }
  0x59   :  { %s8839_s22 = scalar_lea.hbm %s9191_s4, 32 }
  0x5a   :  { %p8840_p12 = scmp.ne.s32.totalorder %s9191_s4, %s8839_s22  ;;  %p8843_p13 = scmp.lt.u32.totalorder %s8839_s22, %s9191_s4 }
  0x5c   :  { %p8845_p0 = pnand %p8843_p13, %p8840_p12 }
  0x5e   :  { %8848 = shalt.err (!%p8845_p0)
}
  0x5f   :  { %s8849_s2 = scalar_lea.vmem %s68_s16, 32  ;;  %p8854_p2 = scmp.lt.s32.totalorder %s68_s16, %s68_s16 }
  0x60   :  { %p8850_p1 = scmp.ne.s32.totalorder %s68_s16, %s8849_s2  ;;  %p8855_p3 = scmp.lt.s32.totalorder %s8849_s2, %s8849_s2 }
  0x62   :  { %p8856_p4 = por %p8855_p3, %p8854_p2 }
  0x64   :  { %p8857_p5 = pnand %p8856_p4, %p8850_p1 }
  0x66   :  { %8860 = shalt.err (!%p8857_p5)
}
  0x67   :  { %70 = dma.hbm_to_vmem [thread:$0]  %s9191_s4, 32, %s68_s16, [#allocation9]  }
  0x68   :  { %s8861_s28 = scalar_lea.hbm %s9193_s6, 16 }
  0x69   :  { %p8862_p6 = scmp.ne.s32.totalorder %s9193_s6, %s8861_s28  ;;  %p8865_p7 = scmp.lt.u32.totalorder %s8861_s28, %s9193_s6 }
  0x6b   :  { %p8867_p8 = pnand %p8865_p7, %p8862_p6 }
  0x6d   :  { %8870 = shalt.err (!%p8867_p8)
}
  0x6e   :  { %s8871_s10 = scalar_lea.vmem %s90_s18, 16  ;;  %s8875_s11 = scalar_lea.vmem %s90_s18, 32 }
  0x6f   :  { %p8872_p9 = scmp.ne.s32.totalorder %s90_s18, %s8871_s10  ;;  %p8876_p10 = scmp.lt.s32.totalorder %s90_s18, %s90_s18 }
  0x70   :  { %p8877_p11 = scmp.lt.s32.totalorder %s8875_s11, %s8871_s10 }
  0x72   :  { %p8878_p12 = por %p8877_p11, %p8876_p10 }
  0x74   :  { %p8879_p13 = pnand %p8878_p12, %p8872_p9 }
  0x76   :  { %8882 = shalt.err (!%p8879_p13)
}
  0x77   :  { %92 = dma.hbm_to_vmem [thread:$0]  %s9193_s6, 16, %s90_s18, [#allocation12]  }
  0x78   :  { %8905 = dma.done.wait [#allocation3], 3072  }
  0x79   :  { %8906 = vsyncadd [#allocation3], 4294964224 }
  0x7a   :  { %8907 = dma.done.wait [#allocation6], 98368  }
  0x7b   :  { %8908 = vsyncadd [#allocation6], 4294868928 }
  0x7c   :  { %8909 = dma.done.wait [#allocation9], 8224  }
  0x7d   :  { %8910 = vsyncadd [#allocation9], 4294959072 }
  0x7e   :  { %8911 = dma.done.wait [#allocation12], 2064  }
  0x7f   :  { %8912 = vsyncadd [#allocation12], 4294965232  ;;  %v7461_v0 = vld [vmem:[#allocation5 + $0x4] ss:$16 sps:$4 sm:$0xff]   ;;  %v7465_v2 = vld [vmem:[#allocation5] ss:$16 sps:$4 sm:$0xff]  }
  0x80   :  { %v7463_v1 = vld [vmem:[#allocation5 + $0x204] ss:$16 sps:$4 sm:$0xff]   ;;  %4793 = vmatprep.subr.bf16.mxu1 %v7461_v0  ;;  %v7466_v3 = vld [vmem:[#allocation5 + $0x200] ss:$16 sps:$4 sm:$0xff]   ;;  %v116_v46 = vld [vmem:[#allocation2 + $0x8] sm:$0xff]  ;;  %s8928_s6 = smov [#allocation14]  }
  0x81   :  { %4834 = vmatprep.subr.bf16.mxu0 %v7463_v1  ;;  %v7467_v4 = vld [vmem:[#allocation5 + $0x24] ss:$16 sps:$4 sm:$0xff]   ;;  %4794 = vmatpush1.bf16.msra.mxu1 %v7465_v2  ;;  %v7471_v6 = vld [vmem:[#allocation5 + $0x20] ss:$16 sps:$4 sm:$0xff]   ;;  %v9053_v48 = vpack.c.bf16 %v116_v46, %v116_v46  ;;  %v118_v49 = vld [vmem:[#allocation2 + $0x18] sm:$0xff]  ;;  %s6467_s13 = sshll.u32 %s8928_s6, 4  ;;  %s6468_s13 = int_to_ptr.vmem [resolvable:$true] %s6467_s13 }
  0x82   :  { %4835 = vmatpush1.bf16.msra.mxu0 %v7466_v3  ;;  %v7469_v5 = vld [vmem:[#allocation5 + $0x224] ss:$16 sps:$4 sm:$0xff]   ;;  %4795 = vmatprep.subr.bf16.mxu1 %v7467_v4  ;;  %v7472_v7 = vld [vmem:[#allocation5 + $0x220] ss:$16 sps:$4 sm:$0xff]   ;;  %v9055_v52 = vpack.c.bf16 %v118_v49, %v118_v49  ;;  %v7614_v49 = vld [vmem:[#allocation5 + $0x128] ss:$16 sps:$4 sm:$0xff]   ;;  %p8888_p1 = scmp.lt.s32.totalorder %s6468_s13, %s6468_s13 }
  0x83   :  { %4836 = vmatprep.subr.bf16.mxu0 %v7469_v5  ;;  %v7473_v8 = vld [vmem:[#allocation5 + $0x44] ss:$16 sps:$4 sm:$0xff]   ;;  %v7477_v10 = vld [vmem:[#allocation5 + $0x40] ss:$16 sps:$4 sm:$0xff]   ;;  %4825 = vmatprep.mubr.bf16.mxu1 %v9053_v48  ;;  %s8883_s14 = scalar_lea.vmem %s6468_s13, 128 }
  0x84   :  { %v7475_v9 = vld [vmem:[#allocation5 + $0x244] ss:$16 sps:$4 sm:$0xff]   ;;  %v7478_v11 = vld [vmem:[#allocation5 + $0x240] ss:$16 sps:$4 sm:$0xff]   ;;  %4866 = vmatprep.mubr.bf16.mxu0 %v9055_v52  ;;  %p8884_p0 = scmp.ne.s32.totalorder %s6468_s13, %s8883_s14  ;;  %p8889_p2 = scmp.lt.s32.totalorder %s8883_s14, %s8883_s14 }
  0x85   :  { %4796 = vmatpush1.bf16.msra.mxu1 %v7471_v6  ;;  %v7479_v12 = vld [vmem:[#allocation5 + $0x64] ss:$16 sps:$4 sm:$0xff]   ;;  %v7483_v14 = vld [vmem:[#allocation5 + $0x60] ss:$16 sps:$4 sm:$0xff]  }
  0x86   :  { %4837 = vmatpush1.bf16.msra.mxu0 %v7472_v7  ;;  %4797 = vmatprep.subr.bf16.mxu1 %v7473_v8  ;;  %v7481_v13 = vld [vmem:[#allocation5 + $0x264] ss:$16 sps:$4 sm:$0xff]   ;;  %v7484_v15 = vld [vmem:[#allocation5 + $0x260] ss:$16 sps:$4 sm:$0xff]   ;;  %v7562_v7 = vld [vmem:[#allocation5 + $0xc] ss:$16 sps:$4 sm:$0xff]   ;;  %p8890_p3 = por %p8889_p2, %p8888_p1 }
  0x87   :  { %4838 = vmatprep.subr.bf16.mxu0 %v7475_v9  ;;  %v7485_v16 = vld [vmem:[#allocation5 + $0x84] ss:$16 sps:$4 sm:$0xff]   ;;  %v7489_v18 = vld [vmem:[#allocation5 + $0x80] ss:$16 sps:$4 sm:$0xff]  }
  0x88   :  { %v7487_v17 = vld [vmem:[#allocation5 + $0x284] ss:$16 sps:$4 sm:$0xff]   ;;  %v7490_v19 = vld [vmem:[#allocation5 + $0x280] ss:$16 sps:$4 sm:$0xff]   ;;  %p8891_p4 = pnand %p8890_p3, %p8884_p0 }
  0x89   :  { %4798 = vmatpush1.bf16.msra.mxu1 %v7477_v10  ;;  %v7491_v20 = vld [vmem:[#allocation5 + $0xa4] ss:$16 sps:$4 sm:$0xff]   ;;  %v7495_v22 = vld [vmem:[#allocation5 + $0xa0] ss:$16 sps:$4 sm:$0xff]   ;;  %v7560_v10 = vld [vmem:[#allocation5 + $0x8] ss:$16 sps:$4 sm:$0xff]  }
  0x8a   :  { %4839 = vmatpush1.bf16.msra.mxu0 %v7478_v11  ;;  %4799 = vmatprep.subr.bf16.mxu1 %v7479_v12  ;;  %v7493_v21 = vld [vmem:[#allocation5 + $0x2a4] ss:$16 sps:$4 sm:$0xff]   ;;  %v7496_v23 = vld [vmem:[#allocation5 + $0x2a0] ss:$16 sps:$4 sm:$0xff]  }
  0x8b   :  { %4840 = vmatprep.subr.bf16.mxu0 %v7481_v13  ;;  %v7497_v24 = vld [vmem:[#allocation5 + $0xc4] ss:$16 sps:$4 sm:$0xff]   ;;  %v7501_v26 = vld [vmem:[#allocation5 + $0xc0] ss:$16 sps:$4 sm:$0xff]   ;;  %v7568_v13 = vld [vmem:[#allocation5 + $0x2c] ss:$16 sps:$4 sm:$0xff]  }
  0x8c   :  { %v7499_v25 = vld [vmem:[#allocation5 + $0x2c4] ss:$16 sps:$4 sm:$0xff]   ;;  %v7502_v27 = vld [vmem:[#allocation5 + $0x2c0] ss:$16 sps:$4 sm:$0xff]  }
  0x8d   :  { %4800 = vmatpush1.bf16.msra.mxu1 %v7483_v14  ;;  %v7503_v28 = vld [vmem:[#allocation5 + $0xe4] ss:$16 sps:$4 sm:$0xff]   ;;  %v7507_v30 = vld [vmem:[#allocation5 + $0xe0] ss:$16 sps:$4 sm:$0xff]  }
  0x8e   :  { %4841 = vmatpush1.bf16.msra.mxu0 %v7484_v15  ;;  %4801 = vmatprep.subr.bf16.mxu1 %v7485_v16  ;;  %v7505_v29 = vld [vmem:[#allocation5 + $0x2e4] ss:$16 sps:$4 sm:$0xff]   ;;  %v7508_v31 = vld [vmem:[#allocation5 + $0x2e0] ss:$16 sps:$4 sm:$0xff]   ;;  %v7566_v15 = vld [vmem:[#allocation5 + $0x28] ss:$16 sps:$4 sm:$0xff]  }
  0x8f   :  { %4842 = vmatprep.subr.bf16.mxu0 %v7487_v17  ;;  %v7509_v32 = vld [vmem:[#allocation5 + $0x104] ss:$16 sps:$4 sm:$0xff]   ;;  %v7513_v34 = vld [vmem:[#allocation5 + $0x100] ss:$16 sps:$4 sm:$0xff]   ;;  %v7574_v17 = vld [vmem:[#allocation5 + $0x4c] ss:$16 sps:$4 sm:$0xff]  }
  0x90   :  { %v7511_v33 = vld [vmem:[#allocation5 + $0x304] ss:$16 sps:$4 sm:$0xff]   ;;  %v7514_v35 = vld [vmem:[#allocation5 + $0x300] ss:$16 sps:$4 sm:$0xff]  }
  0x91   :  { %4802 = vmatpush1.bf16.msra.mxu1 %v7489_v18  ;;  %v7515_v36 = vld [vmem:[#allocation5 + $0x124] ss:$16 sps:$4 sm:$0xff]   ;;  %v7519_v38 = vld [vmem:[#allocation5 + $0x120] ss:$16 sps:$4 sm:$0xff]  }
  0x92   :  { %4843 = vmatpush1.bf16.msra.mxu0 %v7490_v19  ;;  %4803 = vmatprep.subr.bf16.mxu1 %v7491_v20  ;;  %v7517_v37 = vld [vmem:[#allocation5 + $0x324] ss:$16 sps:$4 sm:$0xff]   ;;  %v7520_v39 = vld [vmem:[#allocation5 + $0x320] ss:$16 sps:$4 sm:$0xff]   ;;  %v7572_v19 = vld [vmem:[#allocation5 + $0x48] ss:$16 sps:$4 sm:$0xff]  }
  0x93   :  { %4844 = vmatprep.subr.bf16.mxu0 %v7493_v21  ;;  %v7521_v40 = vld [vmem:[#allocation5 + $0x144] ss:$16 sps:$4 sm:$0xff]   ;;  %v7525_v42 = vld [vmem:[#allocation5 + $0x140] ss:$16 sps:$4 sm:$0xff]   ;;  %v7580_v21 = vld [vmem:[#allocation5 + $0x6c] ss:$16 sps:$4 sm:$0xff]  }
  0x94   :  { %v7523_v41 = vld [vmem:[#allocation5 + $0x344] ss:$16 sps:$4 sm:$0xff]   ;;  %v7526_v43 = vld [vmem:[#allocation5 + $0x340] ss:$16 sps:$4 sm:$0xff]  }
  0x95   :  { %4804 = vmatpush1.bf16.msra.mxu1 %v7495_v22  ;;  %v7527_v44 = vld [vmem:[#allocation5 + $0x164] ss:$16 sps:$4 sm:$0xff]   ;;  %v7531_v47 = vld [vmem:[#allocation5 + $0x160] ss:$16 sps:$4 sm:$0xff]  }
  0x96   :  { %4845 = vmatpush1.bf16.msra.mxu0 %v7496_v23  ;;  %4805 = vmatprep.subr.bf16.mxu1 %v7497_v24  ;;  %v7529_v45 = vld [vmem:[#allocation5 + $0x364] ss:$16 sps:$4 sm:$0xff]   ;;  %v7532_v50 = vld [vmem:[#allocation5 + $0x360] ss:$16 sps:$4 sm:$0xff]   ;;  %v7578_v23 = vld [vmem:[#allocation5 + $0x68] ss:$16 sps:$4 sm:$0xff]  }
  0x97   :  { %4846 = vmatprep.subr.bf16.mxu0 %v7499_v25  ;;  %v7533_v51 = vld [vmem:[#allocation5 + $0x184] ss:$16 sps:$4 sm:$0xff]   ;;  %v7537_v54 = vld [vmem:[#allocation5 + $0x180] ss:$16 sps:$4 sm:$0xff]   ;;  %v7586_v25 = vld [vmem:[#allocation5 + $0x8c] ss:$16 sps:$4 sm:$0xff]  }
  0x98   :  { %v7535_v53 = vld [vmem:[#allocation5 + $0x384] ss:$16 sps:$4 sm:$0xff]   ;;  %v7538_v55 = vld [vmem:[#allocation5 + $0x380] ss:$16 sps:$4 sm:$0xff]  }
  0x99   :  { %4806 = vmatpush1.bf16.msra.mxu1 %v7501_v26  ;;  %v7539_v56 = vld [vmem:[#allocation5 + $0x1a4] ss:$16 sps:$4 sm:$0xff]   ;;  %v7543_v58 = vld [vmem:[#allocation5 + $0x1a0] ss:$16 sps:$4 sm:$0xff]  }
  0x9a   :  { %4847 = vmatpush1.bf16.msra.mxu0 %v7502_v27  ;;  %4807 = vmatprep.subr.bf16.mxu1 %v7503_v28  ;;  %v7541_v57 = vld [vmem:[#allocation5 + $0x3a4] ss:$16 sps:$4 sm:$0xff]   ;;  %v7544_v59 = vld [vmem:[#allocation5 + $0x3a0] ss:$16 sps:$4 sm:$0xff]   ;;  %v7584_v27 = vld [vmem:[#allocation5 + $0x88] ss:$16 sps:$4 sm:$0xff]  }
  0x9b   :  { %4848 = vmatprep.subr.bf16.mxu0 %v7505_v29  ;;  %v7545_v60 = vld [vmem:[#allocation5 + $0x1c4] ss:$16 sps:$4 sm:$0xff]   ;;  %v7549_v62 = vld [vmem:[#allocation5 + $0x1c0] ss:$16 sps:$4 sm:$0xff]   ;;  %v7592_v29 = vld [vmem:[#allocation5 + $0xac] ss:$16 sps:$4 sm:$0xff]  }
  0x9c   :  { %v7547_v61 = vld [vmem:[#allocation5 + $0x3c4] ss:$16 sps:$4 sm:$0xff]   ;;  %v7550_v63 = vld [vmem:[#allocation5 + $0x3c0] ss:$16 sps:$4 sm:$0xff]  }
  0x9d   :  { %4808 = vmatpush1.bf16.msra.mxu1 %v7507_v30  ;;  %v7551_v0 = vld [vmem:[#allocation5 + $0x1e4] ss:$16 sps:$4 sm:$0xff]   ;;  %v7555_v2 = vld [vmem:[#allocation5 + $0x1e0] ss:$16 sps:$4 sm:$0xff]  }
  0x9e   :  { %4849 = vmatpush1.bf16.msra.mxu0 %v7508_v31  ;;  %4809 = vmatprep.subr.bf16.mxu1 %v7509_v32  ;;  %v7553_v1 = vld [vmem:[#allocation5 + $0x3e4] ss:$16 sps:$4 sm:$0xff]   ;;  %v7556_v3 = vld [vmem:[#allocation5 + $0x3e0] ss:$16 sps:$4 sm:$0xff]   ;;  %v7590_v31 = vld [vmem:[#allocation5 + $0xa8] ss:$16 sps:$4 sm:$0xff]  }
  0x9f   :  { %4850 = vmatprep.subr.bf16.mxu0 %v7511_v33  ;;  %v115_v4 = vld [vmem:[#allocation2] sm:$0xff]  ;;  %v117_v6 = vld [vmem:[#allocation2 + $0x10] sm:$0xff]  ;;  %v7598_v33 = vld [vmem:[#allocation5 + $0xcc] ss:$16 sps:$4 sm:$0xff]  }
  0xa0   :  { %v7559_v5 = vld [vmem:[#allocation5 + $0x404] ss:$16 sps:$4 sm:$0xff]   ;;  %v9059_v8 = vpack.c.bf16 %v115_v4, %v115_v4  ;;  %v7557_v9 = vld [vmem:[#allocation5 + $0x400] ss:$16 sps:$4 sm:$0xff]   ;;  %v9061_v11 = vpack.c.bf16 %v117_v6, %v117_v6  ;;  %v7646_v4 = vld [vmem:[#allocation5 + $0x1cc] ss:$16 sps:$4 sm:$0xff]  }
  0xa1   :  { %4810 = vmatpush1.bf16.msra.mxu1 %v7513_v34  ;;  %v7565_v12 = vld [vmem:[#allocation5 + $0x424] ss:$16 sps:$4 sm:$0xff]   ;;  %v7563_v14 = vld [vmem:[#allocation5 + $0x420] ss:$16 sps:$4 sm:$0xff]   ;;  %v120_v34 = vld [vmem:[#allocation2 + $0x28] sm:$0xff] }
  0xa2   :  { %4851 = vmatpush1.bf16.msra.mxu0 %v7514_v35  ;;  %4811 = vmatprep.subr.bf16.mxu1 %v7515_v36  ;;  %v7571_v16 = vld [vmem:[#allocation5 + $0x444] ss:$16 sps:$4 sm:$0xff]   ;;  %v7569_v18 = vld [vmem:[#allocation5 + $0x440] ss:$16 sps:$4 sm:$0xff]   ;;  %v9066_v36 = vpack.c.bf16 %v120_v34, %v120_v34  ;;  %v7644_v6 = vld [vmem:[#allocation5 + $0x1c8] ss:$16 sps:$4 sm:$0xff]  }
  0xa3   :  { %4852 = vmatprep.subr.bf16.mxu0 %v7517_v37  ;;  %v7577_v20 = vld [vmem:[#allocation5 + $0x464] ss:$16 sps:$4 sm:$0xff]   ;;  %v7575_v22 = vld [vmem:[#allocation5 + $0x460] ss:$16 sps:$4 sm:$0xff]   ;;  %v7596_v37 = vld [vmem:[#allocation5 + $0xc8] ss:$16 sps:$4 sm:$0xff]  }
  0xa4   :  { %v7583_v24 = vld [vmem:[#allocation5 + $0x484] ss:$16 sps:$4 sm:$0xff]   ;;  %v7581_v26 = vld [vmem:[#allocation5 + $0x480] ss:$16 sps:$4 sm:$0xff]  }
  0xa5   :  { %4812 = vmatpush1.bf16.msra.mxu1 %v7519_v38  ;;  %v7589_v28 = vld [vmem:[#allocation5 + $0x4a4] ss:$16 sps:$4 sm:$0xff]   ;;  %v7587_v30 = vld [vmem:[#allocation5 + $0x4a0] ss:$16 sps:$4 sm:$0xff]  }
  0xa6   :  { %4853 = vmatpush1.bf16.msra.mxu0 %v7520_v39  ;;  %4813 = vmatprep.subr.bf16.mxu1 %v7521_v40  ;;  %v7595_v32 = vld [vmem:[#allocation5 + $0x4c4] ss:$16 sps:$4 sm:$0xff]   ;;  %v7593_v35 = vld [vmem:[#allocation5 + $0x4c0] ss:$16 sps:$4 sm:$0xff]   ;;  %v7604_v39 = vld [vmem:[#allocation5 + $0xec] ss:$16 sps:$4 sm:$0xff]  }
  0xa7   :  { %4854 = vmatprep.subr.bf16.mxu0 %v7523_v41  ;;  %v7601_v38 = vld [vmem:[#allocation5 + $0x4e4] ss:$16 sps:$4 sm:$0xff]   ;;  %v7599_v40 = vld [vmem:[#allocation5 + $0x4e0] ss:$16 sps:$4 sm:$0xff]   ;;  %v7602_v41 = vld [vmem:[#allocation5 + $0xe8] ss:$16 sps:$4 sm:$0xff]  }
  0xa8   :  { %v7613_v46 = vld [vmem:[#allocation5 + $0x524] ss:$16 sps:$4 sm:$0xff]   ;;  %v7677_v34 = vld [vmem:[#allocation5 + $0x680] ss:$16 sps:$4 sm:$0xff]  }
  0xa9   :  { %4814 = vmatpush1.bf16.msra.mxu1 %v7525_v42  ;;  %v7607_v42 = vld [vmem:[#allocation5 + $0x504] ss:$16 sps:$4 sm:$0xff]  }
  0xaa   :  { %4855 = vmatpush1.bf16.msra.mxu0 %v7526_v43  ;;  %4815 = vmatprep.subr.bf16.mxu1 %v7527_v44  ;;  %v7610_v43 = vld [vmem:[#allocation5 + $0x10c] ss:$16 sps:$4 sm:$0xff]   ;;  %v7605_v44 = vld [vmem:[#allocation5 + $0x500] ss:$16 sps:$4 sm:$0xff]  }
  0xab   :  { %4856 = vmatprep.subr.bf16.mxu0 %v7529_v45  ;;  %v7608_v45 = vld [vmem:[#allocation5 + $0x108] ss:$16 sps:$4 sm:$0xff]  }
  0xad   :  { %4816 = vmatpush1.bf16.msra.mxu1 %v7531_v47  ;;  %v7616_v47 = vld [vmem:[#allocation5 + $0x12c] ss:$16 sps:$4 sm:$0xff]  }
  0xae   :  { %4857 = vmatpush1.bf16.msra.mxu0 %v7532_v50  ;;  %4817 = vmatprep.subr.bf16.mxu1 %v7533_v51  ;;  %v7619_v50 = vld [vmem:[#allocation5 + $0x544] ss:$16 sps:$4 sm:$0xff]   ;;  %v7622_v51 = vld [vmem:[#allocation5 + $0x14c] ss:$16 sps:$4 sm:$0xff]  }
  0xaf   :  { %4858 = vmatprep.subr.bf16.mxu0 %v7535_v53  ;;  %v7617_v53 = vld [vmem:[#allocation5 + $0x540] ss:$16 sps:$4 sm:$0xff]  }
  0xb1   :  { %4818 = vmatpush1.bf16.msra.mxu1 %v7537_v54  ;;  %v7620_v54 = vld [vmem:[#allocation5 + $0x148] ss:$16 sps:$4 sm:$0xff]  }
  0xb2   :  { %4859 = vmatpush1.bf16.msra.mxu0 %v7538_v55  ;;  %4819 = vmatprep.subr.bf16.mxu1 %v7539_v56  ;;  %v7625_v55 = vld [vmem:[#allocation5 + $0x564] ss:$16 sps:$4 sm:$0xff]   ;;  %v7628_v56 = vld [vmem:[#allocation5 + $0x16c] ss:$16 sps:$4 sm:$0xff]  }
  0xb3   :  { %4860 = vmatprep.subr.bf16.mxu0 %v7541_v57  ;;  %v7623_v57 = vld [vmem:[#allocation5 + $0x560] ss:$16 sps:$4 sm:$0xff]  }
  0xb5   :  { %4820 = vmatpush1.bf16.msra.mxu1 %v7543_v58  ;;  %v7626_v58 = vld [vmem:[#allocation5 + $0x168] ss:$16 sps:$4 sm:$0xff]  }
  0xb6   :  { %4861 = vmatpush1.bf16.msra.mxu0 %v7544_v59  ;;  %4821 = vmatprep.subr.bf16.mxu1 %v7545_v60  ;;  %v7631_v59 = vld [vmem:[#allocation5 + $0x584] ss:$16 sps:$4 sm:$0xff]   ;;  %v7634_v60 = vld [vmem:[#allocation5 + $0x18c] ss:$16 sps:$4 sm:$0xff]  }
  0xb7   :  { %4862 = vmatprep.subr.bf16.mxu0 %v7547_v61  ;;  %v7629_v61 = vld [vmem:[#allocation5 + $0x580] ss:$16 sps:$4 sm:$0xff]  }
  0xb9   :  { %4822 = vmatpush1.bf16.msra.mxu1 %v7549_v62  ;;  %v7632_v62 = vld [vmem:[#allocation5 + $0x188] ss:$16 sps:$4 sm:$0xff]  }
  0xba   :  { %4863 = vmatpush1.bf16.msra.mxu0 %v7550_v63  ;;  %4823 = vmatprep.subr.bf16.mxu1 %v7551_v0  ;;  %v7637_v63 = vld [vmem:[#allocation5 + $0x5a4] ss:$16 sps:$4 sm:$0xff]   ;;  %v7640_v0 = vld [vmem:[#allocation5 + $0x1ac] ss:$16 sps:$4 sm:$0xff]  }
  0xbb   :  { %4864 = vmatprep.subr.bf16.mxu0 %v7553_v1  ;;  %v7635_v1 = vld [vmem:[#allocation5 + $0x5a0] ss:$16 sps:$4 sm:$0xff]  }
  0xbd   :  { %4824 = vmatpush1.bf16.msra.mxu1 %v7555_v2  ;;  %v7638_v2 = vld [vmem:[#allocation5 + $0x1a8] ss:$16 sps:$4 sm:$0xff]  }
  0xbe   :  { %4865 = vmatpush1.bf16.msra.mxu0 %v7556_v3  ;;  %5285 = vmatprep.subr.bf16.mxu1 %v7562_v7  ;;  %v7643_v3 = vld [vmem:[#allocation5 + $0x5c4] ss:$16 sps:$4 sm:$0xff]  }
  0xbf   :  { %4875 = vmatprep.subr.bf16.mxu0 %v7559_v5  ;;  %v7641_v5 = vld [vmem:[#allocation5 + $0x5c0] ss:$16 sps:$4 sm:$0xff]   ;;  %v7649_v7 = vld [vmem:[#allocation5 + $0x5e4] ss:$16 sps:$4 sm:$0xff]  }
  0xc0   :  { %4826 = vmatmul.mubr.bf16.vlgmr.msra.gmra.mrb[0].mxu1 %v9059_v8 }
  0xc1   :  { %4867 = vmatmul.mubr.bf16.vlgmr.msra.gmra.mrb[0].mxu0 %v9061_v11  ;;  %5286 = vmatpush1.bf16.msra.mxu1 %v7560_v10  ;;  %v7647_v10 = vld [vmem:[#allocation5 + $0x5e0] ss:$16 sps:$4 sm:$0xff]  }
  0xc2   :  { %4876 = vmatpush1.bf16.msra.mxu0 %v7557_v9  ;;  %5287 = vmatprep.subr.bf16.mxu1 %v7568_v13  ;;  %v7652_v9 = vld [vmem:[#allocation5 + $0x1ec] ss:$16 sps:$4 sm:$0xff]   ;;  %v119_v13 = vld [vmem:[#allocation2 + $0x20] sm:$0xff] }
  0xc3   :  { %4877 = vmatprep.subr.bf16.mxu0 %v7565_v12  ;;  %5317 = vmatprep.mubr.bf16.mxu1 %v9053_v48  ;;  %v7611_v48 = vld [vmem:[#allocation5 + $0x520] ss:$16 sps:$4 sm:$0xff]   ;;  %v7650_v12 = vld [vmem:[#allocation5 + $0x1e8] ss:$16 sps:$4 sm:$0xff]  }
  0xc4   :  { %4907 = vmatprep.mubr.bf16.mxu0 %v9066_v36 }
  0xc5   :  { %5288 = vmatpush1.bf16.msra.mxu1 %v7566_v15  ;;  %v7658_v15 = vld [vmem:[#allocation5 + $0x20c] ss:$16 sps:$4 sm:$0xff]  }
  0xc6   :  { %4878 = vmatpush1.bf16.msra.mxu0 %v7563_v14  ;;  %5289 = vmatprep.subr.bf16.mxu1 %v7574_v17  ;;  %v7655_v14 = vld [vmem:[#allocation5 + $0x604] ss:$16 sps:$4 sm:$0xff]   ;;  %v7653_v17 = vld [vmem:[#allocation5 + $0x600] ss:$16 sps:$4 sm:$0xff]  }
  0xc7   :  { %4879 = vmatprep.subr.bf16.mxu0 %v7571_v16  ;;  %v9069_v16 = vpack.c.bf16 %v119_v13, %v119_v13  ;;  %v7737_v13 = vld [vmem:[#allocation5 + $0x7c0] ss:$16 sps:$4 sm:$0xff]  }
  0xc9   :  { %5290 = vmatpush1.bf16.msra.mxu1 %v7572_v19  ;;  %v7661_v19 = vld [vmem:[#allocation5 + $0x624] ss:$16 sps:$4 sm:$0xff]  }
  0xca   :  { %4880 = vmatpush1.bf16.msra.mxu0 %v7569_v18  ;;  %5291 = vmatprep.subr.bf16.mxu1 %v7580_v21  ;;  %v7656_v18 = vld [vmem:[#allocation5 + $0x208] ss:$16 sps:$4 sm:$0xff]  }
  0xcb   :  { %4881 = vmatprep.subr.bf16.mxu0 %v7577_v20  ;;  %v7664_v20 = vld [vmem:[#allocation5 + $0x22c] ss:$16 sps:$4 sm:$0xff]  }
  0xcc   :  { %v122_v21 = vld [vmem:[#allocation2 + $0x38] sm:$0xff] }
  0xcd   :  { %5292 = vmatpush1.bf16.msra.mxu1 %v7578_v23  ;;  %v9073_v23 = vpack.c.bf16 %v122_v21, %v122_v21  ;;  %v121_v21 = vld [vmem:[#allocation2 + $0x30] sm:$0xff] }
  0xce   :  { %4882 = vmatpush1.bf16.msra.mxu0 %v7575_v22  ;;  %5293 = vmatprep.subr.bf16.mxu1 %v7586_v25  ;;  %v7659_v22 = vld [vmem:[#allocation5 + $0x620] ss:$16 sps:$4 sm:$0xff]   ;;  %v7667_v25 = vld [vmem:[#allocation5 + $0x644] ss:$16 sps:$4 sm:$0xff]  }
  0xcf   :  { %4883 = vmatprep.subr.bf16.mxu0 %v7583_v24  ;;  %v7662_v24 = vld [vmem:[#allocation5 + $0x228] ss:$16 sps:$4 sm:$0xff]  }
  0xd1   :  { %5294 = vmatpush1.bf16.msra.mxu1 %v7584_v27  ;;  %v7665_v27 = vld [vmem:[#allocation5 + $0x640] ss:$16 sps:$4 sm:$0xff]  }
  0xd2   :  { %4884 = vmatpush1.bf16.msra.mxu0 %v7581_v26  ;;  %5295 = vmatprep.subr.bf16.mxu1 %v7592_v29  ;;  %v7670_v26 = vld [vmem:[#allocation5 + $0x24c] ss:$16 sps:$4 sm:$0xff]   ;;  %v7673_v29 = vld [vmem:[#allocation5 + $0x664] ss:$16 sps:$4 sm:$0xff]  }
  0xd3   :  { %4885 = vmatprep.subr.bf16.mxu0 %v7589_v28  ;;  %v7668_v28 = vld [vmem:[#allocation5 + $0x248] ss:$16 sps:$4 sm:$0xff]  }
  0xd5   :  { %5296 = vmatpush1.bf16.msra.mxu1 %v7590_v31  ;;  %v7674_v31 = vld [vmem:[#allocation5 + $0x268] ss:$16 sps:$4 sm:$0xff]  }
  0xd6   :  { %4886 = vmatpush1.bf16.msra.mxu0 %v7587_v30  ;;  %5297 = vmatprep.subr.bf16.mxu1 %v7598_v33  ;;  %v7671_v30 = vld [vmem:[#allocation5 + $0x660] ss:$16 sps:$4 sm:$0xff]   ;;  %v7682_v33 = vld [vmem:[#allocation5 + $0x28c] ss:$16 sps:$4 sm:$0xff]  }
  0xd7   :  { %4887 = vmatprep.subr.bf16.mxu0 %v7595_v32  ;;  %v7679_v32 = vld [vmem:[#allocation5 + $0x684] ss:$16 sps:$4 sm:$0xff]  }
  0xd9   :  { %5298 = vmatpush1.bf16.msra.mxu1 %v7596_v37  ;;  %v7688_v37 = vld [vmem:[#allocation5 + $0x2ac] ss:$16 sps:$4 sm:$0xff]  }
  0xda   :  { %4888 = vmatpush1.bf16.msra.mxu0 %v7593_v35  ;;  %5299 = vmatprep.subr.bf16.mxu1 %v7604_v39  ;;  %v7680_v35 = vld [vmem:[#allocation5 + $0x288] ss:$16 sps:$4 sm:$0xff]  }
  0xdb   :  { %4889 = vmatprep.subr.bf16.mxu0 %v7601_v38  ;;  %v7683_v38 = vld [vmem:[#allocation5 + $0x6a0] ss:$16 sps:$4 sm:$0xff]   ;;  %v7686_v39 = vld [vmem:[#allocation5 + $0x2a8] ss:$16 sps:$4 sm:$0xff]  }
  0xdd   :  { %5300 = vmatpush1.bf16.msra.mxu1 %v7602_v41  ;;  %v7694_v41 = vld [vmem:[#allocation5 + $0x2cc] ss:$16 sps:$4 sm:$0xff]  }
  0xde   :  { %4890 = vmatpush1.bf16.msra.mxu0 %v7599_v40  ;;  %5301 = vmatprep.subr.bf16.mxu1 %v7610_v43  ;;  %v7691_v40 = vld [vmem:[#allocation5 + $0x6c4] ss:$16 sps:$4 sm:$0xff]   ;;  %v7692_v43 = vld [vmem:[#allocation5 + $0x2c8] ss:$16 sps:$4 sm:$0xff]  }
  0xdf   :  { %4891 = vmatprep.subr.bf16.mxu0 %v7607_v42  ;;  %v7689_v42 = vld [vmem:[#allocation5 + $0x6c0] ss:$16 sps:$4 sm:$0xff]  }
  0xe1   :  { %5302 = vmatpush1.bf16.msra.mxu1 %v7608_v45  ;;  %v7700_v45 = vld [vmem:[#allocation5 + $0x2ec] ss:$16 sps:$4 sm:$0xff]  }
  0xe2   :  { %4892 = vmatpush1.bf16.msra.mxu0 %v7605_v44  ;;  %5303 = vmatprep.subr.bf16.mxu1 %v7616_v47  ;;  %v7697_v44 = vld [vmem:[#allocation5 + $0x6e4] ss:$16 sps:$4 sm:$0xff]   ;;  %v7698_v47 = vld [vmem:[#allocation5 + $0x2e8] ss:$16 sps:$4 sm:$0xff]  }
  0xe3   :  { %4893 = vmatprep.subr.bf16.mxu0 %v7613_v46  ;;  %v7695_v46 = vld [vmem:[#allocation5 + $0x6e0] ss:$16 sps:$4 sm:$0xff]  }
  0xe5   :  { %5304 = vmatpush1.bf16.msra.mxu1 %v7614_v49  ;;  %v7706_v49 = vld [vmem:[#allocation5 + $0x30c] ss:$16 sps:$4 sm:$0xff]  }
  0xe6   :  { %4894 = vmatpush1.bf16.msra.mxu0 %v7611_v48  ;;  %5305 = vmatprep.subr.bf16.mxu1 %v7622_v51  ;;  %v7703_v48 = vld [vmem:[#allocation5 + $0x704] ss:$16 sps:$4 sm:$0xff]   ;;  %v7704_v51 = vld [vmem:[#allocation5 + $0x308] ss:$16 sps:$4 sm:$0xff]  }
  0xe7   :  { %4895 = vmatprep.subr.bf16.mxu0 %v7619_v50  ;;  %v7701_v50 = vld [vmem:[#allocation5 + $0x700] ss:$16 sps:$4 sm:$0xff]  }
  0xe9   :  { %5306 = vmatpush1.bf16.msra.mxu1 %v7620_v54  ;;  %v7712_v54 = vld [vmem:[#allocation5 + $0x32c] ss:$16 sps:$4 sm:$0xff]  }
  0xea   :  { %4896 = vmatpush1.bf16.msra.mxu0 %v7617_v53  ;;  %5307 = vmatprep.subr.bf16.mxu1 %v7628_v56  ;;  %v7709_v53 = vld [vmem:[#allocation5 + $0x724] ss:$16 sps:$4 sm:$0xff]   ;;  %v7710_v56 = vld [vmem:[#allocation5 + $0x328] ss:$16 sps:$4 sm:$0xff]  }
  0xeb   :  { %4897 = vmatprep.subr.bf16.mxu0 %v7625_v55  ;;  %v7707_v55 = vld [vmem:[#allocation5 + $0x720] ss:$16 sps:$4 sm:$0xff]  }
  0xed   :  { %5308 = vmatpush1.bf16.msra.mxu1 %v7626_v58  ;;  %v7718_v58 = vld [vmem:[#allocation5 + $0x34c] ss:$16 sps:$4 sm:$0xff]  }
  0xee   :  { %4898 = vmatpush1.bf16.msra.mxu0 %v7623_v57  ;;  %5309 = vmatprep.subr.bf16.mxu1 %v7634_v60  ;;  %v7715_v57 = vld [vmem:[#allocation5 + $0x744] ss:$16 sps:$4 sm:$0xff]   ;;  %v7716_v60 = vld [vmem:[#allocation5 + $0x348] ss:$16 sps:$4 sm:$0xff]  }
  0xef   :  { %4899 = vmatprep.subr.bf16.mxu0 %v7631_v59  ;;  %v7713_v59 = vld [vmem:[#allocation5 + $0x740] ss:$16 sps:$4 sm:$0xff]  }
  0xf1   :  { %5310 = vmatpush1.bf16.msra.mxu1 %v7632_v62  ;;  %v7724_v62 = vld [vmem:[#allocation5 + $0x36c] ss:$16 sps:$4 sm:$0xff]  }
  0xf2   :  { %4900 = vmatpush1.bf16.msra.mxu0 %v7629_v61  ;;  %5311 = vmatprep.subr.bf16.mxu1 %v7640_v0  ;;  %v7721_v61 = vld [vmem:[#allocation5 + $0x764] ss:$16 sps:$4 sm:$0xff]   ;;  %v7722_v0 = vld [vmem:[#allocation5 + $0x368] ss:$16 sps:$4 sm:$0xff]  }
  0xf3   :  { %4901 = vmatprep.subr.bf16.mxu0 %v7637_v63  ;;  %v7719_v63 = vld [vmem:[#allocation5 + $0x760] ss:$16 sps:$4 sm:$0xff]  }
  0xf5   :  { %5312 = vmatpush1.bf16.msra.mxu1 %v7638_v2  ;;  %v7730_v2 = vld [vmem:[#allocation5 + $0x38c] ss:$16 sps:$4 sm:$0xff]  }
  0xf6   :  { %4902 = vmatpush1.bf16.msra.mxu0 %v7635_v1  ;;  %5313 = vmatprep.subr.bf16.mxu1 %v7646_v4  ;;  %v7727_v1 = vld [vmem:[#allocation5 + $0x784] ss:$16 sps:$4 sm:$0xff]   ;;  %v7728_v4 = vld [vmem:[#allocation5 + $0x388] ss:$16 sps:$4 sm:$0xff]  }
  0xf7   :  { %4903 = vmatprep.subr.bf16.mxu0 %v7643_v3  ;;  %v7725_v3 = vld [vmem:[#allocation5 + $0x780] ss:$16 sps:$4 sm:$0xff]  }
  0xf9   :  { %5314 = vmatpush1.bf16.msra.mxu1 %v7644_v6  ;;  %v7736_v6 = vld [vmem:[#allocation5 + $0x3ac] ss:$16 sps:$4 sm:$0xff]  }
  0xfa   :  { %4904 = vmatpush1.bf16.msra.mxu0 %v7641_v5  ;;  %5315 = vmatprep.subr.bf16.mxu1 %v7652_v9  ;;  %v7733_v5 = vld [vmem:[#allocation5 + $0x7a4] ss:$16 sps:$4 sm:$0xff]   ;;  %v7734_v9 = vld [vmem:[#allocation5 + $0x3a8] ss:$16 sps:$4 sm:$0xff]  }
  0xfb   :  { %4905 = vmatprep.subr.bf16.mxu0 %v7649_v7  ;;  %v7731_v7 = vld [vmem:[#allocation5 + $0x7a0] ss:$16 sps:$4 sm:$0xff]  }
  0xfd   :  { %5316 = vmatpush1.bf16.msra.mxu1 %v7650_v12  ;;  %v7742_v12 = vld [vmem:[#allocation5 + $0x3cc] ss:$16 sps:$4 sm:$0xff]  }
  0xfe   :  { %4906 = vmatpush1.bf16.msra.mxu0 %v7647_v10  ;;  %5326 = vmatprep.subr.bf16.mxu1 %v7658_v15  ;;  %v7739_v10 = vld [vmem:[#allocation5 + $0x7c4] ss:$16 sps:$4 sm:$0xff]  }
  0xff   :  { %4916 = vmatprep.subr.bf16.mxu0 %v7655_v14  ;;  %v7740_v14 = vld [vmem:[#allocation5 + $0x3c8] ss:$16 sps:$4 sm:$0xff]   ;;  %v7745_v15 = vld [vmem:[#allocation5 + $0x7e4] ss:$16 sps:$4 sm:$0xff]  }
 0x100   :  { %5318 = vmatmul.mubr.bf16.vlgmr.msra.gmra.mrb[4].mxu1 %v9059_v8  ;;  %v7676_v8 = vld [vmem:[#allocation5 + $0x26c] ss:$16 sps:$4 sm:$0xff]  }
 0x101   :  { %4908 = vmatmul.mubr.bf16.vlgmr.msra.gmra.mrb[0].mxu0 %v9069_v16  ;;  %5327 = vmatpush1.bf16.msra.mxu1 %v7656_v18  ;;  %v7743_v18 = vld [vmem:[#allocation5 + $0x7e0] ss:$16 sps:$4 sm:$0xff]  }
 0x102   :  { %4917 = vmatpush1.bf16.msra.mxu0 %v7653_v17  ;;  %5328 = vmatprep.subr.bf16.mxu1 %v7664_v20  ;;  %v7748_v17 = vld [vmem:[#allocation5 + $0x3ec] ss:$16 sps:$4 sm:$0xff]   ;;  %v7751_v20 = vld [vmem:[#allocation5 + $0x804] ss:$16 sps:$4 sm:$0xff]  }
 0x103   :  { %4918 = vmatprep.subr.bf16.mxu0 %v7661_v19  ;;  %4948 = vmatprep.mubr.bf16.mxu0 %v9073_v23  ;;  %v7746_v19 = vld [vmem:[#allocation5 + $0x3e8] ss:$16 sps:$4 sm:$0xff]  }
 0x104   :  { %5358 = vmatprep.mubr.bf16.mxu1 %v9055_v52  ;;  %v7685_v52 = vld [vmem:[#allocation5 + $0x6a4] ss:$16 sps:$4 sm:$0xff]  }
 0x105   :  { %5329 = vmatpush1.bf16.msra.mxu1 %v7662_v24  ;;  %v7749_v24 = vld [vmem:[#allocation5 + $0x800] ss:$16 sps:$4 sm:$0xff]  }
 0x106   :  { %4919 = vmatpush1.bf16.msra.mxu0 %v7659_v22  ;;  %5330 = vmatprep.subr.bf16.mxu1 %v7670_v26  ;;  %v7754_v22 = vld [vmem:[#allocation5 + $0x40c] ss:$16 sps:$4 sm:$0xff]  }
 0x107   :  { %4920 = vmatprep.subr.bf16.mxu0 %v7667_v25  ;;  %v9077_v25 = vpack.c.bf16 %v121_v21, %v121_v21  ;;  %v124_v26 = vld [vmem:[#allocation2 + $0x48] sm:$0xff] }
 0x108   :  { %v7836_v21 = vld [vmem:[#allocation5 + $0x5c8] ss:$16 sps:$4 sm:$0xff]  }
 0x109   :  { %5331 = vmatpush1.bf16.msra.mxu1 %v7668_v28  ;;  %v7757_v28 = vld [vmem:[#allocation5 + $0x824] ss:$16 sps:$4 sm:$0xff]  }
 0x10a   :  { %4921 = vmatpush1.bf16.msra.mxu0 %v7665_v27  ;;  %5332 = vmatprep.subr.bf16.mxu1 %v7676_v8  ;;  %v7752_v27 = vld [vmem:[#allocation5 + $0x408] ss:$16 sps:$4 sm:$0xff]   ;;  %v9079_v8 = vpack.c.bf16 %v124_v26, %v124_v26  ;;  %v7839_v26 = vld [vmem:[#allocation5 + $0x9e0] ss:$16 sps:$4 sm:$0xff]  }
 0x10b   :  { %4922 = vmatprep.subr.bf16.mxu0 %v7673_v29  ;;  %v7760_v29 = vld [vmem:[#allocation5 + $0x42c] ss:$16 sps:$4 sm:$0xff]  }
 0x10d   :  { %5333 = vmatpush1.bf16.msra.mxu1 %v7674_v31  ;;  %v7758_v31 = vld [vmem:[#allocation5 + $0x428] ss:$16 sps:$4 sm:$0xff]  }
 0x10e   :  { %4923 = vmatpush1.bf16.msra.mxu0 %v7671_v30  ;;  %5334 = vmatprep.subr.bf16.mxu1 %v7682_v33  ;;  %v7755_v30 = vld [vmem:[#allocation5 + $0x820] ss:$16 sps:$4 sm:$0xff]   ;;  %v7766_v33 = vld [vmem:[#allocation5 + $0x44c] ss:$16 sps:$4 sm:$0xff]  }
 0x10f   :  { %4924 = vmatprep.subr.bf16.mxu0 %v7679_v32  ;;  %v7763_v32 = vld [vmem:[#allocation5 + $0x844] ss:$16 sps:$4 sm:$0xff]  }
 0x111   :  { %5335 = vmatpush1.bf16.msra.mxu1 %v7680_v35  ;;  %v7764_v35 = vld [vmem:[#allocation5 + $0x448] ss:$16 sps:$4 sm:$0xff]  }
 0x112   :  { %4925 = vmatpush1.bf16.msra.mxu0 %v7677_v34  ;;  %5336 = vmatprep.subr.bf16.mxu1 %v7688_v37  ;;  %v7761_v34 = vld [vmem:[#allocation5 + $0x840] ss:$16 sps:$4 sm:$0xff]  }
 0x113   :  { %4926 = vmatprep.subr.bf16.mxu0 %v7685_v52  ;;  %v7769_v52 = vld [vmem:[#allocation5 + $0x864] ss:$16 sps:$4 sm:$0xff]   ;;  %v7767_v37 = vld [vmem:[#allocation5 + $0x860] ss:$16 sps:$4 sm:$0xff]  }
 0x115   :  { %5337 = vmatpush1.bf16.msra.mxu1 %v7686_v39  ;;  %v7775_v39 = vld [vmem:[#allocation5 + $0x884] ss:$16 sps:$4 sm:$0xff]  }
 0x116   :  { %4927 = vmatpush1.bf16.msra.mxu0 %v7683_v38  ;;  %5338 = vmatprep.subr.bf16.mxu1 %v7694_v41  ;;  %v7770_v38 = vld [vmem:[#allocation5 + $0x468] ss:$16 sps:$4 sm:$0xff]   ;;  %v7773_v41 = vld [vmem:[#allocation5 + $0x880] ss:$16 sps:$4 sm:$0xff]  }
 0x117   :  { %4928 = vmatprep.subr.bf16.mxu0 %v7691_v40  ;;  %v7778_v40 = vld [vmem:[#allocation5 + $0x48c] ss:$16 sps:$4 sm:$0xff]  }
 0x119   :  { %5339 = vmatpush1.bf16.msra.mxu1 %v7692_v43  ;;  %v7784_v43 = vld [vmem:[#allocation5 + $0x4ac] ss:$16 sps:$4 sm:$0xff]  }
 0x11a   :  { %4929 = vmatpush1.bf16.msra.mxu0 %v7689_v42  ;;  %5340 = vmatprep.subr.bf16.mxu1 %v7700_v45  ;;  %v7781_v42 = vld [vmem:[#allocation5 + $0x8a4] ss:$16 sps:$4 sm:$0xff]   ;;  %v7782_v45 = vld [vmem:[#allocation5 + $0x4a8] ss:$16 sps:$4 sm:$0xff]  }
 0x11b   :  { %4930 = vmatprep.subr.bf16.mxu0 %v7697_v44  ;;  %v7779_v44 = vld [vmem:[#allocation5 + $0x8a0] ss:$16 sps:$4 sm:$0xff]  }
 0x11d   :  { %5341 = vmatpush1.bf16.msra.mxu1 %v7698_v47  ;;  %v7790_v47 = vld [vmem:[#allocation5 + $0x4cc] ss:$16 sps:$4 sm:$0xff]  }
 0x11e   :  { %4931 = vmatpush1.bf16.msra.mxu0 %v7695_v46  ;;  %5342 = vmatprep.subr.bf16.mxu1 %v7706_v49  ;;  %v7787_v46 = vld [vmem:[#allocation5 + $0x8c4] ss:$16 sps:$4 sm:$0xff]   ;;  %v7788_v49 = vld [vmem:[#allocation5 + $0x4c8] ss:$16 sps:$4 sm:$0xff]  }
 0x11f   :  { %4932 = vmatprep.subr.bf16.mxu0 %v7703_v48  ;;  %v7785_v48 = vld [vmem:[#allocation5 + $0x8c0] ss:$16 sps:$4 sm:$0xff]  }
 0x121   :  { %5343 = vmatpush1.bf16.msra.mxu1 %v7704_v51  ;;  %v7796_v51 = vld [vmem:[#allocation5 + $0x4ec] ss:$16 sps:$4 sm:$0xff]  }
 0x122   :  { %4933 = vmatpush1.bf16.msra.mxu0 %v7701_v50  ;;  %5344 = vmatprep.subr.bf16.mxu1 %v7712_v54  ;;  %v7793_v50 = vld [vmem:[#allocation5 + $0x8e4] ss:$16 sps:$4 sm:$0xff]   ;;  %v7794_v54 = vld [vmem:[#allocation5 + $0x4e8] ss:$16 sps:$4 sm:$0xff]  }
 0x123   :  { %4934 = vmatprep.subr.bf16.mxu0 %v7709_v53  ;;  %v7791_v53 = vld [vmem:[#allocation5 + $0x8e0] ss:$16 sps:$4 sm:$0xff]  }
 0x125   :  { %5345 = vmatpush1.bf16.msra.mxu1 %v7710_v56  ;;  %v7802_v56 = vld [vmem:[#allocation5 + $0x50c] ss:$16 sps:$4 sm:$0xff]  }
 0x126   :  { %4935 = vmatpush1.bf16.msra.mxu0 %v7707_v55  ;;  %5346 = vmatprep.subr.bf16.mxu1 %v7718_v58  ;;  %v7799_v55 = vld [vmem:[#allocation5 + $0x904] ss:$16 sps:$4 sm:$0xff]   ;;  %v7800_v58 = vld [vmem:[#allocation5 + $0x508] ss:$16 sps:$4 sm:$0xff]  }
 0x127   :  { %4936 = vmatprep.subr.bf16.mxu0 %v7715_v57  ;;  %v7797_v57 = vld [vmem:[#allocation5 + $0x900] ss:$16 sps:$4 sm:$0xff]  }
 0x129   :  { %5347 = vmatpush1.bf16.msra.mxu1 %v7716_v60  ;;  %v7808_v60 = vld [vmem:[#allocation5 + $0x52c] ss:$16 sps:$4 sm:$0xff]  }
 0x12a   :  { %4937 = vmatpush1.bf16.msra.mxu0 %v7713_v59  ;;  %5348 = vmatprep.subr.bf16.mxu1 %v7724_v62  ;;  %v7805_v59 = vld [vmem:[#allocation5 + $0x924] ss:$16 sps:$4 sm:$0xff]   ;;  %v7806_v62 = vld [vmem:[#allocation5 + $0x528] ss:$16 sps:$4 sm:$0xff]  }
 0x12b   :  { %4938 = vmatprep.subr.bf16.mxu0 %v7721_v61  ;;  %v7803_v61 = vld [vmem:[#allocation5 + $0x920] ss:$16 sps:$4 sm:$0xff]  }
 0x12d   :  { %5349 = vmatpush1.bf16.msra.mxu1 %v7722_v0  ;;  %v7814_v0 = vld [vmem:[#allocation5 + $0x54c] ss:$16 sps:$4 sm:$0xff]  }
 0x12e   :  { %4939 = vmatpush1.bf16.msra.mxu0 %v7719_v63  ;;  %5350 = vmatprep.subr.bf16.mxu1 %v7730_v2  ;;  %v7811_v63 = vld [vmem:[#allocation5 + $0x944] ss:$16 sps:$4 sm:$0xff]   ;;  %v7812_v2 = vld [vmem:[#allocation5 + $0x548] ss:$16 sps:$4 sm:$0xff]  }
 0x12f   :  { %4940 = vmatprep.subr.bf16.mxu0 %v7727_v1  ;;  %v7809_v1 = vld [vmem:[#allocation5 + $0x940] ss:$16 sps:$4 sm:$0xff]  }
 0x131   :  { %5351 = vmatpush1.bf16.msra.mxu1 %v7728_v4  ;;  %v7820_v4 = vld [vmem:[#allocation5 + $0x56c] ss:$16 sps:$4 sm:$0xff]  }
 0x132   :  { %4941 = vmatpush1.bf16.msra.mxu0 %v7725_v3  ;;  %5352 = vmatprep.subr.bf16.mxu1 %v7736_v6  ;;  %v7817_v3 = vld [vmem:[#allocation5 + $0x964] ss:$16 sps:$4 sm:$0xff]   ;;  %v7818_v6 = vld [vmem:[#allocation5 + $0x568] ss:$16 sps:$4 sm:$0xff]  }
 0x133   :  { %4942 = vmatprep.subr.bf16.mxu0 %v7733_v5  ;;  %v7815_v5 = vld [vmem:[#allocation5 + $0x960] ss:$16 sps:$4 sm:$0xff]  }
 0x135   :  { %5353 = vmatpush1.bf16.msra.mxu1 %v7734_v9  ;;  %v7826_v9 = vld [vmem:[#allocation5 + $0x58c] ss:$16 sps:$4 sm:$0xff]  }
 0x136   :  { %4943 = vmatpush1.bf16.msra.mxu0 %v7731_v7  ;;  %5354 = vmatprep.subr.bf16.mxu1 %v7742_v12  ;;  %v7823_v7 = vld [vmem:[#allocation5 + $0x984] ss:$16 sps:$4 sm:$0xff]   ;;  %v7824_v12 = vld [vmem:[#allocation5 + $0x588] ss:$16 sps:$4 sm:$0xff]  }
 0x137   :  { %4944 = vmatprep.subr.bf16.mxu0 %v7739_v10  ;;  %v7821_v10 = vld [vmem:[#allocation5 + $0x980] ss:$16 sps:$4 sm:$0xff]  }
 0x139   :  { %5355 = vmatpush1.bf16.msra.mxu1 %v7740_v14  ;;  %v7832_v14 = vld [vmem:[#allocation5 + $0x5ac] ss:$16 sps:$4 sm:$0xff]  }
 0x13a   :  { %4945 = vmatpush1.bf16.msra.mxu0 %v7737_v13  ;;  %5356 = vmatprep.subr.bf16.mxu1 %v7748_v17  ;;  %v7829_v13 = vld [vmem:[#allocation5 + $0x9a4] ss:$16 sps:$4 sm:$0xff]   ;;  %v7830_v17 = vld [vmem:[#allocation5 + $0x5a8] ss:$16 sps:$4 sm:$0xff]  }
 0x13b   :  { %4946 = vmatprep.subr.bf16.mxu0 %v7745_v15  ;;  %v7827_v15 = vld [vmem:[#allocation5 + $0x9a0] ss:$16 sps:$4 sm:$0xff]  }
 0x13d   :  { %5357 = vmatpush1.bf16.msra.mxu1 %v7746_v19  ;;  %v7838_v19 = vld [vmem:[#allocation5 + $0x5cc] ss:$16 sps:$4 sm:$0xff]  }
 0x13e   :  { %4947 = vmatpush1.bf16.msra.mxu0 %v7743_v18  ;;  %5367 = vmatprep.subr.bf16.mxu1 %v7754_v22  ;;  %v7835_v18 = vld [vmem:[#allocation5 + $0x9c4] ss:$16 sps:$4 sm:$0xff]  }
 0x13f   :  { %4957 = vmatprep.subr.bf16.mxu0 %v7751_v20  ;;  %v7833_v20 = vld [vmem:[#allocation5 + $0x9c0] ss:$16 sps:$4 sm:$0xff]   ;;  %v7841_v22 = vld [vmem:[#allocation5 + $0x9e4] ss:$16 sps:$4 sm:$0xff]  }
 0x140   :  { %5359 = vmatmul.mubr.bf16.vlgmr.msra.gmra.mrb[4].mxu1 %v9061_v11  ;;  %v7772_v11 = vld [vmem:[#allocation5 + $0x46c] ss:$16 sps:$4 sm:$0xff]  }
 0x141   :  { %4949 = vmatmul.mubr.bf16.vlgmr.msra.gmra.mrb[0].mxu0 %v9077_v25  ;;  %5368 = vmatpush1.bf16.msra.mxu1 %v7752_v27  ;;  %v7842_v27 = vld [vmem:[#allocation5 + $0x5e8] ss:$16 sps:$4 sm:$0xff]  }
 0x142   :  { %4958 = vmatpush1.bf16.msra.mxu0 %v7749_v24  ;;  %5369 = vmatprep.subr.bf16.mxu1 %v7760_v29  ;;  %v7844_v24 = vld [vmem:[#allocation5 + $0x5ec] ss:$16 sps:$4 sm:$0xff]   ;;  %v7847_v29 = vld [vmem:[#allocation5 + $0xa04] ss:$16 sps:$4 sm:$0xff]  }
 0x143   :  { %4959 = vmatprep.subr.bf16.mxu0 %v7757_v28  ;;  %4989 = vmatprep.mubr.bf16.mxu0 %v9079_v8  ;;  %v123_v28 = vld [vmem:[#allocation2 + $0x40] sm:$0xff] }
 0x144   :  { %5399 = vmatprep.mubr.bf16.mxu1 %v9066_v36  ;;  %v7776_v36 = vld [vmem:[#allocation5 + $0x488] ss:$16 sps:$4 sm:$0xff]  }
 0x145   :  { %5370 = vmatpush1.bf16.msra.mxu1 %v7758_v31  ;;  %v7845_v31 = vld [vmem:[#allocation5 + $0xa00] ss:$16 sps:$4 sm:$0xff]  }
 0x146   :  { %4960 = vmatpush1.bf16.msra.mxu0 %v7755_v30  ;;  %5371 = vmatprep.subr.bf16.mxu1 %v7766_v33  ;;  %v7850_v30 = vld [vmem:[#allocation5 + $0x60c] ss:$16 sps:$4 sm:$0xff]  }
 0x147   :  { %4961 = vmatprep.subr.bf16.mxu0 %v7763_v32  ;;  %v9085_v32 = vpack.c.bf16 %v123_v28, %v123_v28  ;;  %v126_v33 = vld [vmem:[#allocation2 + $0x58] sm:$0xff]  ;;  %v7923_v28 = vld [vmem:[#allocation5 + $0xba0] ss:$16 sps:$4 sm:$0xff]  }
 0x149   :  { %5372 = vmatpush1.bf16.msra.mxu1 %v7764_v35  ;;  %v7853_v35 = vld [vmem:[#allocation5 + $0xa24] ss:$16 sps:$4 sm:$0xff]  }
 0x14a   :  { %4962 = vmatpush1.bf16.msra.mxu0 %v7761_v34  ;;  %5373 = vmatprep.subr.bf16.mxu1 %v7772_v11  ;;  %v7848_v34 = vld [vmem:[#allocation5 + $0x608] ss:$16 sps:$4 sm:$0xff]   ;;  %v9087_v11 = vpack.c.bf16 %v126_v33, %v126_v33  ;;  %v7929_v33 = vld [vmem:[#allocation5 + $0xbc0] ss:$16 sps:$4 sm:$0xff]  }
 0x14b   :  { %4963 = vmatprep.subr.bf16.mxu0 %v7769_v52  ;;  %v7856_v52 = vld [vmem:[#allocation5 + $0x62c] ss:$16 sps:$4 sm:$0xff]  }
 0x14d   :  { %5374 = vmatpush1.bf16.msra.mxu1 %v7770_v38  ;;  %v7854_v38 = vld [vmem:[#allocation5 + $0x628] ss:$16 sps:$4 sm:$0xff]  }
 0x14e   :  { %4964 = vmatpush1.bf16.msra.mxu0 %v7767_v37  ;;  %5375 = vmatprep.subr.bf16.mxu1 %v7778_v40  ;;  %v7851_v37 = vld [vmem:[#allocation5 + $0xa20] ss:$16 sps:$4 sm:$0xff]   ;;  %v7862_v40 = vld [vmem:[#allocation5 + $0x64c] ss:$16 sps:$4 sm:$0xff]  }
 0x14f   :  { %4965 = vmatprep.subr.bf16.mxu0 %v7775_v39  ;;  %v7859_v39 = vld [vmem:[#allocation5 + $0xa44] ss:$16 sps:$4 sm:$0xff]  }
 0x151   :  { %5376 = vmatpush1.bf16.msra.mxu1 %v7776_v36  ;;  %v7860_v36 = vld [vmem:[#allocation5 + $0x648] ss:$16 sps:$4 sm:$0xff]  }
 0x152   :  { %4966 = vmatpush1.bf16.msra.mxu0 %v7773_v41  ;;  %5377 = vmatprep.subr.bf16.mxu1 %v7784_v43  ;;  %v7857_v41 = vld [vmem:[#allocation5 + $0xa40] ss:$16 sps:$4 sm:$0xff]  }
 0x153   :  { %4967 = vmatprep.subr.bf16.mxu0 %v7781_v42  ;;  %v7865_v42 = vld [vmem:[#allocation5 + $0xa64] ss:$16 sps:$4 sm:$0xff]   ;;  %v7863_v43 = vld [vmem:[#allocation5 + $0xa60] ss:$16 sps:$4 sm:$0xff]  }
 0x155   :  { %5378 = vmatpush1.bf16.msra.mxu1 %v7782_v45  ;;  %v7871_v45 = vld [vmem:[#allocation5 + $0xa84] ss:$16 sps:$4 sm:$0xff]  }
 0x156   :  { %4968 = vmatpush1.bf16.msra.mxu0 %v7779_v44  ;;  %5379 = vmatprep.subr.bf16.mxu1 %v7790_v47  ;;  %v7866_v44 = vld [vmem:[#allocation5 + $0x668] ss:$16 sps:$4 sm:$0xff]   ;;  %v7869_v47 = vld [vmem:[#allocation5 + $0xa80] ss:$16 sps:$4 sm:$0xff]  }
 0x157   :  { %4969 = vmatprep.subr.bf16.mxu0 %v7787_v46  ;;  %v7874_v46 = vld [vmem:[#allocation5 + $0x68c] ss:$16 sps:$4 sm:$0xff]  }
 0x159   :  { %5380 = vmatpush1.bf16.msra.mxu1 %v7788_v49  ;;  %v7880_v49 = vld [vmem:[#allocation5 + $0x6ac] ss:$16 sps:$4 sm:$0xff]  }
 0x15a   :  { %4970 = vmatpush1.bf16.msra.mxu0 %v7785_v48  ;;  %5381 = vmatprep.subr.bf16.mxu1 %v7796_v51  ;;  %v7877_v48 = vld [vmem:[#allocation5 + $0xaa4] ss:$16 sps:$4 sm:$0xff]   ;;  %v7878_v51 = vld [vmem:[#allocation5 + $0x6a8] ss:$16 sps:$4 sm:$0xff]  }
 0x15b   :  { %4971 = vmatprep.subr.bf16.mxu0 %v7793_v50  ;;  %v7875_v50 = vld [vmem:[#allocation5 + $0xaa0] ss:$16 sps:$4 sm:$0xff]  }
 0x15d   :  { %5382 = vmatpush1.bf16.msra.mxu1 %v7794_v54  ;;  %v7886_v54 = vld [vmem:[#allocation5 + $0x6cc] ss:$16 sps:$4 sm:$0xff]  }
 0x15e   :  { %4972 = vmatpush1.bf16.msra.mxu0 %v7791_v53  ;;  %5383 = vmatprep.subr.bf16.mxu1 %v7802_v56  ;;  %v7883_v53 = vld [vmem:[#allocation5 + $0xac4] ss:$16 sps:$4 sm:$0xff]  }
 0x15f   :  { %4973 = vmatprep.subr.bf16.mxu0 %v7799_v55 }
 0x161   :  { %5384 = vmatpush1.bf16.msra.mxu1 %v7800_v58  ;;  %v7881_v58 = vld [vmem:[#allocation5 + $0xac0] ss:$16 sps:$4 sm:$0xff]  }
 0x162   :  { %4974 = vmatpush1.bf16.msra.mxu0 %v7797_v57  ;;  %5385 = vmatprep.subr.bf16.mxu1 %v7808_v60 }
 0x163   :  { %4975 = vmatprep.subr.bf16.mxu0 %v7805_v59  ;;  %v7884_v59 = vld [vmem:[#allocation5 + $0x6c8] ss:$16 sps:$4 sm:$0xff]  }
 0x165   :  { %5386 = vmatpush1.bf16.msra.mxu1 %v7806_v62  ;;  %v7892_v62 = vld [vmem:[#allocation5 + $0x6ec] ss:$16 sps:$4 sm:$0xff]  }
 0x166   :  { %4976 = vmatpush1.bf16.msra.mxu0 %v7803_v61  ;;  %5387 = vmatprep.subr.bf16.mxu1 %v7814_v0  ;;  %v7889_v61 = vld [vmem:[#allocation5 + $0xae4] ss:$16 sps:$4 sm:$0xff]   ;;  %v7890_v0 = vld [vmem:[#allocation5 + $0x6e8] ss:$16 sps:$4 sm:$0xff]  }
 0x167   :  { %4977 = vmatprep.subr.bf16.mxu0 %v7811_v63  ;;  %v7887_v63 = vld [vmem:[#allocation5 + $0xae0] ss:$16 sps:$4 sm:$0xff]  }
 0x169   :  { %5388 = vmatpush1.bf16.msra.mxu1 %v7812_v2  ;;  %v7898_v2 = vld [vmem:[#allocation5 + $0x70c] ss:$16 sps:$4 sm:$0xff]  }
 0x16a   :  { %4978 = vmatpush1.bf16.msra.mxu0 %v7809_v1  ;;  %5389 = vmatprep.subr.bf16.mxu1 %v7820_v4  ;;  %v7895_v1 = vld [vmem:[#allocation5 + $0xb04] ss:$16 sps:$4 sm:$0xff]   ;;  %v7896_v4 = vld [vmem:[#allocation5 + $0x708] ss:$16 sps:$4 sm:$0xff]  }
 0x16b   :  { %4979 = vmatprep.subr.bf16.mxu0 %v7817_v3  ;;  %v7893_v3 = vld [vmem:[#allocation5 + $0xb00] ss:$16 sps:$4 sm:$0xff]  }
 0x16d   :  { %5390 = vmatpush1.bf16.msra.mxu1 %v7818_v6  ;;  %v7904_v6 = vld [vmem:[#allocation5 + $0x72c] ss:$16 sps:$4 sm:$0xff]  }
 0x16e   :  { %4980 = vmatpush1.bf16.msra.mxu0 %v7815_v5  ;;  %5391 = vmatprep.subr.bf16.mxu1 %v7826_v9  ;;  %v7901_v5 = vld [vmem:[#allocation5 + $0xb24] ss:$16 sps:$4 sm:$0xff]   ;;  %v7902_v9 = vld [vmem:[#allocation5 + $0x728] ss:$16 sps:$4 sm:$0xff]  }
 0x16f   :  { %4981 = vmatprep.subr.bf16.mxu0 %v7823_v7  ;;  %v7899_v7 = vld [vmem:[#allocation5 + $0xb20] ss:$16 sps:$4 sm:$0xff]  }
 0x171   :  { %5392 = vmatpush1.bf16.msra.mxu1 %v7824_v12  ;;  %v7910_v12 = vld [vmem:[#allocation5 + $0x74c] ss:$16 sps:$4 sm:$0xff]  }
 0x172   :  { %4982 = vmatpush1.bf16.msra.mxu0 %v7821_v10  ;;  %5393 = vmatprep.subr.bf16.mxu1 %v7832_v14  ;;  %v7907_v10 = vld [vmem:[#allocation5 + $0xb44] ss:$16 sps:$4 sm:$0xff]   ;;  %v7908_v14 = vld [vmem:[#allocation5 + $0x748] ss:$16 sps:$4 sm:$0xff]  }
 0x173   :  { %4983 = vmatprep.subr.bf16.mxu0 %v7829_v13  ;;  %v7905_v13 = vld [vmem:[#allocation5 + $0xb40] ss:$16 sps:$4 sm:$0xff]  }
 0x175   :  { %5394 = vmatpush1.bf16.msra.mxu1 %v7830_v17  ;;  %v7916_v17 = vld [vmem:[#allocation5 + $0x76c] ss:$16 sps:$4 sm:$0xff]  }
 0x176   :  { %4984 = vmatpush1.bf16.msra.mxu0 %v7827_v15  ;;  %5395 = vmatprep.subr.bf16.mxu1 %v7838_v19  ;;  %v7913_v15 = vld [vmem:[#allocation5 + $0xb64] ss:$16 sps:$4 sm:$0xff]   ;;  %v7914_v19 = vld [vmem:[#allocation5 + $0x768] ss:$16 sps:$4 sm:$0xff]  }
 0x177   :  { %4985 = vmatprep.subr.bf16.mxu0 %v7835_v18  ;;  %v7911_v18 = vld [vmem:[#allocation5 + $0xb60] ss:$16 sps:$4 sm:$0xff]  }
 0x179   :  { %5396 = vmatpush1.bf16.msra.mxu1 %v7836_v21  ;;  %v7922_v21 = vld [vmem:[#allocation5 + $0x78c] ss:$16 sps:$4 sm:$0xff]  }
 0x17a   :  { %4986 = vmatpush1.bf16.msra.mxu0 %v7833_v20  ;;  %5397 = vmatprep.subr.bf16.mxu1 %v7844_v24  ;;  %v7919_v20 = vld [vmem:[#allocation5 + $0xb84] ss:$16 sps:$4 sm:$0xff]   ;;  %v7920_v24 = vld [vmem:[#allocation5 + $0x788] ss:$16 sps:$4 sm:$0xff]  }
 0x17b   :  { %4987 = vmatprep.subr.bf16.mxu0 %v7841_v22  ;;  %v7917_v22 = vld [vmem:[#allocation5 + $0xb80] ss:$16 sps:$4 sm:$0xff]  }
 0x17d   :  { %5398 = vmatpush1.bf16.msra.mxu1 %v7842_v27  ;;  %v7928_v27 = vld [vmem:[#allocation5 + $0x7ac] ss:$16 sps:$4 sm:$0xff]  }
 0x17e   :  { %4988 = vmatpush1.bf16.msra.mxu0 %v7839_v26  ;;  %5408 = vmatprep.subr.bf16.mxu1 %v7850_v30  ;;  %v7925_v26 = vld [vmem:[#allocation5 + $0xba4] ss:$16 sps:$4 sm:$0xff]  }
 0x17f   :  { %4998 = vmatprep.subr.bf16.mxu0 %v7847_v29  ;;  %v7926_v29 = vld [vmem:[#allocation5 + $0x7a8] ss:$16 sps:$4 sm:$0xff]   ;;  %v7931_v30 = vld [vmem:[#allocation5 + $0xbc4] ss:$16 sps:$4 sm:$0xff]  }
 0x180   :  { %5400 = vmatmul.mubr.bf16.vlgmr.msra.gmra.mrb[4].mxu1 %v9069_v16  ;;  %v7868_v16 = vld [vmem:[#allocation5 + $0x66c] ss:$16 sps:$4 sm:$0xff]  }
 0x181   :  { %4990 = vmatmul.mubr.bf16.vlgmr.msra.gmra.mrb[0].mxu0 %v9085_v32  ;;  %5409 = vmatpush1.bf16.msra.mxu1 %v7848_v34  ;;  %v7932_v34 = vld [vmem:[#allocation5 + $0x7c8] ss:$16 sps:$4 sm:$0xff]  }
 0x182   :  { %4999 = vmatpush1.bf16.msra.mxu0 %v7845_v31  ;;  %5410 = vmatprep.subr.bf16.mxu1 %v7856_v52  ;;  %v7934_v31 = vld [vmem:[#allocation5 + $0x7cc] ss:$16 sps:$4 sm:$0xff]  }
 0x183   :  { %5000 = vmatprep.subr.bf16.mxu0 %v7853_v35  ;;  %5030 = vmatprep.mubr.bf16.mxu0 %v9087_v11  ;;  %v7937_v35 = vld [vmem:[#allocation5 + $0xbe4] ss:$16 sps:$4 sm:$0xff]   ;;  %v7940_v52 = vld [vmem:[#allocation5 + $0x7ec] ss:$16 sps:$4 sm:$0xff]  }
 0x184   :  { %5440 = vmatprep.mubr.bf16.mxu1 %v9073_v23  ;;  %v7872_v23 = vld [vmem:[#allocation5 + $0x688] ss:$16 sps:$4 sm:$0xff]  }
 0x185   :  { %5411 = vmatpush1.bf16.msra.mxu1 %v7854_v38  ;;  %v7938_v38 = vld [vmem:[#allocation5 + $0x7e8] ss:$16 sps:$4 sm:$0xff]  }
 0x186   :  { %5001 = vmatpush1.bf16.msra.mxu0 %v7851_v37  ;;  %5412 = vmatprep.subr.bf16.mxu1 %v7862_v40  ;;  %v7935_v37 = vld [vmem:[#allocation5 + $0xbe0] ss:$16 sps:$4 sm:$0xff]  }
 0x187   :  { %5002 = vmatprep.subr.bf16.mxu0 %v7859_v39  ;;  %v7943_v39 = vld [vmem:[#allocation5 + $0xc04] ss:$16 sps:$4 sm:$0xff]  }
 0x188   :  { %v125_v40 = vld [vmem:[#allocation2 + $0x50] sm:$0xff] }
 0x189   :  { %5413 = vmatpush1.bf16.msra.mxu1 %v7860_v36  ;;  %v128_v36 = vld [vmem:[#allocation2 + $0x68] sm:$0xff] }
 0x18a   :  { %5003 = vmatpush1.bf16.msra.mxu0 %v7857_v41  ;;  %5414 = vmatprep.subr.bf16.mxu1 %v7868_v16  ;;  %v7946_v41 = vld [vmem:[#allocation5 + $0x80c] ss:$16 sps:$4 sm:$0xff]   ;;  %v7941_v16 = vld [vmem:[#allocation5 + $0xc00] ss:$16 sps:$4 sm:$0xff]  }
 0x18b   :  { %5004 = vmatprep.subr.bf16.mxu0 %v7865_v42  ;;  %v9097_v42 = vpack.c.bf16 %v125_v40, %v125_v40  ;;  %v8030_v40 = vld [vmem:[#allocation5 + $0x9cc] ss:$16 sps:$4 sm:$0xff]  }
 0x18d   :  { %5415 = vmatpush1.bf16.msra.mxu1 %v7866_v44  ;;  %v7949_v44 = vld [vmem:[#allocation5 + $0xc24] ss:$16 sps:$4 sm:$0xff]  }
 0x18e   :  { %5005 = vmatpush1.bf16.msra.mxu0 %v7863_v43  ;;  %5416 = vmatprep.subr.bf16.mxu1 %v7874_v46  ;;  %v7944_v43 = vld [vmem:[#allocation5 + $0x808] ss:$16 sps:$4 sm:$0xff]   ;;  %v9099_v46 = vpack.c.bf16 %v128_v36, %v128_v36 }
 0x18f   :  { %5006 = vmatprep.subr.bf16.mxu0 %v7871_v45  ;;  %v7952_v45 = vld [vmem:[#allocation5 + $0x82c] ss:$16 sps:$4 sm:$0xff]   ;;  %v8028_v36 = vld [vmem:[#allocation5 + $0x9c8] ss:$16 sps:$4 sm:$0xff]  }
 0x191   :  { %5417 = vmatpush1.bf16.msra.mxu1 %v7872_v23  ;;  %v7950_v23 = vld [vmem:[#allocation5 + $0x828] ss:$16 sps:$4 sm:$0xff]  }
 0x192   :  { %5007 = vmatpush1.bf16.msra.mxu0 %v7869_v47  ;;  %5418 = vmatprep.subr.bf16.mxu1 %v7880_v49  ;;  %v7947_v47 = vld [vmem:[#allocation5 + $0xc20] ss:$16 sps:$4 sm:$0xff]   ;;  %v7958_v49 = vld [vmem:[#allocation5 + $0x84c] ss:$16 sps:$4 sm:$0xff]  }
 0x193   :  { %5008 = vmatprep.subr.bf16.mxu0 %v7877_v48  ;;  %v9093_v55 = vpop.f32.mrb[0].mxu1  ;;  %v7955_v48 = vld [vmem:[#allocation5 + $0xc44] ss:$16 sps:$4 sm:$0xff]  }
 0x194   :  { %v9095_v56 = vpop.f32.mrb[1].mxu1 }
 0x195   :  { %v4831_v57 = vpop.f32.mrb[2].mxu1  ;;  %5419 = vmatpush1.bf16.msra.mxu1 %v7878_v51  ;;  %v7956_v51 = vld [vmem:[#allocation5 + $0x848] ss:$16 sps:$4 sm:$0xff]  }
 0x196   :  { %5009 = vmatpush1.bf16.msra.mxu0 %v7875_v50  ;;  %v4832_v60 = vpop.f32.mrb[3].mxu1  ;;  %5420 = vmatprep.subr.bf16.mxu1 %v7886_v54  ;;  %v7953_v50 = vld [vmem:[#allocation5 + $0xc40] ss:$16 sps:$4 sm:$0xff]   ;;  %v7962_v57 = vld [vmem:[#allocation5 + $0x868] ss:$16 sps:$4 sm:$0xff]  }
 0x197   :  { %5010 = vmatprep.subr.bf16.mxu0 %v7883_v53  ;;  %v7961_v53 = vld [vmem:[#allocation5 + $0xc64] ss:$16 sps:$4 sm:$0xff]   ;;  %v7959_v54 = vld [vmem:[#allocation5 + $0xc60] ss:$16 sps:$4 sm:$0xff]  }
 0x198   :  { %v7965_v60 = vld [vmem:[#allocation5 + $0xc80] ss:$16 sps:$4 sm:$0xff]  }
 0x199   :  { %5421 = vmatpush1.bf16.msra.mxu1 %v7884_v59  ;;  %v7970_v59 = vld [vmem:[#allocation5 + $0x88c] ss:$16 sps:$4 sm:$0xff]  }
 0x19a   :  { %5011 = vmatpush1.bf16.msra.mxu0 %v7881_v58  ;;  %5422 = vmatprep.subr.bf16.mxu1 %v7892_v62  ;;  %v7967_v58 = vld [vmem:[#allocation5 + $0xc84] ss:$16 sps:$4 sm:$0xff]   ;;  %v7976_v62 = vld [vmem:[#allocation5 + $0x8ac] ss:$16 sps:$4 sm:$0xff]  }
 0x19b   :  { %5012 = vmatprep.subr.bf16.mxu0 %v7889_v61  ;;  %v7973_v61 = vld [vmem:[#allocation5 + $0xca4] ss:$16 sps:$4 sm:$0xff]  }
 0x19d   :  { %5423 = vmatpush1.bf16.msra.mxu1 %v7890_v0  ;;  %v7974_v0 = vld [vmem:[#allocation5 + $0x8a8] ss:$16 sps:$4 sm:$0xff]  }
 0x19e   :  { %5013 = vmatpush1.bf16.msra.mxu0 %v7887_v63  ;;  %5424 = vmatprep.subr.bf16.mxu1 %v7898_v2  ;;  %v7971_v63 = vld [vmem:[#allocation5 + $0xca0] ss:$16 sps:$4 sm:$0xff]   ;;  %v7982_v2 = vld [vmem:[#allocation5 + $0x8cc] ss:$16 sps:$4 sm:$0xff]  }
 0x19f   :  { %5014 = vmatprep.subr.bf16.mxu0 %v7895_v1  ;;  %v7979_v1 = vld [vmem:[#allocation5 + $0xcc4] ss:$16 sps:$4 sm:$0xff]  }
 0x1a1   :  { %5425 = vmatpush1.bf16.msra.mxu1 %v7896_v4  ;;  %v7980_v4 = vld [vmem:[#allocation5 + $0x8c8] ss:$16 sps:$4 sm:$0xff]  }
 0x1a2   :  { %5015 = vmatpush1.bf16.msra.mxu0 %v7893_v3  ;;  %5426 = vmatprep.subr.bf16.mxu1 %v7904_v6  ;;  %v7977_v3 = vld [vmem:[#allocation5 + $0xcc0] ss:$16 sps:$4 sm:$0xff]   ;;  %v7988_v6 = vld [vmem:[#allocation5 + $0x8ec] ss:$16 sps:$4 sm:$0xff]  }
 0x1a3   :  { %5016 = vmatprep.subr.bf16.mxu0 %v7901_v5  ;;  %v7985_v5 = vld [vmem:[#allocation5 + $0xce4] ss:$16 sps:$4 sm:$0xff]  }
 0x1a5   :  { %5427 = vmatpush1.bf16.msra.mxu1 %v7902_v9  ;;  %v7986_v9 = vld [vmem:[#allocation5 + $0x8e8] ss:$16 sps:$4 sm:$0xff]  }
 0x1a6   :  { %5017 = vmatpush1.bf16.msra.mxu0 %v7899_v7  ;;  %5428 = vmatprep.subr.bf16.mxu1 %v7910_v12  ;;  %v7983_v7 = vld [vmem:[#allocation5 + $0xce0] ss:$16 sps:$4 sm:$0xff]   ;;  %v7994_v12 = vld [vmem:[#allocation5 + $0x90c] ss:$16 sps:$4 sm:$0xff]  }
 0x1a7   :  { %5018 = vmatprep.subr.bf16.mxu0 %v7907_v10  ;;  %v7991_v10 = vld [vmem:[#allocation5 + $0xd04] ss:$16 sps:$4 sm:$0xff]  }
 0x1a9   :  { %5429 = vmatpush1.bf16.msra.mxu1 %v7908_v14  ;;  %v7992_v14 = vld [vmem:[#allocation5 + $0x908] ss:$16 sps:$4 sm:$0xff]  }
 0x1aa   :  { %5019 = vmatpush1.bf16.msra.mxu0 %v7905_v13  ;;  %5430 = vmatprep.subr.bf16.mxu1 %v7916_v17  ;;  %v7989_v13 = vld [vmem:[#allocation5 + $0xd00] ss:$16 sps:$4 sm:$0xff]   ;;  %v8000_v17 = vld [vmem:[#allocation5 + $0x92c] ss:$16 sps:$4 sm:$0xff]  }
 0x1ab   :  { %5020 = vmatprep.subr.bf16.mxu0 %v7913_v15  ;;  %v7997_v15 = vld [vmem:[#allocation5 + $0xd24] ss:$16 sps:$4 sm:$0xff]  }
 0x1ad   :  { %5431 = vmatpush1.bf16.msra.mxu1 %v7914_v19  ;;  %v7998_v19 = vld [vmem:[#allocation5 + $0x928] ss:$16 sps:$4 sm:$0xff]  }
 0x1ae   :  { %5021 = vmatpush1.bf16.msra.mxu0 %v7911_v18  ;;  %5432 = vmatprep.subr.bf16.mxu1 %v7922_v21  ;;  %v7995_v18 = vld [vmem:[#allocation5 + $0xd20] ss:$16 sps:$4 sm:$0xff]   ;;  %v8006_v21 = vld [vmem:[#allocation5 + $0x94c] ss:$16 sps:$4 sm:$0xff]  }
 0x1af   :  { %5022 = vmatprep.subr.bf16.mxu0 %v7919_v20  ;;  %v8003_v20 = vld [vmem:[#allocation5 + $0xd44] ss:$16 sps:$4 sm:$0xff]  }
 0x1b1   :  { %5433 = vmatpush1.bf16.msra.mxu1 %v7920_v24  ;;  %v8004_v24 = vld [vmem:[#allocation5 + $0x948] ss:$16 sps:$4 sm:$0xff]  }
 0x1b2   :  { %5023 = vmatpush1.bf16.msra.mxu0 %v7917_v22  ;;  %5434 = vmatprep.subr.bf16.mxu1 %v7928_v27  ;;  %v8001_v22 = vld [vmem:[#allocation5 + $0xd40] ss:$16 sps:$4 sm:$0xff]   ;;  %v8012_v27 = vld [vmem:[#allocation5 + $0x96c] ss:$16 sps:$4 sm:$0xff]  }
 0x1b3   :  { %5024 = vmatprep.subr.bf16.mxu0 %v7925_v26  ;;  %v8009_v26 = vld [vmem:[#allocation5 + $0xd64] ss:$16 sps:$4 sm:$0xff]  }
 0x1b5   :  { %5435 = vmatpush1.bf16.msra.mxu1 %v7926_v29  ;;  %v8010_v29 = vld [vmem:[#allocation5 + $0x968] ss:$16 sps:$4 sm:$0xff]  }
 0x1b6   :  { %5025 = vmatpush1.bf16.msra.mxu0 %v7923_v28  ;;  %5436 = vmatprep.subr.bf16.mxu1 %v7934_v31  ;;  %v8007_v28 = vld [vmem:[#allocation5 + $0xd60] ss:$16 sps:$4 sm:$0xff]   ;;  %v8018_v31 = vld [vmem:[#allocation5 + $0x98c] ss:$16 sps:$4 sm:$0xff]  }
 0x1b7   :  { %5026 = vmatprep.subr.bf16.mxu0 %v7931_v30  ;;  %v8015_v30 = vld [vmem:[#allocation5 + $0xd84] ss:$16 sps:$4 sm:$0xff]  }
 0x1b9   :  { %5437 = vmatpush1.bf16.msra.mxu1 %v7932_v34  ;;  %v8016_v34 = vld [vmem:[#allocation5 + $0x988] ss:$16 sps:$4 sm:$0xff]  }
 0x1ba   :  { %5027 = vmatpush1.bf16.msra.mxu0 %v7929_v33  ;;  %5438 = vmatprep.subr.bf16.mxu1 %v7940_v52  ;;  %v8013_v33 = vld [vmem:[#allocation5 + $0xd80] ss:$16 sps:$4 sm:$0xff]   ;;  %v8024_v52 = vld [vmem:[#allocation5 + $0x9ac] ss:$16 sps:$4 sm:$0xff]  }
 0x1bb   :  { %5028 = vmatprep.subr.bf16.mxu0 %v7937_v35  ;;  %v8021_v35 = vld [vmem:[#allocation5 + $0xda4] ss:$16 sps:$4 sm:$0xff]  }
 0x1bd   :  { %5439 = vmatpush1.bf16.msra.mxu1 %v7938_v38  ;;  %v8022_v38 = vld [vmem:[#allocation5 + $0x9a8] ss:$16 sps:$4 sm:$0xff]  }
 0x1be   :  { %5029 = vmatpush1.bf16.msra.mxu0 %v7935_v37  ;;  %5449 = vmatprep.subr.bf16.mxu1 %v7946_v41  ;;  %v8019_v37 = vld [vmem:[#allocation5 + $0xda0] ss:$16 sps:$4 sm:$0xff]  }
 0x1bf   :  { %5039 = vmatprep.subr.bf16.mxu0 %v7943_v39  ;;  %v8027_v39 = vld [vmem:[#allocation5 + $0xdc4] ss:$16 sps:$4 sm:$0xff]   ;;  %v8025_v41 = vld [vmem:[#allocation5 + $0xdc0] ss:$16 sps:$4 sm:$0xff]  }
 0x1c0   :  { %5441 = vmatmul.mubr.bf16.vlgmr.msra.gmra.mrb[4].mxu1 %v9077_v25  ;;  %v7964_v25 = vld [vmem:[#allocation5 + $0x86c] ss:$16 sps:$4 sm:$0xff]  }
 0x1c1   :  { %5031 = vmatmul.mubr.bf16.vlgmr.msra.gmra.mrb[0].mxu0 %v9097_v42  ;;  %5450 = vmatpush1.bf16.msra.mxu1 %v7944_v43  ;;  %v8036_v43 = vld [vmem:[#allocation5 + $0x9ec] ss:$16 sps:$4 sm:$0xff]  }
 0x1c2   :  { %5040 = vmatpush1.bf16.msra.mxu0 %v7941_v16  ;;  %5451 = vmatprep.subr.bf16.mxu1 %v7952_v45  ;;  %v8033_v16 = vld [vmem:[#allocation5 + $0xde4] ss:$16 sps:$4 sm:$0xff]   ;;  %v8034_v45 = vld [vmem:[#allocation5 + $0x9e8] ss:$16 sps:$4 sm:$0xff]  }
 0x1c3   :  { %5041 = vmatprep.subr.bf16.mxu0 %v7949_v44  ;;  %5071 = vmatprep.mubr.bf16.mxu0 %v9099_v46  ;;  %v8031_v44 = vld [vmem:[#allocation5 + $0xde0] ss:$16 sps:$4 sm:$0xff]  }
 0x1c4   :  { %5481 = vmatprep.mubr.bf16.mxu1 %v9079_v8  ;;  %v7968_v8 = vld [vmem:[#allocation5 + $0x888] ss:$16 sps:$4 sm:$0xff]  }
 0x1c5   :  { %5452 = vmatpush1.bf16.msra.mxu1 %v7950_v23  ;;  %v127_v23 = vld [vmem:[#allocation2 + $0x60] sm:$0xff] }
 0x1c6   :  { %5042 = vmatpush1.bf16.msra.mxu0 %v7947_v47  ;;  %5453 = vmatprep.subr.bf16.mxu1 %v7958_v49  ;;  %v8039_v47 = vld [vmem:[#allocation5 + $0xe04] ss:$16 sps:$4 sm:$0xff]   ;;  %v130_v49 = vld [vmem:[#allocation2 + $0x78] sm:$0xff] }
 0x1c7   :  { %5043 = vmatprep.subr.bf16.mxu0 %v7955_v48  ;;  %v8042_v48 = vld [vmem:[#allocation5 + $0xa0c] ss:$16 sps:$4 sm:$0xff]  }
 0x1c9   :  { %5454 = vmatpush1.bf16.msra.mxu1 %v7956_v51  ;;  %v8037_v51 = vld [vmem:[#allocation5 + $0xe00] ss:$16 sps:$4 sm:$0xff]  }
 0x1ca   :  { %5044 = vmatpush1.bf16.msra.mxu0 %v7953_v50  ;;  %5455 = vmatprep.subr.bf16.mxu1 %v7964_v25  ;;  %v9105_v50 = vpack.c.bf16 %v127_v23, %v127_v23  ;;  %v8045_v25 = vld [vmem:[#allocation5 + $0xe24] ss:$16 sps:$4 sm:$0xff]   ;;  %v8126_v23 = vld [vmem:[#allocation5 + $0xbcc] ss:$16 sps:$4 sm:$0xff]  }
 0x1cb   :  { %5045 = vmatprep.subr.bf16.mxu0 %v7961_v53  ;;  %v8040_v53 = vld [vmem:[#allocation5 + $0xa08] ss:$16 sps:$4 sm:$0xff]  }
 0x1cd   :  { %5456 = vmatpush1.bf16.msra.mxu1 %v7962_v57  ;;  %v9107_v57 = vpack.c.bf16 %v130_v49, %v130_v49  ;;  %v8124_v49 = vld [vmem:[#allocation5 + $0xbc8] ss:$16 sps:$4 sm:$0xff]  }
 0x1ce   :  { %5046 = vmatpush1.bf16.msra.mxu0 %v7959_v54  ;;  %5457 = vmatprep.subr.bf16.mxu1 %v7970_v59  ;;  %v8048_v54 = vld [vmem:[#allocation5 + $0xa2c] ss:$16 sps:$4 sm:$0xff]   ;;  %v8046_v59 = vld [vmem:[#allocation5 + $0xa28] ss:$16 sps:$4 sm:$0xff]  }
 0x1cf   :  { %5047 = vmatprep.subr.bf16.mxu0 %v7967_v58  ;;  %v8043_v58 = vld [vmem:[#allocation5 + $0xe20] ss:$16 sps:$4 sm:$0xff]  }
 0x1d1   :  { %5458 = vmatpush1.bf16.msra.mxu1 %v7968_v8  ;;  %v8054_v8 = vld [vmem:[#allocation5 + $0xa4c] ss:$16 sps:$4 sm:$0xff]  }
 0x1d2   :  { %5048 = vmatpush1.bf16.msra.mxu0 %v7965_v60  ;;  %5459 = vmatprep.subr.bf16.mxu1 %v7976_v62  ;;  %v8051_v60 = vld [vmem:[#allocation5 + $0xe44] ss:$16 sps:$4 sm:$0xff]   ;;  %v8052_v62 = vld [vmem:[#allocation5 + $0xa48] ss:$16 sps:$4 sm:$0xff]  }
 0x1d3   :  { %5049 = vmatprep.subr.bf16.mxu0 %v7973_v61  ;;  %v8049_v61 = vld [vmem:[#allocation5 + $0xe40] ss:$16 sps:$4 sm:$0xff]  }
 0x1d5   :  { %5460 = vmatpush1.bf16.msra.mxu1 %v7974_v0  ;;  %v8055_v0 = vld [vmem:[#allocation5 + $0xe60] ss:$16 sps:$4 sm:$0xff]  }
 0x1d6   :  { %5050 = vmatpush1.bf16.msra.mxu0 %v7971_v63  ;;  %5461 = vmatprep.subr.bf16.mxu1 %v7982_v2  ;;  %v8057_v63 = vld [vmem:[#allocation5 + $0xe64] ss:$16 sps:$4 sm:$0xff]  }
 0x1d7   :  { %5051 = vmatprep.subr.bf16.mxu0 %v7979_v1  ;;  %v8058_v1 = vld [vmem:[#allocation5 + $0xa68] ss:$16 sps:$4 sm:$0xff]   ;;  %v8063_v2 = vld [vmem:[#allocation5 + $0xe84] ss:$16 sps:$4 sm:$0xff]  }
 0x1d9   :  { %5462 = vmatpush1.bf16.msra.mxu1 %v7980_v4  ;;  %v8061_v4 = vld [vmem:[#allocation5 + $0xe80] ss:$16 sps:$4 sm:$0xff]  }
 0x1da   :  { %5052 = vmatpush1.bf16.msra.mxu0 %v7977_v3  ;;  %5463 = vmatprep.subr.bf16.mxu1 %v7988_v6  ;;  %v8066_v3 = vld [vmem:[#allocation5 + $0xa8c] ss:$16 sps:$4 sm:$0xff]  }
 0x1db   :  { %5053 = vmatprep.subr.bf16.mxu0 %v7985_v5  ;;  %v8069_v5 = vld [vmem:[#allocation5 + $0xea4] ss:$16 sps:$4 sm:$0xff]   ;;  %v8072_v6 = vld [vmem:[#allocation5 + $0xaac] ss:$16 sps:$4 sm:$0xff]  }
 0x1dd   :  { %5464 = vmatpush1.bf16.msra.mxu1 %v7986_v9  ;;  %v8070_v9 = vld [vmem:[#allocation5 + $0xaa8] ss:$16 sps:$4 sm:$0xff]  }
 0x1de   :  { %5054 = vmatpush1.bf16.msra.mxu0 %v7983_v7  ;;  %5465 = vmatprep.subr.bf16.mxu1 %v7994_v12  ;;  %v8067_v7 = vld [vmem:[#allocation5 + $0xea0] ss:$16 sps:$4 sm:$0xff]   ;;  %v8078_v12 = vld [vmem:[#allocation5 + $0xacc] ss:$16 sps:$4 sm:$0xff]  }
 0x1df   :  { %5055 = vmatprep.subr.bf16.mxu0 %v7991_v10  ;;  %v8075_v10 = vld [vmem:[#allocation5 + $0xec4] ss:$16 sps:$4 sm:$0xff]  }
 0x1e1   :  { %5466 = vmatpush1.bf16.msra.mxu1 %v7992_v14  ;;  %v8076_v14 = vld [vmem:[#allocation5 + $0xac8] ss:$16 sps:$4 sm:$0xff]  }
 0x1e2   :  { %5056 = vmatpush1.bf16.msra.mxu0 %v7989_v13  ;;  %5467 = vmatprep.subr.bf16.mxu1 %v8000_v17  ;;  %v8073_v13 = vld [vmem:[#allocation5 + $0xec0] ss:$16 sps:$4 sm:$0xff]   ;;  %v8084_v17 = vld [vmem:[#allocation5 + $0xaec] ss:$16 sps:$4 sm:$0xff]  }
 0x1e3   :  { %5057 = vmatprep.subr.bf16.mxu0 %v7997_v15  ;;  %v8081_v15 = vld [vmem:[#allocation5 + $0xee4] ss:$16 sps:$4 sm:$0xff]  }
 0x1e5   :  { %5468 = vmatpush1.bf16.msra.mxu1 %v7998_v19  ;;  %v8082_v19 = vld [vmem:[#allocation5 + $0xae8] ss:$16 sps:$4 sm:$0xff]  }
 0x1e6   :  { %5058 = vmatpush1.bf16.msra.mxu0 %v7995_v18  ;;  %5469 = vmatprep.subr.bf16.mxu1 %v8006_v21  ;;  %v8079_v18 = vld [vmem:[#allocation5 + $0xee0] ss:$16 sps:$4 sm:$0xff]   ;;  %v8090_v21 = vld [vmem:[#allocation5 + $0xb0c] ss:$16 sps:$4 sm:$0xff]  }
 0x1e7   :  { %5059 = vmatprep.subr.bf16.mxu0 %v8003_v20  ;;  %v8087_v20 = vld [vmem:[#allocation5 + $0xf04] ss:$16 sps:$4 sm:$0xff]  }
 0x1e9   :  { %5470 = vmatpush1.bf16.msra.mxu1 %v8004_v24  ;;  %v8088_v24 = vld [vmem:[#allocation5 + $0xb08] ss:$16 sps:$4 sm:$0xff]  }
 0x1ea   :  { %5060 = vmatpush1.bf16.msra.mxu0 %v8001_v22  ;;  %5471 = vmatprep.subr.bf16.mxu1 %v8012_v27  ;;  %v8085_v22 = vld [vmem:[#allocation5 + $0xf00] ss:$16 sps:$4 sm:$0xff]   ;;  %v8096_v27 = vld [vmem:[#allocation5 + $0xb2c] ss:$16 sps:$4 sm:$0xff]  }
 0x1eb   :  { %5061 = vmatprep.subr.bf16.mxu0 %v8009_v26  ;;  %v8093_v26 = vld [vmem:[#allocation5 + $0xf24] ss:$16 sps:$4 sm:$0xff]  }
 0x1ed   :  { %5472 = vmatpush1.bf16.msra.mxu1 %v8010_v29  ;;  %v8094_v29 = vld [vmem:[#allocation5 + $0xb28] ss:$16 sps:$4 sm:$0xff]  }
 0x1ee   :  { %5062 = vmatpush1.bf16.msra.mxu0 %v8007_v28  ;;  %5473 = vmatprep.subr.bf16.mxu1 %v8018_v31  ;;  %v8091_v28 = vld [vmem:[#allocation5 + $0xf20] ss:$16 sps:$4 sm:$0xff]   ;;  %v8102_v31 = vld [vmem:[#allocation5 + $0xb4c] ss:$16 sps:$4 sm:$0xff]  }
 0x1ef   :  { %5063 = vmatprep.subr.bf16.mxu0 %v8015_v30  ;;  %v8099_v30 = vld [vmem:[#allocation5 + $0xf44] ss:$16 sps:$4 sm:$0xff]  }
 0x1f1   :  { %5474 = vmatpush1.bf16.msra.mxu1 %v8016_v34  ;;  %v8100_v34 = vld [vmem:[#allocation5 + $0xb48] ss:$16 sps:$4 sm:$0xff]  }
 0x1f2   :  { %5064 = vmatpush1.bf16.msra.mxu0 %v8013_v33  ;;  %5475 = vmatprep.subr.bf16.mxu1 %v8024_v52  ;;  %v8097_v33 = vld [vmem:[#allocation5 + $0xf40] ss:$16 sps:$4 sm:$0xff]   ;;  %v8108_v52 = vld [vmem:[#allocation5 + $0xb6c] ss:$16 sps:$4 sm:$0xff]  }
 0x1f3   :  { %5065 = vmatprep.subr.bf16.mxu0 %v8021_v35  ;;  %v8105_v35 = vld [vmem:[#allocation5 + $0xf64] ss:$16 sps:$4 sm:$0xff]  }
 0x1f5   :  { %5476 = vmatpush1.bf16.msra.mxu1 %v8022_v38  ;;  %v8106_v38 = vld [vmem:[#allocation5 + $0xb68] ss:$16 sps:$4 sm:$0xff]  }
 0x1f6   :  { %5066 = vmatpush1.bf16.msra.mxu0 %v8019_v37  ;;  %5477 = vmatprep.subr.bf16.mxu1 %v8030_v40  ;;  %v8103_v37 = vld [vmem:[#allocation5 + $0xf60] ss:$16 sps:$4 sm:$0xff]   ;;  %v8114_v40 = vld [vmem:[#allocation5 + $0xb8c] ss:$16 sps:$4 sm:$0xff]  }
 0x1f7   :  { %5067 = vmatprep.subr.bf16.mxu0 %v8027_v39  ;;  %v8111_v39 = vld [vmem:[#allocation5 + $0xf84] ss:$16 sps:$4 sm:$0xff]  }
 0x1f9   :  { %5478 = vmatpush1.bf16.msra.mxu1 %v8028_v36  ;;  %v8112_v36 = vld [vmem:[#allocation5 + $0xb88] ss:$16 sps:$4 sm:$0xff]  }
 0x1fa   :  { %5068 = vmatpush1.bf16.msra.mxu0 %v8025_v41  ;;  %5479 = vmatprep.subr.bf16.mxu1 %v8036_v43  ;;  %v8109_v41 = vld [vmem:[#allocation5 + $0xf80] ss:$16 sps:$4 sm:$0xff]   ;;  %v8120_v43 = vld [vmem:[#allocation5 + $0xbac] ss:$16 sps:$4 sm:$0xff]  }
 0x1fb   :  { %5069 = vmatprep.subr.bf16.mxu0 %v8033_v16  ;;  %v8117_v16 = vld [vmem:[#allocation5 + $0xfa4] ss:$16 sps:$4 sm:$0xff]  }
 0x1fd   :  { %5480 = vmatpush1.bf16.msra.mxu1 %v8034_v45  ;;  %v8118_v45 = vld [vmem:[#allocation5 + $0xba8] ss:$16 sps:$4 sm:$0xff]  }
 0x1fe   :  { %5070 = vmatpush1.bf16.msra.mxu0 %v8031_v44  ;;  %5490 = vmatprep.subr.bf16.mxu1 %v8042_v48  ;;  %v8115_v44 = vld [vmem:[#allocation5 + $0xfa0] ss:$16 sps:$4 sm:$0xff]  }
 0x1ff   :  { %5080 = vmatprep.subr.bf16.mxu0 %v8039_v47  ;;  %v8123_v47 = vld [vmem:[#allocation5 + $0xfc4] ss:$16 sps:$4 sm:$0xff]   ;;  %v8121_v48 = vld [vmem:[#allocation5 + $0xfc0] ss:$16 sps:$4 sm:$0xff]  }
 0x200   :  { %5482 = vmatmul.mubr.bf16.vlgmr.msra.gmra.mrb[4].mxu1 %v9085_v32  ;;  %v8060_v32 = vld [vmem:[#allocation5 + $0xa6c] ss:$16 sps:$4 sm:$0xff]  }
 0x201   :  { %5072 = vmatmul.mubr.bf16.vlgmr.msra.gmra.mrb[0].mxu0 %v9105_v50  ;;  %5491 = vmatpush1.bf16.msra.mxu1 %v8040_v53  ;;  %v8132_v53 = vld [vmem:[#allocation5 + $0xbec] ss:$16 sps:$4 sm:$0xff]  }
 0x202   :  { %5081 = vmatpush1.bf16.msra.mxu0 %v8037_v51  ;;  %5492 = vmatprep.subr.bf16.mxu1 %v8048_v54  ;;  %v8129_v51 = vld [vmem:[#allocation5 + $0xfe4] ss:$16 sps:$4 sm:$0xff]   ;;  %v8130_v54 = vld [vmem:[#allocation5 + $0xbe8] ss:$16 sps:$4 sm:$0xff]  }
 0x203   :  { %5082 = vmatprep.subr.bf16.mxu0 %v8045_v25  ;;  %5112 = vmatprep.mubr.bf16.mxu0 %v9107_v57  ;;  %v8127_v25 = vld [vmem:[#allocation5 + $0xfe0] ss:$16 sps:$4 sm:$0xff]  }
 0x204   :  { %5522 = vmatprep.mubr.bf16.mxu1 %v9087_v11  ;;  %v8064_v11 = vld [vmem:[#allocation5 + $0xa88] ss:$16 sps:$4 sm:$0xff]  }
 0x205   :  { %5493 = vmatpush1.bf16.msra.mxu1 %v8046_v59  ;;  %v129_v59 = vld [vmem:[#allocation2 + $0x70] sm:$0xff] }
 0x206   :  { %5083 = vmatpush1.bf16.msra.mxu0 %v8043_v58  ;;  %5494 = vmatprep.subr.bf16.mxu1 %v8054_v8  ;;  %v8135_v58 = vld [vmem:[#allocation5 + $0x1004] ss:$16 sps:$4 sm:$0xff]   ;;  %v132_v8 = vld [vmem:[#allocation2 + $0x88] sm:$0xff] }
 0x207   :  { %5084 = vmatprep.subr.bf16.mxu0 %v8051_v60  ;;  %v8138_v60 = vld [vmem:[#allocation5 + $0xc0c] ss:$16 sps:$4 sm:$0xff]  }
 0x209   :  { %5495 = vmatpush1.bf16.msra.mxu1 %v8052_v62  ;;  %v8133_v62 = vld [vmem:[#allocation5 + $0x1000] ss:$16 sps:$4 sm:$0xff]  }
 0x20a   :  { %5085 = vmatpush1.bf16.msra.mxu0 %v8049_v61  ;;  %5496 = vmatprep.subr.bf16.mxu1 %v8060_v32  ;;  %v9113_v61 = vpack.c.bf16 %v129_v59, %v129_v59  ;;  %v8141_v32 = vld [vmem:[#allocation5 + $0x1024] ss:$16 sps:$4 sm:$0xff]   ;;  %v8222_v59 = vld [vmem:[#allocation5 + $0xdcc] ss:$16 sps:$4 sm:$0xff]  }
 0x20b   :  { %5086 = vmatprep.subr.bf16.mxu0 %v8057_v63  ;;  %v8136_v63 = vld [vmem:[#allocation5 + $0xc08] ss:$16 sps:$4 sm:$0xff]  }
 0x20d   :  { %5497 = vmatpush1.bf16.msra.mxu1 %v8058_v1  ;;  %v9115_v1 = vpack.c.bf16 %v132_v8, %v132_v8  ;;  %v8220_v8 = vld [vmem:[#allocation5 + $0xdc8] ss:$16 sps:$4 sm:$0xff]  }
 0x20e   :  { %5087 = vmatpush1.bf16.msra.mxu0 %v8055_v0  ;;  %5498 = vmatprep.subr.bf16.mxu1 %v8066_v3  ;;  %v8144_v0 = vld [vmem:[#allocation5 + $0xc2c] ss:$16 sps:$4 sm:$0xff]   ;;  %v8142_v3 = vld [vmem:[#allocation5 + $0xc28] ss:$16 sps:$4 sm:$0xff]  }
 0x20f   :  { %5088 = vmatprep.subr.bf16.mxu0 %v8063_v2  ;;  %v8139_v2 = vld [vmem:[#allocation5 + $0x1020] ss:$16 sps:$4 sm:$0xff]  }
 0x211   :  { %5499 = vmatpush1.bf16.msra.mxu1 %v8064_v11  ;;  %v8150_v11 = vld [vmem:[#allocation5 + $0xc4c] ss:$16 sps:$4 sm:$0xff]  }
 0x212   :  { %5089 = vmatpush1.bf16.msra.mxu0 %v8061_v4  ;;  %5500 = vmatprep.subr.bf16.mxu1 %v8072_v6  ;;  %v8147_v4 = vld [vmem:[#allocation5 + $0x1044] ss:$16 sps:$4 sm:$0xff]   ;;  %v8148_v6 = vld [vmem:[#allocation5 + $0xc48] ss:$16 sps:$4 sm:$0xff]  }
 0x213   :  { %5090 = vmatprep.subr.bf16.mxu0 %v8069_v5  ;;  %v8145_v5 = vld [vmem:[#allocation5 + $0x1040] ss:$16 sps:$4 sm:$0xff]  }
 0x215   :  { %5501 = vmatpush1.bf16.msra.mxu1 %v8070_v9  ;;  %v8151_v9 = vld [vmem:[#allocation5 + $0x1060] ss:$16 sps:$4 sm:$0xff]  }
 0x216   :  { %5091 = vmatpush1.bf16.msra.mxu0 %v8067_v7  ;;  %5502 = vmatprep.subr.bf16.mxu1 %v8078_v12  ;;  %v8153_v7 = vld [vmem:[#allocation5 + $0x1064] ss:$16 sps:$4 sm:$0xff]  }
 0x217   :  { %5092 = vmatprep.subr.bf16.mxu0 %v8075_v10  ;;  %v8154_v10 = vld [vmem:[#allocation5 + $0xc68] ss:$16 sps:$4 sm:$0xff]   ;;  %v8159_v12 = vld [vmem:[#allocation5 + $0x1084] ss:$16 sps:$4 sm:$0xff]  }
 0x219   :  { %5503 = vmatpush1.bf16.msra.mxu1 %v8076_v14  ;;  %v8157_v14 = vld [vmem:[#allocation5 + $0x1080] ss:$16 sps:$4 sm:$0xff]  }
 0x21a   :  { %5093 = vmatpush1.bf16.msra.mxu0 %v8073_v13  ;;  %5504 = vmatprep.subr.bf16.mxu1 %v8084_v17  ;;  %v8162_v13 = vld [vmem:[#allocation5 + $0xc8c] ss:$16 sps:$4 sm:$0xff]  }
 0x21b   :  { %5094 = vmatprep.subr.bf16.mxu0 %v8081_v15  ;;  %v8165_v15 = vld [vmem:[#allocation5 + $0x10a4] ss:$16 sps:$4 sm:$0xff]   ;;  %v8168_v17 = vld [vmem:[#allocation5 + $0xcac] ss:$16 sps:$4 sm:$0xff]  }
 0x21d   :  { %5505 = vmatpush1.bf16.msra.mxu1 %v8082_v19  ;;  %v8166_v19 = vld [vmem:[#allocation5 + $0xca8] ss:$16 sps:$4 sm:$0xff]  }
 0x21e   :  { %5095 = vmatpush1.bf16.msra.mxu0 %v8079_v18  ;;  %5506 = vmatprep.subr.bf16.mxu1 %v8090_v21  ;;  %v8163_v18 = vld [vmem:[#allocation5 + $0x10a0] ss:$16 sps:$4 sm:$0xff]   ;;  %v8174_v21 = vld [vmem:[#allocation5 + $0xccc] ss:$16 sps:$4 sm:$0xff]  }
 0x21f   :  { %5096 = vmatprep.subr.bf16.mxu0 %v8087_v20  ;;  %v8171_v20 = vld [vmem:[#allocation5 + $0x10c4] ss:$16 sps:$4 sm:$0xff]  }
 0x221   :  { %5507 = vmatpush1.bf16.msra.mxu1 %v8088_v24  ;;  %v8172_v24 = vld [vmem:[#allocation5 + $0xcc8] ss:$16 sps:$4 sm:$0xff]  }
 0x222   :  { %5097 = vmatpush1.bf16.msra.mxu0 %v8085_v22  ;;  %5508 = vmatprep.subr.bf16.mxu1 %v8096_v27  ;;  %v8169_v22 = vld [vmem:[#allocation5 + $0x10c0] ss:$16 sps:$4 sm:$0xff]   ;;  %v8180_v27 = vld [vmem:[#allocation5 + $0xcec] ss:$16 sps:$4 sm:$0xff]  }
 0x223   :  { %5098 = vmatprep.subr.bf16.mxu0 %v8093_v26  ;;  %v8177_v26 = vld [vmem:[#allocation5 + $0x10e4] ss:$16 sps:$4 sm:$0xff]  }
 0x225   :  { %5509 = vmatpush1.bf16.msra.mxu1 %v8094_v29  ;;  %v8178_v29 = vld [vmem:[#allocation5 + $0xce8] ss:$16 sps:$4 sm:$0xff]  }
 0x226   :  { %5099 = vmatpush1.bf16.msra.mxu0 %v8091_v28  ;;  %5510 = vmatprep.subr.bf16.mxu1 %v8102_v31  ;;  %v8175_v28 = vld [vmem:[#allocation5 + $0x10e0] ss:$16 sps:$4 sm:$0xff]   ;;  %v8186_v31 = vld [vmem:[#allocation5 + $0xd0c] ss:$16 sps:$4 sm:$0xff]  }
 0x227   :  { %5100 = vmatprep.subr.bf16.mxu0 %v8099_v30  ;;  %v8183_v30 = vld [vmem:[#allocation5 + $0x1104] ss:$16 sps:$4 sm:$0xff]  }
 0x229   :  { %5511 = vmatpush1.bf16.msra.mxu1 %v8100_v34  ;;  %v8184_v34 = vld [vmem:[#allocation5 + $0xd08] ss:$16 sps:$4 sm:$0xff]  }
 0x22a   :  { %5101 = vmatpush1.bf16.msra.mxu0 %v8097_v33  ;;  %5512 = vmatprep.subr.bf16.mxu1 %v8108_v52  ;;  %v8181_v33 = vld [vmem:[#allocation5 + $0x1100] ss:$16 sps:$4 sm:$0xff]   ;;  %v8192_v52 = vld [vmem:[#allocation5 + $0xd2c] ss:$16 sps:$4 sm:$0xff]  }
 0x22b   :  { %5102 = vmatprep.subr.bf16.mxu0 %v8105_v35  ;;  %v8189_v35 = vld [vmem:[#allocation5 + $0x1124] ss:$16 sps:$4 sm:$0xff]  }
 0x22d   :  { %5513 = vmatpush1.bf16.msra.mxu1 %v8106_v38  ;;  %v8190_v38 = vld [vmem:[#allocation5 + $0xd28] ss:$16 sps:$4 sm:$0xff]  }
 0x22e   :  { %5103 = vmatpush1.bf16.msra.mxu0 %v8103_v37  ;;  %5514 = vmatprep.subr.bf16.mxu1 %v8114_v40  ;;  %v8187_v37 = vld [vmem:[#allocation5 + $0x1120] ss:$16 sps:$4 sm:$0xff]   ;;  %v8198_v40 = vld [vmem:[#allocation5 + $0xd4c] ss:$16 sps:$4 sm:$0xff]  }
 0x22f   :  { %5104 = vmatprep.subr.bf16.mxu0 %v8111_v39  ;;  %v8195_v39 = vld [vmem:[#allocation5 + $0x1144] ss:$16 sps:$4 sm:$0xff]  }
 0x231   :  { %5515 = vmatpush1.bf16.msra.mxu1 %v8112_v36  ;;  %v8196_v36 = vld [vmem:[#allocation5 + $0xd48] ss:$16 sps:$4 sm:$0xff]  }
 0x232   :  { %5105 = vmatpush1.bf16.msra.mxu0 %v8109_v41  ;;  %5516 = vmatprep.subr.bf16.mxu1 %v8120_v43  ;;  %v8193_v41 = vld [vmem:[#allocation5 + $0x1140] ss:$16 sps:$4 sm:$0xff]   ;;  %v8204_v43 = vld [vmem:[#allocation5 + $0xd6c] ss:$16 sps:$4 sm:$0xff]  }
 0x233   :  { %5106 = vmatprep.subr.bf16.mxu0 %v8117_v16  ;;  %v8201_v16 = vld [vmem:[#allocation5 + $0x1164] ss:$16 sps:$4 sm:$0xff]  }
 0x235   :  { %5517 = vmatpush1.bf16.msra.mxu1 %v8118_v45  ;;  %v8202_v45 = vld [vmem:[#allocation5 + $0xd68] ss:$16 sps:$4 sm:$0xff]  }
 0x236   :  { %5107 = vmatpush1.bf16.msra.mxu0 %v8115_v44  ;;  %5518 = vmatprep.subr.bf16.mxu1 %v8126_v23  ;;  %v8199_v44 = vld [vmem:[#allocation5 + $0x1160] ss:$16 sps:$4 sm:$0xff]   ;;  %v8210_v23 = vld [vmem:[#allocation5 + $0xd8c] ss:$16 sps:$4 sm:$0xff]  }
 0x237   :  { %5108 = vmatprep.subr.bf16.mxu0 %v8123_v47  ;;  %v8207_v47 = vld [vmem:[#allocation5 + $0x1184] ss:$16 sps:$4 sm:$0xff]  }
 0x239   :  { %5519 = vmatpush1.bf16.msra.mxu1 %v8124_v49  ;;  %v8208_v49 = vld [vmem:[#allocation5 + $0xd88] ss:$16 sps:$4 sm:$0xff]  }
 0x23a   :  { %5109 = vmatpush1.bf16.msra.mxu0 %v8121_v48  ;;  %5520 = vmatprep.subr.bf16.mxu1 %v8132_v53  ;;  %v8205_v48 = vld [vmem:[#allocation5 + $0x1180] ss:$16 sps:$4 sm:$0xff]   ;;  %v8216_v53 = vld [vmem:[#allocation5 + $0xdac] ss:$16 sps:$4 sm:$0xff]  }
 0x23b   :  { %5110 = vmatprep.subr.bf16.mxu0 %v8129_v51  ;;  %v8213_v51 = vld [vmem:[#allocation5 + $0x11a4] ss:$16 sps:$4 sm:$0xff]  }
 0x23d   :  { %5521 = vmatpush1.bf16.msra.mxu1 %v8130_v54  ;;  %v8214_v54 = vld [vmem:[#allocation5 + $0xda8] ss:$16 sps:$4 sm:$0xff]  }
 0x23e   :  { %5111 = vmatpush1.bf16.msra.mxu0 %v8127_v25  ;;  %5531 = vmatprep.subr.bf16.mxu1 %v8138_v60  ;;  %v8211_v25 = vld [vmem:[#allocation5 + $0x11a0] ss:$16 sps:$4 sm:$0xff]  }
 0x23f   :  { %5121 = vmatprep.subr.bf16.mxu0 %v8135_v58  ;;  %v8219_v58 = vld [vmem:[#allocation5 + $0x11c4] ss:$16 sps:$4 sm:$0xff]   ;;  %v8217_v60 = vld [vmem:[#allocation5 + $0x11c0] ss:$16 sps:$4 sm:$0xff]  }
 0x240   :  { %5523 = vmatmul.mubr.bf16.vlgmr.msra.gmra.mrb[4].mxu1 %v9097_v42  ;;  %v8156_v42 = vld [vmem:[#allocation5 + $0xc6c] ss:$16 sps:$4 sm:$0xff]  }
 0x241   :  { %5113 = vmatmul.mubr.bf16.vlgmr.msra.gmra.mrb[0].mxu0 %v9113_v61  ;;  %5532 = vmatpush1.bf16.msra.mxu1 %v8136_v63  ;;  %v8228_v63 = vld [vmem:[#allocation5 + $0xdec] ss:$16 sps:$4 sm:$0xff]  }
 0x242   :  { %5122 = vmatpush1.bf16.msra.mxu0 %v8133_v62  ;;  %5533 = vmatprep.subr.bf16.mxu1 %v8144_v0  ;;  %v8225_v62 = vld [vmem:[#allocation5 + $0x11e4] ss:$16 sps:$4 sm:$0xff]   ;;  %v8226_v0 = vld [vmem:[#allocation5 + $0xde8] ss:$16 sps:$4 sm:$0xff]  }
 0x243   :  { %5123 = vmatprep.subr.bf16.mxu0 %v8141_v32  ;;  %5153 = vmatprep.mubr.bf16.mxu0 %v9115_v1  ;;  %v8223_v32 = vld [vmem:[#allocation5 + $0x11e0] ss:$16 sps:$4 sm:$0xff]  }
 0x244   :  { %5563 = vmatprep.mubr.bf16.mxu1 %v9099_v46  ;;  %v8160_v46 = vld [vmem:[#allocation5 + $0xc88] ss:$16 sps:$4 sm:$0xff]  }
 0x245   :  { %5534 = vmatpush1.bf16.msra.mxu1 %v8142_v3  ;;  %v8231_v3 = vld [vmem:[#allocation5 + $0x1204] ss:$16 sps:$4 sm:$0xff]  }
 0x246   :  { %5124 = vmatpush1.bf16.msra.mxu0 %v8139_v2  ;;  %5535 = vmatprep.subr.bf16.mxu1 %v8150_v11  ;;  %v131_v2 = vld [vmem:[#allocation2 + $0x80] sm:$0xff] }
 0x247   :  { %5125 = vmatprep.subr.bf16.mxu0 %v8147_v4  ;;  %v8234_v4 = vld [vmem:[#allocation5 + $0xe0c] ss:$16 sps:$4 sm:$0xff]   ;;  %v9121_v11 = vpack.c.bf16 %v131_v2, %v131_v2  ;;  %v8315_v2 = vld [vmem:[#allocation5 + $0x13c4] ss:$16 sps:$4 sm:$0xff]  }
 0x249   :  { %5536 = vmatpush1.bf16.msra.mxu1 %v8148_v6  ;;  %v8229_v6 = vld [vmem:[#allocation5 + $0x1200] ss:$16 sps:$4 sm:$0xff]  }
 0x24a   :  { %5126 = vmatpush1.bf16.msra.mxu0 %v8145_v5  ;;  %5537 = vmatprep.subr.bf16.mxu1 %v8156_v42  ;;  %v134_v5 = vld [vmem:[#allocation2 + $0x98] sm:$0xff]  ;;  %v8237_v42 = vld [vmem:[#allocation5 + $0x1224] ss:$16 sps:$4 sm:$0xff]  }
 0x24b   :  { %5127 = vmatprep.subr.bf16.mxu0 %v8153_v7  ;;  %v8232_v7 = vld [vmem:[#allocation5 + $0xe08] ss:$16 sps:$4 sm:$0xff]  }
 0x24d   :  { %5538 = vmatpush1.bf16.msra.mxu1 %v8154_v10  ;;  %v9123_v10 = vpack.c.bf16 %v134_v5, %v134_v5  ;;  %v8316_v5 = vld [vmem:[#allocation5 + $0xfc8] ss:$16 sps:$4 sm:$0xff]  }
 0x24e   :  { %5128 = vmatpush1.bf16.msra.mxu0 %v8151_v9  ;;  %5539 = vmatprep.subr.bf16.mxu1 %v8162_v13  ;;  %v8240_v9 = vld [vmem:[#allocation5 + $0xe2c] ss:$16 sps:$4 sm:$0xff]   ;;  %v8238_v13 = vld [vmem:[#allocation5 + $0xe28] ss:$16 sps:$4 sm:$0xff]  }
 0x24f   :  { %5129 = vmatprep.subr.bf16.mxu0 %v8159_v12  ;;  %v8235_v12 = vld [vmem:[#allocation5 + $0x1220] ss:$16 sps:$4 sm:$0xff]  }
 0x251   :  { %5540 = vmatpush1.bf16.msra.mxu1 %v8160_v46  ;;  %v8246_v46 = vld [vmem:[#allocation5 + $0xe4c] ss:$16 sps:$4 sm:$0xff]  }
 0x252   :  { %5130 = vmatpush1.bf16.msra.mxu0 %v8157_v14  ;;  %5541 = vmatprep.subr.bf16.mxu1 %v8168_v17  ;;  %v8243_v14 = vld [vmem:[#allocation5 + $0x1244] ss:$16 sps:$4 sm:$0xff]   ;;  %v8244_v17 = vld [vmem:[#allocation5 + $0xe48] ss:$16 sps:$4 sm:$0xff]  }
 0x253   :  { %5131 = vmatprep.subr.bf16.mxu0 %v8165_v15  ;;  %v8241_v15 = vld [vmem:[#allocation5 + $0x1240] ss:$16 sps:$4 sm:$0xff]  }
 0x255   :  { %5542 = vmatpush1.bf16.msra.mxu1 %v8166_v19  ;;  %v8247_v19 = vld [vmem:[#allocation5 + $0x1260] ss:$16 sps:$4 sm:$0xff]  }
 0x256   :  { %5132 = vmatpush1.bf16.msra.mxu0 %v8163_v18  ;;  %5543 = vmatprep.subr.bf16.mxu1 %v8174_v21  ;;  %v8249_v18 = vld [vmem:[#allocation5 + $0x1264] ss:$16 sps:$4 sm:$0xff]  }
 0x257   :  { %5133 = vmatprep.subr.bf16.mxu0 %v8171_v20  ;;  %v8250_v20 = vld [vmem:[#allocation5 + $0xe68] ss:$16 sps:$4 sm:$0xff]   ;;  %v8255_v21 = vld [vmem:[#allocation5 + $0x1284] ss:$16 sps:$4 sm:$0xff]  }
 0x259   :  { %5544 = vmatpush1.bf16.msra.mxu1 %v8172_v24  ;;  %v8253_v24 = vld [vmem:[#allocation5 + $0x1280] ss:$16 sps:$4 sm:$0xff]  }
 0x25a   :  { %5134 = vmatpush1.bf16.msra.mxu0 %v8169_v22  ;;  %5545 = vmatprep.subr.bf16.mxu1 %v8180_v27  ;;  %v8258_v22 = vld [vmem:[#allocation5 + $0xe8c] ss:$16 sps:$4 sm:$0xff]  }
 0x25b   :  { %5135 = vmatprep.subr.bf16.mxu0 %v8177_v26  ;;  %v8261_v26 = vld [vmem:[#allocation5 + $0x12a4] ss:$16 sps:$4 sm:$0xff]   ;;  %v8264_v27 = vld [vmem:[#allocation5 + $0xeac] ss:$16 sps:$4 sm:$0xff]  }
 0x25d   :  { %5546 = vmatpush1.bf16.msra.mxu1 %v8178_v29  ;;  %v8262_v29 = vld [vmem:[#allocation5 + $0xea8] ss:$16 sps:$4 sm:$0xff]  }
 0x25e   :  { %5136 = vmatpush1.bf16.msra.mxu0 %v8175_v28  ;;  %5547 = vmatprep.subr.bf16.mxu1 %v8186_v31  ;;  %v8259_v28 = vld [vmem:[#allocation5 + $0x12a0] ss:$16 sps:$4 sm:$0xff]   ;;  %v8270_v31 = vld [vmem:[#allocation5 + $0xecc] ss:$16 sps:$4 sm:$0xff]  }
 0x25f   :  { %5137 = vmatprep.subr.bf16.mxu0 %v8183_v30  ;;  %v8267_v30 = vld [vmem:[#allocation5 + $0x12c4] ss:$16 sps:$4 sm:$0xff]  }
 0x261   :  { %5548 = vmatpush1.bf16.msra.mxu1 %v8184_v34  ;;  %v8268_v34 = vld [vmem:[#allocation5 + $0xec8] ss:$16 sps:$4 sm:$0xff]  }
 0x262   :  { %5138 = vmatpush1.bf16.msra.mxu0 %v8181_v33  ;;  %5549 = vmatprep.subr.bf16.mxu1 %v8192_v52  ;;  %v8265_v33 = vld [vmem:[#allocation5 + $0x12c0] ss:$16 sps:$4 sm:$0xff]   ;;  %v8276_v52 = vld [vmem:[#allocation5 + $0xeec] ss:$16 sps:$4 sm:$0xff]  }
 0x263   :  { %5139 = vmatprep.subr.bf16.mxu0 %v8189_v35  ;;  %v8273_v35 = vld [vmem:[#allocation5 + $0x12e4] ss:$16 sps:$4 sm:$0xff]  }
 0x265   :  { %5550 = vmatpush1.bf16.msra.mxu1 %v8190_v38  ;;  %v8274_v38 = vld [vmem:[#allocation5 + $0xee8] ss:$16 sps:$4 sm:$0xff]  }
 0x266   :  { %5140 = vmatpush1.bf16.msra.mxu0 %v8187_v37  ;;  %5551 = vmatprep.subr.bf16.mxu1 %v8198_v40  ;;  %v8271_v37 = vld [vmem:[#allocation5 + $0x12e0] ss:$16 sps:$4 sm:$0xff]   ;;  %v8282_v40 = vld [vmem:[#allocation5 + $0xf0c] ss:$16 sps:$4 sm:$0xff]  }
 0x267   :  { %5141 = vmatprep.subr.bf16.mxu0 %v8195_v39  ;;  %v8279_v39 = vld [vmem:[#allocation5 + $0x1304] ss:$16 sps:$4 sm:$0xff]  }
 0x269   :  { %5552 = vmatpush1.bf16.msra.mxu1 %v8196_v36  ;;  %v8280_v36 = vld [vmem:[#allocation5 + $0xf08] ss:$16 sps:$4 sm:$0xff]  }
 0x26a   :  { %5142 = vmatpush1.bf16.msra.mxu0 %v8193_v41  ;;  %5553 = vmatprep.subr.bf16.mxu1 %v8204_v43  ;;  %v8277_v41 = vld [vmem:[#allocation5 + $0x1300] ss:$16 sps:$4 sm:$0xff]   ;;  %v8288_v43 = vld [vmem:[#allocation5 + $0xf2c] ss:$16 sps:$4 sm:$0xff]  }
 0x26b   :  { %5143 = vmatprep.subr.bf16.mxu0 %v8201_v16  ;;  %v8285_v16 = vld [vmem:[#allocation5 + $0x1324] ss:$16 sps:$4 sm:$0xff]  }
 0x26d   :  { %5554 = vmatpush1.bf16.msra.mxu1 %v8202_v45  ;;  %v8286_v45 = vld [vmem:[#allocation5 + $0xf28] ss:$16 sps:$4 sm:$0xff]  }
 0x26e   :  { %5144 = vmatpush1.bf16.msra.mxu0 %v8199_v44  ;;  %5555 = vmatprep.subr.bf16.mxu1 %v8210_v23  ;;  %v8283_v44 = vld [vmem:[#allocation5 + $0x1320] ss:$16 sps:$4 sm:$0xff]   ;;  %v8294_v23 = vld [vmem:[#allocation5 + $0xf4c] ss:$16 sps:$4 sm:$0xff]  }
 0x26f   :  { %5145 = vmatprep.subr.bf16.mxu0 %v8207_v47  ;;  %v8291_v47 = vld [vmem:[#allocation5 + $0x1344] ss:$16 sps:$4 sm:$0xff]  }
 0x271   :  { %5556 = vmatpush1.bf16.msra.mxu1 %v8208_v49  ;;  %v8292_v49 = vld [vmem:[#allocation5 + $0xf48] ss:$16 sps:$4 sm:$0xff]  }
 0x272   :  { %5146 = vmatpush1.bf16.msra.mxu0 %v8205_v48  ;;  %5557 = vmatprep.subr.bf16.mxu1 %v8216_v53  ;;  %v8289_v48 = vld [vmem:[#allocation5 + $0x1340] ss:$16 sps:$4 sm:$0xff]   ;;  %v8300_v53 = vld [vmem:[#allocation5 + $0xf6c] ss:$16 sps:$4 sm:$0xff]  }
 0x273   :  { %5147 = vmatprep.subr.bf16.mxu0 %v8213_v51  ;;  %v8297_v51 = vld [vmem:[#allocation5 + $0x1364] ss:$16 sps:$4 sm:$0xff]  }
 0x275   :  { %5558 = vmatpush1.bf16.msra.mxu1 %v8214_v54  ;;  %v8298_v54 = vld [vmem:[#allocation5 + $0xf68] ss:$16 sps:$4 sm:$0xff]  }
 0x276   :  { %5148 = vmatpush1.bf16.msra.mxu0 %v8211_v25  ;;  %5559 = vmatprep.subr.bf16.mxu1 %v8222_v59  ;;  %v8295_v25 = vld [vmem:[#allocation5 + $0x1360] ss:$16 sps:$4 sm:$0xff]   ;;  %v8306_v59 = vld [vmem:[#allocation5 + $0xf8c] ss:$16 sps:$4 sm:$0xff]  }
 0x277   :  { %5149 = vmatprep.subr.bf16.mxu0 %v8219_v58  ;;  %v8303_v58 = vld [vmem:[#allocation5 + $0x1384] ss:$16 sps:$4 sm:$0xff]  }
 0x279   :  { %5560 = vmatpush1.bf16.msra.mxu1 %v8220_v8  ;;  %v8304_v8 = vld [vmem:[#allocation5 + $0xf88] ss:$16 sps:$4 sm:$0xff]  }
 0x27a   :  { %5150 = vmatpush1.bf16.msra.mxu0 %v8217_v60  ;;  %5561 = vmatprep.subr.bf16.mxu1 %v8228_v63  ;;  %v8301_v60 = vld [vmem:[#allocation5 + $0x1380] ss:$16 sps:$4 sm:$0xff]   ;;  %v8312_v63 = vld [vmem:[#allocation5 + $0xfac] ss:$16 sps:$4 sm:$0xff]  }
 0x27b   :  { %5151 = vmatprep.subr.bf16.mxu0 %v8225_v62  ;;  %v8309_v62 = vld [vmem:[#allocation5 + $0x13a4] ss:$16 sps:$4 sm:$0xff]  }
 0x27d   :  { %5562 = vmatpush1.bf16.msra.mxu1 %v8226_v0  ;;  %v8310_v0 = vld [vmem:[#allocation5 + $0xfa8] ss:$16 sps:$4 sm:$0xff]  }
 0x27e   :  { %5152 = vmatpush1.bf16.msra.mxu0 %v8223_v32  ;;  %5572 = vmatprep.subr.bf16.mxu1 %v8234_v4  ;;  %v8307_v32 = vld [vmem:[#allocation5 + $0x13a0] ss:$16 sps:$4 sm:$0xff]  }
 0x27f   :  { %5162 = vmatprep.subr.bf16.mxu0 %v8231_v3  ;;  %v8318_v3 = vld [vmem:[#allocation5 + $0xfcc] ss:$16 sps:$4 sm:$0xff]   ;;  %v8313_v4 = vld [vmem:[#allocation5 + $0x13c0] ss:$16 sps:$4 sm:$0xff]  }
 0x280   :  { %5564 = vmatmul.mubr.bf16.vlgmr.msra.gmra.mrb[4].mxu1 %v9105_v50  ;;  %v8252_v50 = vld [vmem:[#allocation5 + $0xe6c] ss:$16 sps:$4 sm:$0xff]  }
 0x281   :  { %5154 = vmatmul.mubr.bf16.vlgmr.msra.gmra.mrb[0].mxu0 %v9121_v11  ;;  %5573 = vmatpush1.bf16.msra.mxu1 %v8232_v7  ;;  %v8324_v7 = vld [vmem:[#allocation5 + $0xfec] ss:$16 sps:$4 sm:$0xff]  }
 0x282   :  { %5163 = vmatpush1.bf16.msra.mxu0 %v8229_v6  ;;  %5574 = vmatprep.subr.bf16.mxu1 %v8240_v9  ;;  %v8321_v6 = vld [vmem:[#allocation5 + $0x13e4] ss:$16 sps:$4 sm:$0xff]   ;;  %v8322_v9 = vld [vmem:[#allocation5 + $0xfe8] ss:$16 sps:$4 sm:$0xff]  }
 0x283   :  { %5164 = vmatprep.subr.bf16.mxu0 %v8237_v42  ;;  %5194 = vmatprep.mubr.bf16.mxu0 %v9123_v10  ;;  %v8319_v42 = vld [vmem:[#allocation5 + $0x13e0] ss:$16 sps:$4 sm:$0xff]  }
 0x284   :  { %5604 = vmatprep.mubr.bf16.mxu1 %v9107_v57  ;;  %v8256_v57 = vld [vmem:[#allocation5 + $0xe88] ss:$16 sps:$4 sm:$0xff]  }
 0x285   :  { %5575 = vmatpush1.bf16.msra.mxu1 %v8238_v13  ;;  %v8327_v13 = vld [vmem:[#allocation5 + $0x1404] ss:$16 sps:$4 sm:$0xff]  }
 0x286   :  { %5165 = vmatpush1.bf16.msra.mxu0 %v8235_v12  ;;  %5576 = vmatprep.subr.bf16.mxu1 %v8246_v46  ;;  %v133_v12 = vld [vmem:[#allocation2 + $0x90] sm:$0xff] }
 0x287   :  { %5166 = vmatprep.subr.bf16.mxu0 %v8243_v14  ;;  %v8330_v14 = vld [vmem:[#allocation5 + $0x100c] ss:$16 sps:$4 sm:$0xff]   ;;  %v9129_v46 = vpack.c.bf16 %v133_v12, %v133_v12  ;;  %v8411_v12 = vld [vmem:[#allocation5 + $0x15c4] ss:$16 sps:$4 sm:$0xff]  }
 0x289   :  { %5577 = vmatpush1.bf16.msra.mxu1 %v8244_v17  ;;  %v8325_v17 = vld [vmem:[#allocation5 + $0x1400] ss:$16 sps:$4 sm:$0xff]  }
 0x28a   :  { %5167 = vmatpush1.bf16.msra.mxu0 %v8241_v15  ;;  %5578 = vmatprep.subr.bf16.mxu1 %v8252_v50  ;;  %v136_v15 = vld [vmem:[#allocation2 + $0xa8] sm:$0xff]  ;;  %v8333_v50 = vld [vmem:[#allocation5 + $0x1424] ss:$16 sps:$4 sm:$0xff]  }
 0x28b   :  { %5168 = vmatprep.subr.bf16.mxu0 %v8249_v18  ;;  %v8328_v18 = vld [vmem:[#allocation5 + $0x1008] ss:$16 sps:$4 sm:$0xff]  }
 0x28d   :  { %5579 = vmatpush1.bf16.msra.mxu1 %v8250_v20  ;;  %v9131_v20 = vpack.c.bf16 %v136_v15, %v136_v15  ;;  %v8412_v15 = vld [vmem:[#allocation5 + $0x11c8] ss:$16 sps:$4 sm:$0xff]  }
 0x28e   :  { %5169 = vmatpush1.bf16.msra.mxu0 %v8247_v19  ;;  %5580 = vmatprep.subr.bf16.mxu1 %v8258_v22  ;;  %v8336_v19 = vld [vmem:[#allocation5 + $0x102c] ss:$16 sps:$4 sm:$0xff]   ;;  %v8334_v22 = vld [vmem:[#allocation5 + $0x1028] ss:$16 sps:$4 sm:$0xff]  }
 0x28f   :  { %5170 = vmatprep.subr.bf16.mxu0 %v8255_v21  ;;  %v8331_v21 = vld [vmem:[#allocation5 + $0x1420] ss:$16 sps:$4 sm:$0xff]  }
 0x291   :  { %5581 = vmatpush1.bf16.msra.mxu1 %v8256_v57  ;;  %v8342_v57 = vld [vmem:[#allocation5 + $0x104c] ss:$16 sps:$4 sm:$0xff]  }
 0x292   :  { %5171 = vmatpush1.bf16.msra.mxu0 %v8253_v24  ;;  %5582 = vmatprep.subr.bf16.mxu1 %v8264_v27  ;;  %v8339_v24 = vld [vmem:[#allocation5 + $0x1444] ss:$16 sps:$4 sm:$0xff]   ;;  %v8340_v27 = vld [vmem:[#allocation5 + $0x1048] ss:$16 sps:$4 sm:$0xff]  }
 0x293   :  { %5172 = vmatprep.subr.bf16.mxu0 %v8261_v26  ;;  %v8337_v26 = vld [vmem:[#allocation5 + $0x1440] ss:$16 sps:$4 sm:$0xff]  }
 0x295   :  { %5583 = vmatpush1.bf16.msra.mxu1 %v8262_v29  ;;  %v8343_v29 = vld [vmem:[#allocation5 + $0x1460] ss:$16 sps:$4 sm:$0xff]  }
 0x296   :  { %5173 = vmatpush1.bf16.msra.mxu0 %v8259_v28  ;;  %5584 = vmatprep.subr.bf16.mxu1 %v8270_v31  ;;  %v8345_v28 = vld [vmem:[#allocation5 + $0x1464] ss:$16 sps:$4 sm:$0xff]  }
 0x297   :  { %5174 = vmatprep.subr.bf16.mxu0 %v8267_v30  ;;  %v8346_v30 = vld [vmem:[#allocation5 + $0x1068] ss:$16 sps:$4 sm:$0xff]   ;;  %v8351_v31 = vld [vmem:[#allocation5 + $0x1484] ss:$16 sps:$4 sm:$0xff]  }
 0x299   :  { %5585 = vmatpush1.bf16.msra.mxu1 %v8268_v34  ;;  %v8349_v34 = vld [vmem:[#allocation5 + $0x1480] ss:$16 sps:$4 sm:$0xff]  }
 0x29a   :  { %5175 = vmatpush1.bf16.msra.mxu0 %v8265_v33  ;;  %5586 = vmatprep.subr.bf16.mxu1 %v8276_v52  ;;  %v8354_v33 = vld [vmem:[#allocation5 + $0x108c] ss:$16 sps:$4 sm:$0xff]  }
 0x29b   :  { %5176 = vmatprep.subr.bf16.mxu0 %v8273_v35  ;;  %v8357_v35 = vld [vmem:[#allocation5 + $0x14a4] ss:$16 sps:$4 sm:$0xff]   ;;  %v8360_v52 = vld [vmem:[#allocation5 + $0x10ac] ss:$16 sps:$4 sm:$0xff]  }
 0x29d   :  { %5587 = vmatpush1.bf16.msra.mxu1 %v8274_v38  ;;  %v8358_v38 = vld [vmem:[#allocation5 + $0x10a8] ss:$16 sps:$4 sm:$0xff]  }
 0x29e   :  { %5177 = vmatpush1.bf16.msra.mxu0 %v8271_v37  ;;  %5588 = vmatprep.subr.bf16.mxu1 %v8282_v40  ;;  %v8355_v37 = vld [vmem:[#allocation5 + $0x14a0] ss:$16 sps:$4 sm:$0xff]   ;;  %v8366_v40 = vld [vmem:[#allocation5 + $0x10cc] ss:$16 sps:$4 sm:$0xff]  }
 0x29f   :  { %5178 = vmatprep.subr.bf16.mxu0 %v8279_v39  ;;  %v8363_v39 = vld [vmem:[#allocation5 + $0x14c4] ss:$16 sps:$4 sm:$0xff]  }
 0x2a1   :  { %5589 = vmatpush1.bf16.msra.mxu1 %v8280_v36  ;;  %v8364_v36 = vld [vmem:[#allocation5 + $0x10c8] ss:$16 sps:$4 sm:$0xff]  }
 0x2a2   :  { %5179 = vmatpush1.bf16.msra.mxu0 %v8277_v41  ;;  %5590 = vmatprep.subr.bf16.mxu1 %v8288_v43  ;;  %v8361_v41 = vld [vmem:[#allocation5 + $0x14c0] ss:$16 sps:$4 sm:$0xff]   ;;  %v8372_v43 = vld [vmem:[#allocation5 + $0x10ec] ss:$16 sps:$4 sm:$0xff]  }
 0x2a3   :  { %5180 = vmatprep.subr.bf16.mxu0 %v8285_v16  ;;  %v8369_v16 = vld [vmem:[#allocation5 + $0x14e4] ss:$16 sps:$4 sm:$0xff]  }
 0x2a5   :  { %5591 = vmatpush1.bf16.msra.mxu1 %v8286_v45  ;;  %v8370_v45 = vld [vmem:[#allocation5 + $0x10e8] ss:$16 sps:$4 sm:$0xff]  }
 0x2a6   :  { %5181 = vmatpush1.bf16.msra.mxu0 %v8283_v44  ;;  %5592 = vmatprep.subr.bf16.mxu1 %v8294_v23  ;;  %v8367_v44 = vld [vmem:[#allocation5 + $0x14e0] ss:$16 sps:$4 sm:$0xff]   ;;  %v8378_v23 = vld [vmem:[#allocation5 + $0x110c] ss:$16 sps:$4 sm:$0xff]  }
 0x2a7   :  { %5182 = vmatprep.subr.bf16.mxu0 %v8291_v47  ;;  %v8375_v47 = vld [vmem:[#allocation5 + $0x1504] ss:$16 sps:$4 sm:$0xff]  }
 0x2a9   :  { %5593 = vmatpush1.bf16.msra.mxu1 %v8292_v49  ;;  %v8376_v49 = vld [vmem:[#allocation5 + $0x1108] ss:$16 sps:$4 sm:$0xff]  }
 0x2aa   :  { %5183 = vmatpush1.bf16.msra.mxu0 %v8289_v48  ;;  %5594 = vmatprep.subr.bf16.mxu1 %v8300_v53  ;;  %v8373_v48 = vld [vmem:[#allocation5 + $0x1500] ss:$16 sps:$4 sm:$0xff]   ;;  %v8384_v53 = vld [vmem:[#allocation5 + $0x112c] ss:$16 sps:$4 sm:$0xff]  }
 0x2ab   :  { %5184 = vmatprep.subr.bf16.mxu0 %v8297_v51  ;;  %v8381_v51 = vld [vmem:[#allocation5 + $0x1524] ss:$16 sps:$4 sm:$0xff]  }
 0x2ad   :  { %5595 = vmatpush1.bf16.msra.mxu1 %v8298_v54  ;;  %v8382_v54 = vld [vmem:[#allocation5 + $0x1128] ss:$16 sps:$4 sm:$0xff]  }
 0x2ae   :  { %5185 = vmatpush1.bf16.msra.mxu0 %v8295_v25  ;;  %5596 = vmatprep.subr.bf16.mxu1 %v8306_v59  ;;  %v8379_v25 = vld [vmem:[#allocation5 + $0x1520] ss:$16 sps:$4 sm:$0xff]   ;;  %v8390_v59 = vld [vmem:[#allocation5 + $0x114c] ss:$16 sps:$4 sm:$0xff]  }
 0x2af   :  { %5186 = vmatprep.subr.bf16.mxu0 %v8303_v58  ;;  %v8387_v58 = vld [vmem:[#allocation5 + $0x1544] ss:$16 sps:$4 sm:$0xff]  }
 0x2b1   :  { %5597 = vmatpush1.bf16.msra.mxu1 %v8304_v8  ;;  %v8388_v8 = vld [vmem:[#allocation5 + $0x1148] ss:$16 sps:$4 sm:$0xff]  }
 0x2b2   :  { %5187 = vmatpush1.bf16.msra.mxu0 %v8301_v60  ;;  %5598 = vmatprep.subr.bf16.mxu1 %v8312_v63  ;;  %v8385_v60 = vld [vmem:[#allocation5 + $0x1540] ss:$16 sps:$4 sm:$0xff]   ;;  %v8396_v63 = vld [vmem:[#allocation5 + $0x116c] ss:$16 sps:$4 sm:$0xff]  }
 0x2b3   :  { %5188 = vmatprep.subr.bf16.mxu0 %v8309_v62  ;;  %v8393_v62 = vld [vmem:[#allocation5 + $0x1564] ss:$16 sps:$4 sm:$0xff]  }
 0x2b5   :  { %5599 = vmatpush1.bf16.msra.mxu1 %v8310_v0  ;;  %v8394_v0 = vld [vmem:[#allocation5 + $0x1168] ss:$16 sps:$4 sm:$0xff]  }
 0x2b6   :  { %5189 = vmatpush1.bf16.msra.mxu0 %v8307_v32  ;;  %5600 = vmatprep.subr.bf16.mxu1 %v8318_v3  ;;  %v8391_v32 = vld [vmem:[#allocation5 + $0x1560] ss:$16 sps:$4 sm:$0xff]   ;;  %v8402_v3 = vld [vmem:[#allocation5 + $0x118c] ss:$16 sps:$4 sm:$0xff]  }
 0x2b7   :  { %5190 = vmatprep.subr.bf16.mxu0 %v8315_v2  ;;  %v8399_v2 = vld [vmem:[#allocation5 + $0x1584] ss:$16 sps:$4 sm:$0xff]  }
 0x2b9   :  { %5601 = vmatpush1.bf16.msra.mxu1 %v8316_v5  ;;  %v8400_v5 = vld [vmem:[#allocation5 + $0x1188] ss:$16 sps:$4 sm:$0xff]  }
 0x2ba   :  { %5191 = vmatpush1.bf16.msra.mxu0 %v8313_v4  ;;  %5602 = vmatprep.subr.bf16.mxu1 %v8324_v7  ;;  %v8397_v4 = vld [vmem:[#allocation5 + $0x1580] ss:$16 sps:$4 sm:$0xff]   ;;  %v8408_v7 = vld [vmem:[#allocation5 + $0x11ac] ss:$16 sps:$4 sm:$0xff]  }
 0x2bb   :  { %5192 = vmatprep.subr.bf16.mxu0 %v8321_v6  ;;  %v8405_v6 = vld [vmem:[#allocation5 + $0x15a4] ss:$16 sps:$4 sm:$0xff]  }
 0x2bd   :  { %5603 = vmatpush1.bf16.msra.mxu1 %v8322_v9  ;;  %v8406_v9 = vld [vmem:[#allocation5 + $0x11a8] ss:$16 sps:$4 sm:$0xff]  }
 0x2be   :  { %5193 = vmatpush1.bf16.msra.mxu0 %v8319_v42  ;;  %5613 = vmatprep.subr.bf16.mxu1 %v8330_v14  ;;  %v8403_v42 = vld [vmem:[#allocation5 + $0x15a0] ss:$16 sps:$4 sm:$0xff]  }
 0x2bf   :  { %5203 = vmatprep.subr.bf16.mxu0 %v8327_v13  ;;  %v8414_v13 = vld [vmem:[#allocation5 + $0x11cc] ss:$16 sps:$4 sm:$0xff]   ;;  %v8409_v14 = vld [vmem:[#allocation5 + $0x15c0] ss:$16 sps:$4 sm:$0xff]  }
 0x2c0   :  { %5605 = vmatmul.mubr.bf16.vlgmr.msra.gmra.mrb[4].mxu1 %v9113_v61  ;;  %v8348_v61 = vld [vmem:[#allocation5 + $0x106c] ss:$16 sps:$4 sm:$0xff]  }
 0x2c1   :  { %5195 = vmatmul.mubr.bf16.vlgmr.msra.gmra.mrb[0].mxu0 %v9129_v46  ;;  %5614 = vmatpush1.bf16.msra.mxu1 %v8328_v18  ;;  %v8420_v18 = vld [vmem:[#allocation5 + $0x11ec] ss:$16 sps:$4 sm:$0xff]  }
 0x2c2   :  { %5204 = vmatpush1.bf16.msra.mxu0 %v8325_v17  ;;  %5615 = vmatprep.subr.bf16.mxu1 %v8336_v19  ;;  %v8417_v17 = vld [vmem:[#allocation5 + $0x15e4] ss:$16 sps:$4 sm:$0xff]   ;;  %v8418_v19 = vld [vmem:[#allocation5 + $0x11e8] ss:$16 sps:$4 sm:$0xff]  }
 0x2c3   :  { %5205 = vmatprep.subr.bf16.mxu0 %v8333_v50  ;;  %5235 = vmatprep.mubr.bf16.mxu0 %v9131_v20  ;;  %v8415_v50 = vld [vmem:[#allocation5 + $0x15e0] ss:$16 sps:$4 sm:$0xff]  }
 0x2c4   :  { %5645 = vmatprep.mubr.bf16.mxu1 %v9115_v1  ;;  %v8352_v1 = vld [vmem:[#allocation5 + $0x1088] ss:$16 sps:$4 sm:$0xff]  }
 0x2c5   :  { %5616 = vmatpush1.bf16.msra.mxu1 %v8334_v22  ;;  %v8423_v22 = vld [vmem:[#allocation5 + $0x1604] ss:$16 sps:$4 sm:$0xff]  }
 0x2c6   :  { %5206 = vmatpush1.bf16.msra.mxu0 %v8331_v21  ;;  %5617 = vmatprep.subr.bf16.mxu1 %v8342_v57  ;;  %v135_v21 = vld [vmem:[#allocation2 + $0xa0] sm:$0xff] }
 0x2c7   :  { %5207 = vmatprep.subr.bf16.mxu0 %v8339_v24  ;;  %v8426_v24 = vld [vmem:[#allocation5 + $0x120c] ss:$16 sps:$4 sm:$0xff]   ;;  %v9137_v57 = vpack.c.bf16 %v135_v21, %v135_v21  ;;  %v8507_v21 = vld [vmem:[#allocation5 + $0x17c4] ss:$16 sps:$4 sm:$0xff]  }
 0x2c9   :  { %5618 = vmatpush1.bf16.msra.mxu1 %v8340_v27  ;;  %v8421_v27 = vld [vmem:[#allocation5 + $0x1600] ss:$16 sps:$4 sm:$0xff]  }
 0x2ca   :  { %5208 = vmatpush1.bf16.msra.mxu0 %v8337_v26  ;;  %5619 = vmatprep.subr.bf16.mxu1 %v8348_v61  ;;  %v138_v26 = vld [vmem:[#allocation2 + $0xb8] sm:$0xff]  ;;  %v8429_v61 = vld [vmem:[#allocation5 + $0x1624] ss:$16 sps:$4 sm:$0xff]  }
 0x2cb   :  { %5209 = vmatprep.subr.bf16.mxu0 %v8345_v28  ;;  %v8424_v28 = vld [vmem:[#allocation5 + $0x1208] ss:$16 sps:$4 sm:$0xff]  }
 0x2cd   :  { %5620 = vmatpush1.bf16.msra.mxu1 %v8346_v30  ;;  %v9139_v30 = vpack.c.bf16 %v138_v26, %v138_v26  ;;  %v8508_v26 = vld [vmem:[#allocation5 + $0x13c8] ss:$16 sps:$4 sm:$0xff]  }
 0x2ce   :  { %5210 = vmatpush1.bf16.msra.mxu0 %v8343_v29  ;;  %5621 = vmatprep.subr.bf16.mxu1 %v8354_v33  ;;  %v8432_v29 = vld [vmem:[#allocation5 + $0x122c] ss:$16 sps:$4 sm:$0xff]   ;;  %v8430_v33 = vld [vmem:[#allocation5 + $0x1228] ss:$16 sps:$4 sm:$0xff]  }
 0x2cf   :  { %5211 = vmatprep.subr.bf16.mxu0 %v8351_v31  ;;  %v8427_v31 = vld [vmem:[#allocation5 + $0x1620] ss:$16 sps:$4 sm:$0xff]  }
 0x2d1   :  { %5622 = vmatpush1.bf16.msra.mxu1 %v8352_v1  ;;  %v8438_v1 = vld [vmem:[#allocation5 + $0x124c] ss:$16 sps:$4 sm:$0xff]  }
 0x2d2   :  { %5212 = vmatpush1.bf16.msra.mxu0 %v8349_v34  ;;  %5623 = vmatprep.subr.bf16.mxu1 %v8360_v52  ;;  %v8435_v34 = vld [vmem:[#allocation5 + $0x1644] ss:$16 sps:$4 sm:$0xff]   ;;  %v8436_v52 = vld [vmem:[#allocation5 + $0x1248] ss:$16 sps:$4 sm:$0xff]  }
 0x2d3   :  { %5213 = vmatprep.subr.bf16.mxu0 %v8357_v35  ;;  %v8433_v35 = vld [vmem:[#allocation5 + $0x1640] ss:$16 sps:$4 sm:$0xff]  }
 0x2d5   :  { %5624 = vmatpush1.bf16.msra.mxu1 %v8358_v38  ;;  %v8439_v38 = vld [vmem:[#allocation5 + $0x1660] ss:$16 sps:$4 sm:$0xff]  }
 0x2d6   :  { %5214 = vmatpush1.bf16.msra.mxu0 %v8355_v37  ;;  %5625 = vmatprep.subr.bf16.mxu1 %v8366_v40  ;;  %v8441_v37 = vld [vmem:[#allocation5 + $0x1664] ss:$16 sps:$4 sm:$0xff]  }
 0x2d7   :  { %5215 = vmatprep.subr.bf16.mxu0 %v8363_v39  ;;  %v8442_v39 = vld [vmem:[#allocation5 + $0x1268] ss:$16 sps:$4 sm:$0xff]   ;;  %v8447_v40 = vld [vmem:[#allocation5 + $0x1684] ss:$16 sps:$4 sm:$0xff]  }
 0x2d9   :  { %5626 = vmatpush1.bf16.msra.mxu1 %v8364_v36  ;;  %v8445_v36 = vld [vmem:[#allocation5 + $0x1680] ss:$16 sps:$4 sm:$0xff]  }
 0x2da   :  { %5216 = vmatpush1.bf16.msra.mxu0 %v8361_v41  ;;  %5627 = vmatprep.subr.bf16.mxu1 %v8372_v43  ;;  %v8450_v41 = vld [vmem:[#allocation5 + $0x128c] ss:$16 sps:$4 sm:$0xff]  }
 0x2db   :  { %5217 = vmatprep.subr.bf16.mxu0 %v8369_v16  ;;  %v8453_v16 = vld [vmem:[#allocation5 + $0x16a4] ss:$16 sps:$4 sm:$0xff]   ;;  %v8456_v43 = vld [vmem:[#allocation5 + $0x12ac] ss:$16 sps:$4 sm:$0xff]  }
 0x2dd   :  { %5628 = vmatpush1.bf16.msra.mxu1 %v8370_v45  ;;  %v8454_v45 = vld [vmem:[#allocation5 + $0x12a8] ss:$16 sps:$4 sm:$0xff]  }
 0x2de   :  { %5218 = vmatpush1.bf16.msra.mxu0 %v8367_v44  ;;  %5629 = vmatprep.subr.bf16.mxu1 %v8378_v23  ;;  %v8451_v44 = vld [vmem:[#allocation5 + $0x16a0] ss:$16 sps:$4 sm:$0xff]   ;;  %v8462_v23 = vld [vmem:[#allocation5 + $0x12cc] ss:$16 sps:$4 sm:$0xff]  }
 0x2df   :  { %5219 = vmatprep.subr.bf16.mxu0 %v8375_v47  ;;  %v8459_v47 = vld [vmem:[#allocation5 + $0x16c4] ss:$16 sps:$4 sm:$0xff]  }
 0x2e1   :  { %5630 = vmatpush1.bf16.msra.mxu1 %v8376_v49  ;;  %v8460_v49 = vld [vmem:[#allocation5 + $0x12c8] ss:$16 sps:$4 sm:$0xff]  }
 0x2e2   :  { %5220 = vmatpush1.bf16.msra.mxu0 %v8373_v48  ;;  %5631 = vmatprep.subr.bf16.mxu1 %v8384_v53  ;;  %v8457_v48 = vld [vmem:[#allocation5 + $0x16c0] ss:$16 sps:$4 sm:$0xff]   ;;  %v8468_v53 = vld [vmem:[#allocation5 + $0x12ec] ss:$16 sps:$4 sm:$0xff]  }
 0x2e3   :  { %5221 = vmatprep.subr.bf16.mxu0 %v8381_v51  ;;  %v8465_v51 = vld [vmem:[#allocation5 + $0x16e4] ss:$16 sps:$4 sm:$0xff]  }
 0x2e5   :  { %5632 = vmatpush1.bf16.msra.mxu1 %v8382_v54  ;;  %v8466_v54 = vld [vmem:[#allocation5 + $0x12e8] ss:$16 sps:$4 sm:$0xff]  }
 0x2e6   :  { %5222 = vmatpush1.bf16.msra.mxu0 %v8379_v25  ;;  %5633 = vmatprep.subr.bf16.mxu1 %v8390_v59  ;;  %v8463_v25 = vld [vmem:[#allocation5 + $0x16e0] ss:$16 sps:$4 sm:$0xff]   ;;  %v8474_v59 = vld [vmem:[#allocation5 + $0x130c] ss:$16 sps:$4 sm:$0xff]  }
 0x2e7   :  { %5223 = vmatprep.subr.bf16.mxu0 %v8387_v58  ;;  %v8471_v58 = vld [vmem:[#allocation5 + $0x1704] ss:$16 sps:$4 sm:$0xff]  }
 0x2e9   :  { %5634 = vmatpush1.bf16.msra.mxu1 %v8388_v8  ;;  %v8472_v8 = vld [vmem:[#allocation5 + $0x1308] ss:$16 sps:$4 sm:$0xff]  }
 0x2ea   :  { %5224 = vmatpush1.bf16.msra.mxu0 %v8385_v60  ;;  %5635 = vmatprep.subr.bf16.mxu1 %v8396_v63  ;;  %v8469_v60 = vld [vmem:[#allocation5 + $0x1700] ss:$16 sps:$4 sm:$0xff]   ;;  %v8480_v63 = vld [vmem:[#allocation5 + $0x132c] ss:$16 sps:$4 sm:$0xff]  }
 0x2eb   :  { %5225 = vmatprep.subr.bf16.mxu0 %v8393_v62  ;;  %v8477_v62 = vld [vmem:[#allocation5 + $0x1724] ss:$16 sps:$4 sm:$0xff]  }
 0x2ed   :  { %5636 = vmatpush1.bf16.msra.mxu1 %v8394_v0  ;;  %v8478_v0 = vld [vmem:[#allocation5 + $0x1328] ss:$16 sps:$4 sm:$0xff]  }
 0x2ee   :  { %5226 = vmatpush1.bf16.msra.mxu0 %v8391_v32  ;;  %5637 = vmatprep.subr.bf16.mxu1 %v8402_v3  ;;  %v8475_v32 = vld [vmem:[#allocation5 + $0x1720] ss:$16 sps:$4 sm:$0xff]   ;;  %v8486_v3 = vld [vmem:[#allocation5 + $0x134c] ss:$16 sps:$4 sm:$0xff]  }
 0x2ef   :  { %5227 = vmatprep.subr.bf16.mxu0 %v8399_v2  ;;  %v8483_v2 = vld [vmem:[#allocation5 + $0x1744] ss:$16 sps:$4 sm:$0xff]  }
 0x2f1   :  { %5638 = vmatpush1.bf16.msra.mxu1 %v8400_v5  ;;  %v8484_v5 = vld [vmem:[#allocation5 + $0x1348] ss:$16 sps:$4 sm:$0xff]  }
 0x2f2   :  { %5228 = vmatpush1.bf16.msra.mxu0 %v8397_v4  ;;  %5639 = vmatprep.subr.bf16.mxu1 %v8408_v7  ;;  %v8481_v4 = vld [vmem:[#allocation5 + $0x1740] ss:$16 sps:$4 sm:$0xff]   ;;  %v8492_v7 = vld [vmem:[#allocation5 + $0x136c] ss:$16 sps:$4 sm:$0xff]  }
 0x2f3   :  { %5229 = vmatprep.subr.bf16.mxu0 %v8405_v6  ;;  %v8489_v6 = vld [vmem:[#allocation5 + $0x1764] ss:$16 sps:$4 sm:$0xff]  }
 0x2f5   :  { %5640 = vmatpush1.bf16.msra.mxu1 %v8406_v9  ;;  %v8490_v9 = vld [vmem:[#allocation5 + $0x1368] ss:$16 sps:$4 sm:$0xff]  }
 0x2f6   :  { %5230 = vmatpush1.bf16.msra.mxu0 %v8403_v42  ;;  %5641 = vmatprep.subr.bf16.mxu1 %v8414_v13  ;;  %v8487_v42 = vld [vmem:[#allocation5 + $0x1760] ss:$16 sps:$4 sm:$0xff]   ;;  %v8498_v13 = vld [vmem:[#allocation5 + $0x138c] ss:$16 sps:$4 sm:$0xff]  }
 0x2f7   :  { %5231 = vmatprep.subr.bf16.mxu0 %v8411_v12  ;;  %v8495_v12 = vld [vmem:[#allocation5 + $0x1784] ss:$16 sps:$4 sm:$0xff]  }
 0x2f9   :  { %5642 = vmatpush1.bf16.msra.mxu1 %v8412_v15  ;;  %v8496_v15 = vld [vmem:[#allocation5 + $0x1388] ss:$16 sps:$4 sm:$0xff]  }
 0x2fa   :  { %5232 = vmatpush1.bf16.msra.mxu0 %v8409_v14  ;;  %5643 = vmatprep.subr.bf16.mxu1 %v8420_v18  ;;  %v8493_v14 = vld [vmem:[#allocation5 + $0x1780] ss:$16 sps:$4 sm:$0xff]   ;;  %v8504_v18 = vld [vmem:[#allocation5 + $0x13ac] ss:$16 sps:$4 sm:$0xff]  }
 0x2fb   :  { %5233 = vmatprep.subr.bf16.mxu0 %v8417_v17  ;;  %v8501_v17 = vld [vmem:[#allocation5 + $0x17a4] ss:$16 sps:$4 sm:$0xff]  }
 0x2fd   :  { %5644 = vmatpush1.bf16.msra.mxu1 %v8418_v19  ;;  %v8502_v19 = vld [vmem:[#allocation5 + $0x13a8] ss:$16 sps:$4 sm:$0xff]  }
 0x2fe   :  { %5234 = vmatpush1.bf16.msra.mxu0 %v8415_v50  ;;  %5654 = vmatprep.subr.bf16.mxu1 %v8426_v24  ;;  %v8499_v50 = vld [vmem:[#allocation5 + $0x17a0] ss:$16 sps:$4 sm:$0xff]  }
 0x2ff   :  { %5244 = vmatprep.subr.bf16.mxu0 %v8423_v22  ;;  %v8510_v22 = vld [vmem:[#allocation5 + $0x13cc] ss:$16 sps:$4 sm:$0xff]   ;;  %v8505_v24 = vld [vmem:[#allocation5 + $0x17c0] ss:$16 sps:$4 sm:$0xff]  }
 0x300   :  { %5646 = vmatmul.mubr.bf16.vlgmr.msra.gmra.mrb[4].mxu1 %v9121_v11  ;;  %v8444_v11 = vld [vmem:[#allocation5 + $0x126c] ss:$16 sps:$4 sm:$0xff]  }
 0x301   :  { %5236 = vmatmul.mubr.bf16.vlgmr.msra.gmra.mrb[0].mxu0 %v9137_v57  ;;  %5655 = vmatpush1.bf16.msra.mxu1 %v8424_v28  ;;  %v8516_v28 = vld [vmem:[#allocation5 + $0x13ec] ss:$16 sps:$4 sm:$0xff]  }
 0x302   :  { %5245 = vmatpush1.bf16.msra.mxu0 %v8421_v27  ;;  %5656 = vmatprep.subr.bf16.mxu1 %v8432_v29  ;;  %v8513_v27 = vld [vmem:[#allocation5 + $0x17e4] ss:$16 sps:$4 sm:$0xff]   ;;  %v8514_v29 = vld [vmem:[#allocation5 + $0x13e8] ss:$16 sps:$4 sm:$0xff]  }
 0x303   :  { %5246 = vmatprep.subr.bf16.mxu0 %v8429_v61  ;;  %5276 = vmatprep.mubr.bf16.mxu0 %v9139_v30  ;;  %v8511_v61 = vld [vmem:[#allocation5 + $0x17e0] ss:$16 sps:$4 sm:$0xff]  }
 0x304   :  { %5686 = vmatprep.mubr.bf16.mxu1 %v9123_v10  ;;  %v8448_v10 = vld [vmem:[#allocation5 + $0x1288] ss:$16 sps:$4 sm:$0xff]  }
 0x305   :  { %5657 = vmatpush1.bf16.msra.mxu1 %v8430_v33  ;;  %v8519_v33 = vld [vmem:[#allocation5 + $0x140c] ss:$16 sps:$4 sm:$0xff]  }
 0x306   :  { %5247 = vmatpush1.bf16.msra.mxu0 %v8427_v31  ;;  %5658 = vmatprep.subr.bf16.mxu1 %v8438_v1  ;;  %v137_v31 = vld [vmem:[#allocation2 + $0xb0] sm:$0xff]  ;;  %v8517_v1 = vld [vmem:[#allocation5 + $0x1408] ss:$16 sps:$4 sm:$0xff]  }
 0x307   :  { %5248 = vmatprep.subr.bf16.mxu0 %v8435_v34  ;;  %v9145_v34 = vpack.c.bf16 %v137_v31, %v137_v31  ;;  %v8564_v31 = vld [vmem:[#allocation5 + $0x15ec] ss:$16 sps:$4 sm:$0xff]  }
 0x309   :  { %5659 = vmatpush1.bf16.msra.mxu1 %v8436_v52  ;;  %v8613_v52 = vld [vmem:[#allocation8] ss:$8 sps:$4 sm:$0xff]  }
 0x30a   :  { %5249 = vmatpush1.bf16.msra.mxu0 %v8433_v35  ;;  %5660 = vmatprep.subr.bf16.mxu1 %v8444_v11  ;;  %v8522_v35 = vld [vmem:[#allocation5 + $0x142c] ss:$16 sps:$4 sm:$0xff]   ;;  %v8520_v11 = vld [vmem:[#allocation5 + $0x1428] ss:$16 sps:$4 sm:$0xff]  }
 0x30b   :  { %5250 = vmatprep.subr.bf16.mxu0 %v8441_v37  ;;  %v8615_v37 = vld [vmem:[#allocation8 + $0x4] ss:$8 sps:$4 sm:$0xff]  }
 0x30d   :  { %5661 = vmatpush1.bf16.msra.mxu1 %v8442_v39  ;;  %v8525_v39 = vld [vmem:[#allocation5 + $0x144c] ss:$16 sps:$4 sm:$0xff]  }
 0x30e   :  { %5251 = vmatpush1.bf16.msra.mxu0 %v8439_v38  ;;  %5662 = vmatprep.subr.bf16.mxu1 %v8450_v41  ;;  %v8618_v38 = vld [vmem:[#allocation8 + $0x14] ss:$8 sps:$4 sm:$0xff]   ;;  %v8621_v41 = vld [vmem:[#allocation8 + $0x24] ss:$8 sps:$4 sm:$0xff]  }
 0x30f   :  { %5252 = vmatprep.subr.bf16.mxu0 %v8447_v40  ;;  %v8616_v40 = vld [vmem:[#allocation8 + $0x10] ss:$8 sps:$4 sm:$0xff]  }
 0x311   :  { %5663 = vmatpush1.bf16.msra.mxu1 %v8448_v10  ;;  %v8528_v10 = vld [vmem:[#allocation5 + $0x146c] ss:$16 sps:$4 sm:$0xff]  }
 0x312   :  { %5253 = vmatpush1.bf16.msra.mxu0 %v8445_v36  ;;  %5664 = vmatprep.subr.bf16.mxu1 %v8456_v43  ;;  %v8523_v36 = vld [vmem:[#allocation5 + $0x1448] ss:$16 sps:$4 sm:$0xff]  }
 0x313   :  { %5254 = vmatprep.subr.bf16.mxu0 %v8453_v16  ;;  %v8624_v16 = vld [vmem:[#allocation8 + $0x34] ss:$8 sps:$4 sm:$0xff]  }
 0x314   :  { %v8526_v43 = vld [vmem:[#allocation5 + $0x1468] ss:$16 sps:$4 sm:$0xff]  }
 0x315   :  { %5665 = vmatpush1.bf16.msra.mxu1 %v8454_v45  ;;  %v8627_v45 = vld [vmem:[#allocation8 + $0x44] ss:$8 sps:$4 sm:$0xff]  }
 0x316   :  { %5255 = vmatpush1.bf16.msra.mxu0 %v8451_v44  ;;  %5666 = vmatprep.subr.bf16.mxu1 %v8462_v23  ;;  %v8622_v44 = vld [vmem:[#allocation8 + $0x30] ss:$8 sps:$4 sm:$0xff]  }
 0x317   :  { %5256 = vmatprep.subr.bf16.mxu0 %v8459_v47  ;;  %v8529_v47 = vld [vmem:[#allocation5 + $0x1488] ss:$16 sps:$4 sm:$0xff]   ;;  %v8534_v23 = vld [vmem:[#allocation5 + $0x14ac] ss:$16 sps:$4 sm:$0xff]  }
 0x319   :  { %5667 = vmatpush1.bf16.msra.mxu1 %v8460_v49  ;;  %v8630_v49 = vld [vmem:[#allocation8 + $0x54] ss:$8 sps:$4 sm:$0xff]  }
 0x31a   :  { %5257 = vmatpush1.bf16.msra.mxu0 %v8457_v48  ;;  %5668 = vmatprep.subr.bf16.mxu1 %v8468_v53  ;;  %v8625_v48 = vld [vmem:[#allocation8 + $0x40] ss:$8 sps:$4 sm:$0xff]  }
 0x31b   :  { %5258 = vmatprep.subr.bf16.mxu0 %v8465_v51  ;;  %v8532_v51 = vld [vmem:[#allocation5 + $0x14a8] ss:$16 sps:$4 sm:$0xff]   ;;  %v8537_v53 = vld [vmem:[#allocation5 + $0x14cc] ss:$16 sps:$4 sm:$0xff]  }
 0x31d   :  { %5669 = vmatpush1.bf16.msra.mxu1 %v8466_v54  ;;  %v8633_v54 = vld [vmem:[#allocation8 + $0x64] ss:$8 sps:$4 sm:$0xff]  }
 0x31e   :  { %5259 = vmatpush1.bf16.msra.mxu0 %v8463_v25  ;;  %5670 = vmatprep.subr.bf16.mxu1 %v8474_v59  ;;  %v8628_v25 = vld [vmem:[#allocation8 + $0x50] ss:$8 sps:$4 sm:$0xff]  }
 0x31f   :  { %5260 = vmatprep.subr.bf16.mxu0 %v8471_v58  ;;  %v8535_v58 = vld [vmem:[#allocation5 + $0x14c8] ss:$16 sps:$4 sm:$0xff]   ;;  %v8540_v59 = vld [vmem:[#allocation5 + $0x14ec] ss:$16 sps:$4 sm:$0xff]  }
 0x321   :  { %5671 = vmatpush1.bf16.msra.mxu1 %v8472_v8  ;;  %v8636_v8 = vld [vmem:[#allocation8 + $0x74] ss:$8 sps:$4 sm:$0xff]  }
 0x322   :  { %5261 = vmatpush1.bf16.msra.mxu0 %v8469_v60  ;;  %5672 = vmatprep.subr.bf16.mxu1 %v8480_v63  ;;  %v8631_v60 = vld [vmem:[#allocation8 + $0x60] ss:$8 sps:$4 sm:$0xff]  }
 0x323   :  { %5262 = vmatprep.subr.bf16.mxu0 %v8477_v62  ;;  %v8538_v62 = vld [vmem:[#allocation5 + $0x14e8] ss:$16 sps:$4 sm:$0xff]   ;;  %v8543_v63 = vld [vmem:[#allocation5 + $0x150c] ss:$16 sps:$4 sm:$0xff]  }
 0x325   :  { %5673 = vmatpush1.bf16.msra.mxu1 %v8478_v0  ;;  %v8639_v0 = vld [vmem:[#allocation8 + $0x84] ss:$8 sps:$4 sm:$0xff]  }
 0x326   :  { %5263 = vmatpush1.bf16.msra.mxu0 %v8475_v32  ;;  %5674 = vmatprep.subr.bf16.mxu1 %v8486_v3  ;;  %v8634_v32 = vld [vmem:[#allocation8 + $0x70] ss:$8 sps:$4 sm:$0xff]  }
 0x327   :  { %5264 = vmatprep.subr.bf16.mxu0 %v8483_v2  ;;  %v8541_v2 = vld [vmem:[#allocation5 + $0x1508] ss:$16 sps:$4 sm:$0xff]   ;;  %v8546_v3 = vld [vmem:[#allocation5 + $0x152c] ss:$16 sps:$4 sm:$0xff]  }
 0x329   :  { %5675 = vmatpush1.bf16.msra.mxu1 %v8484_v5  ;;  %v8642_v5 = vld [vmem:[#allocation8 + $0x94] ss:$8 sps:$4 sm:$0xff]  }
 0x32a   :  { %5265 = vmatpush1.bf16.msra.mxu0 %v8481_v4  ;;  %5676 = vmatprep.subr.bf16.mxu1 %v8492_v7  ;;  %v8637_v4 = vld [vmem:[#allocation8 + $0x80] ss:$8 sps:$4 sm:$0xff]  }
 0x32b   :  { %5266 = vmatprep.subr.bf16.mxu0 %v8489_v6  ;;  %v8544_v6 = vld [vmem:[#allocation5 + $0x1528] ss:$16 sps:$4 sm:$0xff]   ;;  %v8549_v7 = vld [vmem:[#allocation5 + $0x154c] ss:$16 sps:$4 sm:$0xff]  }
 0x32d   :  { %5677 = vmatpush1.bf16.msra.mxu1 %v8490_v9  ;;  %v8645_v9 = vld [vmem:[#allocation8 + $0xa4] ss:$8 sps:$4 sm:$0xff]  }
 0x32e   :  { %5267 = vmatpush1.bf16.msra.mxu0 %v8487_v42  ;;  %5678 = vmatprep.subr.bf16.mxu1 %v8498_v13  ;;  %v8640_v42 = vld [vmem:[#allocation8 + $0x90] ss:$8 sps:$4 sm:$0xff]  }
 0x32f   :  { %5268 = vmatprep.subr.bf16.mxu0 %v8495_v12  ;;  %v8547_v12 = vld [vmem:[#allocation5 + $0x1548] ss:$16 sps:$4 sm:$0xff]   ;;  %v8552_v13 = vld [vmem:[#allocation5 + $0x156c] ss:$16 sps:$4 sm:$0xff]  }
 0x331   :  { %5679 = vmatpush1.bf16.msra.mxu1 %v8496_v15  ;;  %v8648_v15 = vld [vmem:[#allocation8 + $0xb4] ss:$8 sps:$4 sm:$0xff]  }
 0x332   :  { %5269 = vmatpush1.bf16.msra.mxu0 %v8493_v14  ;;  %5680 = vmatprep.subr.bf16.mxu1 %v8504_v18  ;;  %v8643_v14 = vld [vmem:[#allocation8 + $0xa0] ss:$8 sps:$4 sm:$0xff]  }
 0x333   :  { %5270 = vmatprep.subr.bf16.mxu0 %v8501_v17  ;;  %v8550_v17 = vld [vmem:[#allocation5 + $0x1568] ss:$16 sps:$4 sm:$0xff]   ;;  %v8555_v18 = vld [vmem:[#allocation5 + $0x158c] ss:$16 sps:$4 sm:$0xff]  }
 0x335   :  { %5681 = vmatpush1.bf16.msra.mxu1 %v8502_v19  ;;  %v8651_v19 = vld [vmem:[#allocation8 + $0xc4] ss:$8 sps:$4 sm:$0xff]  }
 0x336   :  { %5271 = vmatpush1.bf16.msra.mxu0 %v8499_v50  ;;  %5682 = vmatprep.subr.bf16.mxu1 %v8510_v22  ;;  %v8646_v50 = vld [vmem:[#allocation8 + $0xb0] ss:$8 sps:$4 sm:$0xff]  }
 0x337   :  { %5272 = vmatprep.subr.bf16.mxu0 %v8507_v21  ;;  %v8553_v21 = vld [vmem:[#allocation5 + $0x1588] ss:$16 sps:$4 sm:$0xff]   ;;  %v8558_v22 = vld [vmem:[#allocation5 + $0x15ac] ss:$16 sps:$4 sm:$0xff]  }
 0x339   :  { %5683 = vmatpush1.bf16.msra.mxu1 %v8508_v26  ;;  %v8654_v26 = vld [vmem:[#allocation8 + $0xd4] ss:$8 sps:$4 sm:$0xff]  }
 0x33a   :  { %5273 = vmatpush1.bf16.msra.mxu0 %v8505_v24  ;;  %5684 = vmatprep.subr.bf16.mxu1 %v8516_v28  ;;  %v8649_v24 = vld [vmem:[#allocation8 + $0xc0] ss:$8 sps:$4 sm:$0xff]  }
 0x33b   :  { %5274 = vmatprep.subr.bf16.mxu0 %v8513_v27  ;;  %v8556_v27 = vld [vmem:[#allocation5 + $0x15a8] ss:$16 sps:$4 sm:$0xff]   ;;  %v8561_v28 = vld [vmem:[#allocation5 + $0x15cc] ss:$16 sps:$4 sm:$0xff]  }
 0x33d   :  { %5685 = vmatpush1.bf16.msra.mxu1 %v8514_v29  ;;  %v8559_v29 = vld [vmem:[#allocation5 + $0x15c8] ss:$16 sps:$4 sm:$0xff]  }
 0x33e   :  { %5275 = vmatpush1.bf16.msra.mxu0 %v8511_v61  ;;  %5695 = vmatprep.subr.bf16.mxu1 %v8519_v33  ;;  %v8652_v61 = vld [vmem:[#allocation8 + $0xd0] ss:$8 sps:$4 sm:$0xff]   ;;  %v8562_v33 = vld [vmem:[#allocation5 + $0x15e8] ss:$16 sps:$4 sm:$0xff]  }
 0x33f   :  { %6189 = vmatprep.subr.bf16.mxu0 %v8615_v37  ;;  %v8568_v37 = vld [vmem:[#allocation5 + $0x1628] ss:$16 sps:$4 sm:$0xff]  }
 0x340   :  { %5687 = vmatmul.mubr.bf16.vlgmr.msra.gmra.mrb[4].mxu1 %v9129_v46  ;;  %v8619_v46 = vld [vmem:[#allocation8 + $0x20] ss:$8 sps:$4 sm:$0xff]  }
 0x341   :  { %5277 = vmatmul.mubr.bf16.vlgmr.msra.gmra.mrb[0].mxu0 %v9145_v34  ;;  %5696 = vmatpush1.bf16.msra.mxu1 %v8517_v1  ;;  %v8567_v1 = vld [vmem:[#allocation5 + $0x160c] ss:$16 sps:$4 sm:$0xff]  }
 0x342   :  { %5727 = vmatprep.mubr.bf16.mxu1 %v9131_v20  ;;  %5697 = vmatprep.subr.bf16.mxu1 %v8522_v35  ;;  %v8531_v20 = vld [vmem:[#allocation5 + $0x148c] ss:$16 sps:$4 sm:$0xff]   ;;  %v8565_v35 = vld [vmem:[#allocation5 + $0x1608] ss:$16 sps:$4 sm:$0xff]  }
 0x343   :  { %6190 = vmatpush1.bf16.msra.mxu0 %v8613_v52  ;;  %v8570_v52 = vld [vmem:[#allocation5 + $0x162c] ss:$16 sps:$4 sm:$0xff]  }
 0x344   :  { %6191 = vmatprep.subr.bf16.mxu0 %v8618_v38  ;;  %v8571_v38 = vld [vmem:[#allocation5 + $0x1648] ss:$16 sps:$4 sm:$0xff]  }
 0x345   :  { %5698 = vmatpush1.bf16.msra.mxu1 %v8520_v11  ;;  %v8573_v11 = vld [vmem:[#allocation5 + $0x164c] ss:$16 sps:$4 sm:$0xff]  }
 0x346   :  { %5699 = vmatprep.subr.bf16.mxu1 %v8525_v39  ;;  %v8576_v39 = vld [vmem:[#allocation5 + $0x166c] ss:$16 sps:$4 sm:$0xff]  }
 0x347   :  { %6192 = vmatpush1.bf16.msra.mxu0 %v8616_v40  ;;  %v8574_v40 = vld [vmem:[#allocation5 + $0x1668] ss:$16 sps:$4 sm:$0xff]  }
 0x348   :  { %6193 = vmatprep.subr.bf16.mxu0 %v8621_v41  ;;  %v8579_v41 = vld [vmem:[#allocation5 + $0x168c] ss:$16 sps:$4 sm:$0xff]  }
 0x349   :  { %5700 = vmatpush1.bf16.msra.mxu1 %v8523_v36  ;;  %v8577_v36 = vld [vmem:[#allocation5 + $0x1688] ss:$16 sps:$4 sm:$0xff]  }
 0x34a   :  { %5701 = vmatprep.subr.bf16.mxu1 %v8528_v10  ;;  %v8582_v10 = vld [vmem:[#allocation5 + $0x16ac] ss:$16 sps:$4 sm:$0xff]  }
 0x34b   :  { %6194 = vmatpush1.bf16.msra.mxu0 %v8619_v46  ;;  %v8585_v46 = vld [vmem:[#allocation5 + $0x16cc] ss:$16 sps:$4 sm:$0xff]  }
 0x34c   :  { %6195 = vmatprep.subr.bf16.mxu0 %v8624_v16  ;;  %v8657_v16 = vld [vmem:[#allocation8 + $0xe4] ss:$8 sps:$4 sm:$0xff]  }
 0x34d   :  { %5702 = vmatpush1.bf16.msra.mxu1 %v8526_v43  ;;  %v8583_v43 = vld [vmem:[#allocation5 + $0x16c8] ss:$16 sps:$4 sm:$0xff]  }
 0x34e   :  { %5703 = vmatprep.subr.bf16.mxu1 %v8531_v20  ;;  %v8588_v20 = vld [vmem:[#allocation5 + $0x16ec] ss:$16 sps:$4 sm:$0xff]  }
 0x34f   :  { %6196 = vmatpush1.bf16.msra.mxu0 %v8622_v44  ;;  %v8660_v44 = vld [vmem:[#allocation8 + $0xf4] ss:$8 sps:$4 sm:$0xff]  }
 0x350   :  { %6197 = vmatprep.subr.bf16.mxu0 %v8627_v45  ;;  %v8658_v45 = vld [vmem:[#allocation8 + $0xf0] ss:$8 sps:$4 sm:$0xff]  }
 0x351   :  { %5704 = vmatpush1.bf16.msra.mxu1 %v8529_v47  ;;  %v8586_v47 = vld [vmem:[#allocation5 + $0x16e8] ss:$16 sps:$4 sm:$0xff]  }
 0x352   :  { %5705 = vmatprep.subr.bf16.mxu1 %v8534_v23  ;;  %v8591_v23 = vld [vmem:[#allocation5 + $0x170c] ss:$16 sps:$4 sm:$0xff]  }
 0x353   :  { %6198 = vmatpush1.bf16.msra.mxu0 %v8625_v48  ;;  %v8589_v48 = vld [vmem:[#allocation5 + $0x1708] ss:$16 sps:$4 sm:$0xff]  }
 0x354   :  { %6199 = vmatprep.subr.bf16.mxu0 %v8630_v49  ;;  %v8663_v49 = vld [vmem:[#allocation8 + $0x104] ss:$8 sps:$4 sm:$0xff]  }
 0x355   :  { %5706 = vmatpush1.bf16.msra.mxu1 %v8532_v51  ;;  %v8594_v51 = vld [vmem:[#allocation5 + $0x172c] ss:$16 sps:$4 sm:$0xff]  }
 0x356   :  { %5707 = vmatprep.subr.bf16.mxu1 %v8537_v53  ;;  %v8592_v53 = vld [vmem:[#allocation5 + $0x1728] ss:$16 sps:$4 sm:$0xff]  }
 0x357   :  { %6200 = vmatpush1.bf16.msra.mxu0 %v8628_v25  ;;  %v8597_v25 = vld [vmem:[#allocation5 + $0x174c] ss:$16 sps:$4 sm:$0xff]  }
 0x358   :  { %6201 = vmatprep.subr.bf16.mxu0 %v8633_v54  ;;  %v8595_v54 = vld [vmem:[#allocation5 + $0x1748] ss:$16 sps:$4 sm:$0xff]  }
 0x359   :  { %5708 = vmatpush1.bf16.msra.mxu1 %v8535_v58  ;;  %v8600_v58 = vld [vmem:[#allocation5 + $0x176c] ss:$16 sps:$4 sm:$0xff]  }
 0x35a   :  { %5709 = vmatprep.subr.bf16.mxu1 %v8540_v59  ;;  %v8598_v59 = vld [vmem:[#allocation5 + $0x1768] ss:$16 sps:$4 sm:$0xff]  }
 0x35b   :  { %6202 = vmatpush1.bf16.msra.mxu0 %v8631_v60  ;;  %v8603_v60 = vld [vmem:[#allocation5 + $0x178c] ss:$16 sps:$4 sm:$0xff]  }
 0x35c   :  { %6203 = vmatprep.subr.bf16.mxu0 %v8636_v8  ;;  %v8601_v8 = vld [vmem:[#allocation5 + $0x1788] ss:$16 sps:$4 sm:$0xff]  }
 0x35d   :  { %5710 = vmatpush1.bf16.msra.mxu1 %v8538_v62  ;;  %v8606_v62 = vld [vmem:[#allocation5 + $0x17ac] ss:$16 sps:$4 sm:$0xff]  }
 0x35e   :  { %5711 = vmatprep.subr.bf16.mxu1 %v8543_v63  ;;  %v8604_v63 = vld [vmem:[#allocation5 + $0x17a8] ss:$16 sps:$4 sm:$0xff]  }
 0x35f   :  { %6204 = vmatpush1.bf16.msra.mxu0 %v8634_v32  ;;  %v8609_v32 = vld [vmem:[#allocation5 + $0x17cc] ss:$16 sps:$4 sm:$0xff]  }
 0x360   :  { %6205 = vmatprep.subr.bf16.mxu0 %v8639_v0  ;;  %v8607_v0 = vld [vmem:[#allocation5 + $0x17c8] ss:$16 sps:$4 sm:$0xff]  }
 0x361   :  { %5712 = vmatpush1.bf16.msra.mxu1 %v8541_v2  ;;  %v8612_v2 = vld [vmem:[#allocation5 + $0x17ec] ss:$16 sps:$4 sm:$0xff]  }
 0x362   :  { %5713 = vmatprep.subr.bf16.mxu1 %v8546_v3  ;;  %v8610_v3 = vld [vmem:[#allocation5 + $0x17e8] ss:$16 sps:$4 sm:$0xff]  }
 0x363   :  { %6206 = vmatpush1.bf16.msra.mxu0 %v8637_v4  ;;  %v933_v4 = vlaneseq }
 0x364   :  { %6207 = vmatprep.subr.bf16.mxu0 %v8642_v5 }
 0x365   :  { %5714 = vmatpush1.bf16.msra.mxu1 %v8544_v6  ;;  %v9153_v5 = vshrl.u32 %v933_v4, 7 }
 0x366   :  { %5715 = vmatprep.subr.bf16.mxu1 %v8549_v7  ;;  %v9156_v7 = vld [vmem:[#allocation7] sm:$0xf] }
 0x367   :  { %6208 = vmatpush1.bf16.msra.mxu0 %v8640_v42  ;;  %v935_v6 = vsub.s32 0, %v9153_v5  ;;  %v939_v42 = vsub.s32 1, %v9153_v5  ;;  %v943_v4 = vsub.s32 2, %v9153_v5 }
 0x368   :  { %6209 = vmatprep.subr.bf16.mxu0 %v8645_v9 }
 0x369   :  { %5716 = vmatpush1.bf16.msra.mxu1 %v8547_v12  ;;  %v936_v9 = vrot.slane %v9156_v7, %v935_v6  ;;  %v940_v12 = vrot.slane %v9156_v7, %v939_v42 }
 0x36a   :  { %5717 = vmatprep.subr.bf16.mxu1 %v8552_v13 }
 0x36b   :  { %6210 = vmatpush1.bf16.msra.mxu0 %v8643_v14  ;;  %v4828_v13 = vadd.f32 %v9093_v55, %v936_v9  ;;  %v8709_v55 = vld [vmem:[#allocation11 + $0x40] sm:$0xff]   ;;  %v947_v9 = vsub.s32 3, %v9153_v5 }
 0x36c   :  { %6211 = vmatprep.subr.bf16.mxu0 %v8648_v15 }
 0x36d   :  { %5718 = vmatpush1.bf16.msra.mxu1 %v8550_v17 }
 0x36e   :  { %5719 = vmatprep.subr.bf16.mxu1 %v8555_v18 }
 0x36f   :  { %6212 = vmatpush1.bf16.msra.mxu0 %v8646_v50 }
 0x370   :  { %6213 = vmatprep.subr.bf16.mxu0 %v8651_v19 }
 0x371   :  { %5720 = vmatpush1.bf16.msra.mxu1 %v8553_v21 }
 0x372   :  { %5721 = vmatprep.subr.bf16.mxu1 %v8558_v22 }
 0x373   :  { %6214 = vmatpush1.bf16.msra.mxu0 %v8649_v24 }
 0x374   :  { %6215 = vmatprep.subr.bf16.mxu0 %v8654_v26 }
 0x375   :  { %5722 = vmatpush1.bf16.msra.mxu1 %v8556_v27 }
 0x376   :  { %5723 = vmatprep.subr.bf16.mxu1 %v8561_v28  ;;  %v8661_v28 = vld [vmem:[#allocation8 + $0x100] ss:$8 sps:$4 sm:$0xff]  }
 0x377   :  { %6216 = vmatpush1.bf16.msra.mxu0 %v8652_v61 }
 0x378   :  { %6217 = vmatprep.subr.bf16.mxu0 %v8657_v16  ;;  %v8718_v16 = vld [vmem:[#allocation11 + $0x20] sm:$0xff]  }
 0x379   :  { %5724 = vmatpush1.bf16.msra.mxu1 %v8559_v29  ;;  %v8666_v29 = vld [vmem:[#allocation8 + $0x114] ss:$8 sps:$4 sm:$0xff]  }
 0x37a   :  { %5725 = vmatprep.subr.bf16.mxu1 %v8564_v31  ;;  %v8711_v31 = vld [vmem:[#allocation11 + $0x48] sm:$0xff]  }
 0x37d   :  { %5726 = vmatpush1.bf16.msra.mxu1 %v8562_v33  ;;  %v8664_v33 = vld [vmem:[#allocation8 + $0x110] ss:$8 sps:$4 sm:$0xff]  }
 0x37e   :  { %5736 = vmatprep.subr.bf16.mxu1 %v8567_v1  ;;  %v8669_v1 = vld [vmem:[#allocation8 + $0x124] ss:$8 sps:$4 sm:$0xff]  }
 0x380   :  { %5728 = vmatmul.mubr.bf16.vlgmr.msra.gmra.mrb[4].mxu1 %v9137_v57  ;;  %v8580_v57 = vld [vmem:[#allocation5 + $0x16a8] ss:$16 sps:$4 sm:$0xff]  }
 0x381   :  { %5737 = vmatpush1.bf16.msra.mxu1 %v8565_v35  ;;  %5768 = vmatprep.mubr.bf16.mxu1 %v9139_v30  ;;  %v8655_v30 = vld [vmem:[#allocation8 + $0xe0] ss:$8 sps:$4 sm:$0xff]  }
 0x382   :  { %5738 = vmatprep.subr.bf16.mxu1 %v8570_v52  ;;  %6218 = vmatpush1.bf16.msra.mxu0 %v8655_v30  ;;  %v8712_v35 = vld [vmem:[#allocation11 + $0x8] sm:$0xff]   ;;  %v8713_v52 = vld [vmem:[#allocation11 + $0x50] sm:$0xff]  }
 0x383   :  { %6219 = vmatprep.subr.bf16.mxu0 %v8660_v44  ;;  %v8719_v30 = vld [vmem:[#allocation11 + $0x68] sm:$0xff]  }
 0x384   :  { %v8720_v44 = vld [vmem:[#allocation11 + $0x28] sm:$0xff]  }
 0x385   :  { %5739 = vmatpush1.bf16.msra.mxu1 %v8568_v37  ;;  %v8667_v37 = vld [vmem:[#allocation8 + $0x120] ss:$8 sps:$4 sm:$0xff]  }
 0x386   :  { %5740 = vmatprep.subr.bf16.mxu1 %v8573_v11  ;;  %6220 = vmatpush1.bf16.msra.mxu0 %v8658_v45  ;;  %v8672_v11 = vld [vmem:[#allocation8 + $0x134] ss:$8 sps:$4 sm:$0xff]   ;;  %v8679_v45 = vld [vmem:[#allocation8 + $0x160] ss:$8 sps:$4 sm:$0xff]  }
 0x387   :  { %6230 = vmatprep.subr.bf16.mxu0 %v8663_v49  ;;  %v8685_v49 = vld [vmem:[#allocation8 + $0x180] ss:$8 sps:$4 sm:$0xff]  }
 0x389   :  { %5741 = vmatpush1.bf16.msra.mxu1 %v8571_v38  ;;  %v8714_v38 = vld [vmem:[#allocation11 + $0x10] sm:$0xff]  }
 0x38a   :  { %5742 = vmatprep.subr.bf16.mxu1 %v8576_v39  ;;  %v8715_v39 = vld [vmem:[#allocation11 + $0x58] sm:$0xff]  }
 0x38d   :  { %5743 = vmatpush1.bf16.msra.mxu1 %v8574_v40  ;;  %v8670_v40 = vld [vmem:[#allocation8 + $0x130] ss:$8 sps:$4 sm:$0xff]  }
 0x38e   :  { %5744 = vmatprep.subr.bf16.mxu1 %v8579_v41  ;;  %v8675_v41 = vld [vmem:[#allocation8 + $0x144] ss:$8 sps:$4 sm:$0xff]  }
 0x391   :  { %5745 = vmatpush1.bf16.msra.mxu1 %v8577_v36  ;;  %v8716_v36 = vld [vmem:[#allocation11 + $0x18] sm:$0xff]  }
 0x392   :  { %5746 = vmatprep.subr.bf16.mxu1 %v8582_v10  ;;  %v8717_v10 = vld [vmem:[#allocation11 + $0x60] sm:$0xff]  }
 0x395   :  { %5747 = vmatpush1.bf16.msra.mxu1 %v8580_v57  ;;  %v8673_v57 = vld [vmem:[#allocation8 + $0x140] ss:$8 sps:$4 sm:$0xff]  }
 0x396   :  { %5748 = vmatprep.subr.bf16.mxu1 %v8585_v46  ;;  %v8678_v46 = vld [vmem:[#allocation8 + $0x154] ss:$8 sps:$4 sm:$0xff]  }
 0x399   :  { %5749 = vmatpush1.bf16.msra.mxu1 %v8583_v43  ;;  %v8676_v43 = vld [vmem:[#allocation8 + $0x150] ss:$8 sps:$4 sm:$0xff]  }
 0x39a   :  { %5750 = vmatprep.subr.bf16.mxu1 %v8588_v20  ;;  %v8681_v20 = vld [vmem:[#allocation8 + $0x164] ss:$8 sps:$4 sm:$0xff]  }
 0x39d   :  { %5751 = vmatpush1.bf16.msra.mxu1 %v8586_v47  ;;  %v8684_v47 = vld [vmem:[#allocation8 + $0x174] ss:$8 sps:$4 sm:$0xff]  }
 0x39e   :  { %5752 = vmatprep.subr.bf16.mxu1 %v8591_v23  ;;  %v8682_v23 = vld [vmem:[#allocation8 + $0x170] ss:$8 sps:$4 sm:$0xff]  }
 0x3a1   :  { %5753 = vmatpush1.bf16.msra.mxu1 %v8589_v48  ;;  %v8687_v48 = vld [vmem:[#allocation8 + $0x184] ss:$8 sps:$4 sm:$0xff]  }
 0x3a2   :  { %5754 = vmatprep.subr.bf16.mxu1 %v8594_v51  ;;  %v8690_v51 = vld [vmem:[#allocation8 + $0x194] ss:$8 sps:$4 sm:$0xff]  }
 0x3a5   :  { %5755 = vmatpush1.bf16.msra.mxu1 %v8592_v53  ;;  %v8688_v53 = vld [vmem:[#allocation8 + $0x190] ss:$8 sps:$4 sm:$0xff]  }
 0x3a6   :  { %5756 = vmatprep.subr.bf16.mxu1 %v8597_v25  ;;  %v8693_v25 = vld [vmem:[#allocation8 + $0x1a4] ss:$8 sps:$4 sm:$0xff]  }
 0x3a9   :  { %5757 = vmatpush1.bf16.msra.mxu1 %v8595_v54  ;;  %v8691_v54 = vld [vmem:[#allocation8 + $0x1a0] ss:$8 sps:$4 sm:$0xff]  }
 0x3aa   :  { %5758 = vmatprep.subr.bf16.mxu1 %v8600_v58  ;;  %v8696_v58 = vld [vmem:[#allocation8 + $0x1b4] ss:$8 sps:$4 sm:$0xff]  }
 0x3ad   :  { %5759 = vmatpush1.bf16.msra.mxu1 %v8598_v59  ;;  %v8694_v59 = vld [vmem:[#allocation8 + $0x1b0] ss:$8 sps:$4 sm:$0xff]  }
 0x3ae   :  { %5760 = vmatprep.subr.bf16.mxu1 %v8603_v60  ;;  %v8699_v60 = vld [vmem:[#allocation8 + $0x1c4] ss:$8 sps:$4 sm:$0xff]  }
 0x3b1   :  { %5761 = vmatpush1.bf16.msra.mxu1 %v8601_v8  ;;  %v8697_v8 = vld [vmem:[#allocation8 + $0x1c0] ss:$8 sps:$4 sm:$0xff]  }
 0x3b2   :  { %5762 = vmatprep.subr.bf16.mxu1 %v8606_v62  ;;  %v8702_v62 = vld [vmem:[#allocation8 + $0x1d4] ss:$8 sps:$4 sm:$0xff]  }
 0x3b5   :  { %5763 = vmatpush1.bf16.msra.mxu1 %v8604_v63  ;;  %v8700_v63 = vld [vmem:[#allocation8 + $0x1d0] ss:$8 sps:$4 sm:$0xff]  }
 0x3b6   :  { %5764 = vmatprep.subr.bf16.mxu1 %v8609_v32  ;;  %v8705_v32 = vld [vmem:[#allocation8 + $0x1e4] ss:$8 sps:$4 sm:$0xff]  }
 0x3b9   :  { %5765 = vmatpush1.bf16.msra.mxu1 %v8607_v0  ;;  %v8703_v0 = vld [vmem:[#allocation8 + $0x1e0] ss:$8 sps:$4 sm:$0xff]  }
 0x3ba   :  { %5766 = vmatprep.subr.bf16.mxu1 %v8612_v2  ;;  %v8708_v2 = vld [vmem:[#allocation8 + $0x1f4] ss:$8 sps:$4 sm:$0xff]  }
 0x3bd   :  { %5767 = vmatpush1.bf16.msra.mxu1 %v8610_v3  ;;  %v8706_v3 = vld [vmem:[#allocation8 + $0x1f0] ss:$8 sps:$4 sm:$0xff]  }
 0x3be   :  { %7329 = vmatprep.subr.bf16.mxu1 %v8709_v55  ;;  %v5857_v55 = vld [vmem:[#allocation10] sm:$0x3] }
 0x3c0   :  { %5769 = vmatmul.mubr.bf16.vlgmr.msra.gmra.mrb[4].mxu1 %v9145_v34  ;;  %v4830_v34 = vadd.f32 %v9095_v56, %v940_v12  ;;  %v8710_v56 = vld [vmem:[#allocation11] sm:$0xff]   ;;  %v944_v12 = vrot.slane %v9156_v7, %v943_v4 }
 0x3c1   :  { %7330 = vmatpush3.bf16.msra.mxu1 %v8710_v56  ;;  %v5862_v56 = vrot.slane %v5857_v55, %v935_v6 }
 0x3c2   :  { %7331 = vmatprep.subr.bf16.mxu1 %v8711_v31  ;;  %v5866_v31 = vrot.slane %v5857_v55, %v939_v42 }
 0x3c5   :  { %7332 = vmatpush3.bf16.msra.mxu1 %v8712_v35 }
 0x3c6   :  { %7333 = vmatprep.subr.bf16.mxu1 %v8713_v52 }
 0x3c9   :  { %7334 = vmatpush3.bf16.msra.mxu1 %v8714_v38 }
 0x3ca   :  { %7335 = vmatprep.subr.bf16.mxu1 %v8715_v39 }
 0x3cd   :  { %7336 = vmatpush3.bf16.msra.mxu1 %v8716_v36 }
 0x3ce   :  { %7337 = vmatprep.subr.bf16.mxu1 %v8717_v10 }
 0x3d1   :  { %7338 = vmatpush3.bf16.msra.mxu1 %v8718_v16 }
 0x3d2   :  { %7339 = vmatprep.subr.bf16.mxu1 %v8719_v30 }
 0x3d5   :  { %7340 = vmatpush3.bf16.msra.mxu1 %v8720_v44 }
 0x414   :  { %v5278_v14 = vpop.f32.mrb[0].mxu0 }
 0x415   :  { %v7352_v15 = vadd.f32 %v5278_v14, %v4828_v13  ;;  %v5280_v17 = vpop.f32.mrb[1].mxu0  ;;  %v948_v13 = vrot.slane %v9156_v7, %v947_v9  ;;  %v8723_v7 = vld [vmem:[#allocation11 + $0x78] sm:$0xff]  }
 0x416   :  { %v7354_v18 = vadd.f32 %v5280_v17, %v4830_v34  ;;  %v5282_v50 = vpop.f32.mrb[2].mxu0 }
 0x417   :  { %vm5777_vm0 = vcmp.gt.f32.partialorder %v7352_v15, 0.0  ;;  %v5781_v19 = vmul.f32 0.2, %v7352_v15  ;;  %v5283_v21 = vpop.f32.mrb[3].mxu0 }
 0x418   :  { %vm5778_vm1 = vcmp.gt.f32.partialorder %v7354_v18, 0.0  ;;  %v5782_v22 = vmul.f32 0.2, %v7354_v18 }
 0x419   :  { %v5785_v24 = vsel %vm5777_vm0, %v7352_v15, %v5781_v19 }
 0x41a   :  { %v5786_v26 = vsel %vm5778_vm1, %v7354_v18, %v5782_v22  ;;  %v5789_v61 = vpack.c.bf16 %v5785_v24, %v5785_v24 }
 0x41b   :  { %v5790_v27 = vpack.c.bf16 %v5786_v26, %v5786_v26 }
 0x41d   :  { %6221 = vmatprep.mubr.bf16.mxu0 %v5790_v27 }
 0x41e   :  { %6222 = vmatmul.mubr.bf16.vlgmr.msra.gmra.mrb[4].mxu0 %v5789_v61  ;;  %v8722_v61 = vld [vmem:[#allocation11 + $0x30] sm:$0xff]  }
 0x41f   :  { %6231 = vmatpush1.bf16.msra.mxu0 %v8661_v28  ;;  %v8721_v28 = vld [vmem:[#allocation11 + $0x70] sm:$0xff]  }
 0x420   :  { %6232 = vmatprep.subr.bf16.mxu0 %v8666_v29  ;;  %7341 = vmatprep.subr.bf16.mxu1 %v8721_v28  ;;  %v8724_v29 = vld [vmem:[#allocation11 + $0x38] sm:$0xff]  }
 0x421   :  { %7342 = vmatpush3.bf16.msra.mxu1 %v8722_v61 }
 0x422   :  { %7343 = vmatprep.subr.bf16.mxu1 %v8723_v7 }
 0x423   :  { %6233 = vmatpush1.bf16.msra.mxu0 %v8664_v33 }
 0x424   :  { %6234 = vmatprep.subr.bf16.mxu0 %v8669_v1 }
 0x425   :  { %7344 = vmatpush3.bf16.msra.mxu1 %v8724_v29 }
 0x427   :  { %6235 = vmatpush1.bf16.msra.mxu0 %v8667_v37 }
 0x428   :  { %6236 = vmatprep.subr.bf16.mxu0 %v8672_v11 }
 0x42b   :  { %6237 = vmatpush1.bf16.msra.mxu0 %v8670_v40 }
 0x42c   :  { %6238 = vmatprep.subr.bf16.mxu0 %v8675_v41 }
 0x42f   :  { %6239 = vmatpush1.bf16.msra.mxu0 %v8673_v57  ;;  %v7311_v57 = vld [vmem:[#allocation13] ss:$0 sm:$0xff] }
 0x430   :  { %6240 = vmatprep.subr.bf16.mxu0 %v8678_v46 }
 0x433   :  { %6241 = vmatpush1.bf16.msra.mxu0 %v8676_v43 }
 0x434   :  { %6242 = vmatprep.subr.bf16.mxu0 %v8681_v20 }
 0x437   :  { %6243 = vmatpush1.bf16.msra.mxu0 %v8679_v45 }
 0x438   :  { %6244 = vmatprep.subr.bf16.mxu0 %v8684_v47 }
 0x43b   :  { %6245 = vmatpush1.bf16.msra.mxu0 %v8682_v23 }
 0x43c   :  { %6246 = vmatprep.subr.bf16.mxu0 %v8687_v48 }
 0x43f   :  { %6247 = vmatpush1.bf16.msra.mxu0 %v8685_v49 }
 0x440   :  { %6248 = vmatprep.subr.bf16.mxu0 %v8690_v51 }
 0x443   :  { %6249 = vmatpush1.bf16.msra.mxu0 %v8688_v53 }
 0x444   :  { %6250 = vmatprep.subr.bf16.mxu0 %v8693_v25 }
 0x447   :  { %6251 = vmatpush1.bf16.msra.mxu0 %v8691_v54 }
 0x448   :  { %6252 = vmatprep.subr.bf16.mxu0 %v8696_v58 }
 0x44b   :  { %6253 = vmatpush1.bf16.msra.mxu0 %v8694_v59 }
 0x44c   :  { %6254 = vmatprep.subr.bf16.mxu0 %v8699_v60 }
 0x44f   :  { %6255 = vmatpush1.bf16.msra.mxu0 %v8697_v8 }
 0x450   :  { %6256 = vmatprep.subr.bf16.mxu0 %v8702_v62 }
 0x453   :  { %6257 = vmatpush1.bf16.msra.mxu0 %v8700_v63 }
 0x454   :  { %6258 = vmatprep.subr.bf16.mxu0 %v8705_v32 }
 0x457   :  { %6259 = vmatpush1.bf16.msra.mxu0 %v8703_v0 }
 0x458   :  { %6260 = vmatprep.subr.bf16.mxu0 %v8708_v2 }
 0x45b   :  { %6261 = vmatpush1.bf16.msra.mxu0 %v8706_v3 }
 0x493   :  { %v5770_v34 = vpop.f32.mrb[4].mxu1 }
 0x494   :  { %v7355_v14 = vadd.f32 %v5770_v34, %v944_v12  ;;  %v5772_v15 = vpop.f32.mrb[5].mxu1 }
 0x495   :  { %v7356_v17 = vadd.f32 %v5772_v15, %v948_v13  ;;  %v5774_v18 = vpop.f32.mrb[6].mxu1 }
 0x496   :  { %vm5779_vm2 = vcmp.gt.f32.partialorder %v7355_v14, 0.0  ;;  %v5783_v50 = vmul.f32 0.2, %v7355_v14  ;;  %v5775_v19 = vpop.f32.mrb[7].mxu1 }
 0x497   :  { %vm5780_vm3 = vcmp.gt.f32.partialorder %v7356_v17, 0.0  ;;  %v5784_v21 = vmul.f32 0.2, %v7356_v17 }
 0x498   :  { %v5787_v22 = vsel %vm5779_vm2, %v7355_v14, %v5783_v50 }
 0x499   :  { %v5788_v24 = vsel %vm5780_vm3, %v7356_v17, %v5784_v21  ;;  %v5791_v27 = vpack.c.bf16 %v5787_v22, %v5787_v22 }
 0x49a   :  { %v5792_v26 = vpack.c.bf16 %v5788_v24, %v5788_v24 }
 0x49c   :  { %6262 = vmatprep.mubr.bf16.mxu0 %v5792_v26 }
 0x49d   :  { %6263 = vmatmul.mubr.bf16.vlgmr.msra.gmra.mrb[4].mxu0 %v5791_v27 }
 0x570   :  { %v6264_v33 = vpop.f32.mrb[4].mxu0 }
 0x571   :  { %v7357_v1 = vadd.f32 %v6264_v33, %v5862_v56  ;;  %v6266_v35 = vpop.f32.mrb[5].mxu0 }
 0x572   :  { %v7358_v52 = vadd.f32 %v6266_v35, %v5866_v31  ;;  %v6268_v37 = vpop.f32.mrb[6].mxu0 }
 0x573   :  { %vm6271_vm4 = vcmp.gt.f32.partialorder %v7357_v1, 0.0  ;;  %v6273_v11 = vmul.f32 0.2, %v7357_v1  ;;  %v6269_v38 = vpop.f32.mrb[7].mxu0 }
 0x574   :  { %vm6272_vm5 = vcmp.gt.f32.partialorder %v7358_v52, 0.0  ;;  %v6274_v39 = vmul.f32 0.2, %v7358_v52 }
 0x575   :  { %v6275_v40 = vsel %vm6271_vm4, %v7357_v1, %v6273_v11 }
 0x576   :  { %v6276_v41 = vsel %vm6272_vm5, %v7358_v52, %v6274_v39  ;;  %v6277_v10 = vpack.c.bf16 %v6275_v40, %v6275_v40 }
 0x577   :  { %v6278_v36 = vpack.c.bf16 %v6276_v41, %v6276_v41 }
 0x579   :  { %6446 = vmatprep.mubr.bf16.mxu1 %v6278_v36 }
 0x57a   :  { %6447 = vmatmul.mubr.bf16.vlgmr.msra.gmra.mrb[8].mxu1 %v6277_v10 }
 0x64d   :  { %v7345_v6 = vpop.f32.mrb[8].mxu1 }
 0x64e   :  { %v7346_v5 = vpop.f32.mrb[9].mxu1 }
 0x64f   :  { %v7347_v42 = vadd.f32 %v7346_v5, %v7345_v6  ;;  %v7348_v46 = vpop.f32.mrb[10].mxu1 }
 0x650   :  { %v7349_v16 = vpop.f32.mrb[11].mxu1 }
 0x651   :  { %v6449_v30 = vadd.f32 %v7347_v42, %v7311_v57 }
 0x653   :  { %v7328_v43 = vmul.f32 -1.442695, %v6449_v30 }
 0x655   :  { %8725 = vpow2.f32 %v7328_v43 }
 0x65f   :  { %v8726_v20 = vpop.eup %8725 }
 0x660   :  { %v6457_v44 = vadd.f32 1.0, %v8726_v20 }
 0x662   :  { %8727 = vrcp.f32 %v6457_v44 }
 0x66c   :  { %v8728_v45 = vpop.eup %8727 }
 0x66d   :  { %6460 = vst [vmem:[#allocation14] sm:$0xff] %v8728_v45 }
 0x66e   :  { %8894 = shalt.err (!%p8891_p4)
}
 0x66f   :  { %s8895_s15 = scalar_lea.hbm %s9194_s7, 128 }
 0x670   :  { %p8896_p5 = scmp.ne.s32.totalorder %s9194_s7, %s8895_s15  ;;  %p8899_p6 = scmp.lt.u32.totalorder %s8895_s15, %s9194_s7 }
 0x672   :  { %p8901_p7 = pnand %p8899_p6, %p8896_p5 }
 0x674   :  { %8904 = shalt.err (!%p8901_p7)
}
 0x675   :  { %6470 = dma.vmem_to_hbm [thread:$0]  %s6468_s13, 128, %s9194_s7, [#allocation4]  }
 0x676   :  { %8913 = dma.done.wait [#allocation4], 128  }
 0x677   :  { %8914 = vsyncadd [#allocation4], 4294967168 }
 0x678   :  { %6474 = vsyncpa [#allocation3], 1 }
 0x679   :  { %6475 = vsyncpa [#allocation6], 1 }
 0x67a   :  { %6476 = vsyncpa [#allocation9], 1 }
 0x67b   :  { %6477 = vsyncpa [#allocation12], 1 }
 0x67c   :  { %6478 = vsyncpa [#allocation4], 1 }

</bundles_post_ra>
